<compile_context>
chip_gen: v7x
topology: tpu7x:2x2x1
jax: 0.10.0
libtpu: 0.0.40
codegen_flags: <defaults>
</compile_context>

<pallas_src>
import jax
import jax.numpy as jnp
from jax.experimental import pallas as pl
from jax.experimental.pallas import tpu as pltpu

Z_DIM = 32          # z_dim of the MLP head (as in the previously reviewed kernel)
HIDDEN = 400        # hidden width from the module definition
OUT = 2             # final Linear(400, 2)
OUT_PAD = 128       # lane-dense padded output width
NUM_LAYERS = 6
NEG_SLOPE = 0.2     # LeakyReLU(0.2)
SUBLANE = 16        # bf16 sublane packing -> batch tiles are multiples of 16


def _round_up(x, m):
    return ((x + m - 1) // m) * m


def _cdiv(a, b):
    return (a + b - 1) // b


def _device_info():
    """(tb_max, num_tensorcores) for the local device generation."""
    kind = ""
    try:
        kind = jax.devices()[0].device_kind.lower()
    except Exception:
        pass
    if "v7" in kind:
        return 1024, 2              # 2 TCs/chip; big tile amortizes step overhead
    if "v6" in kind:
        return 1024, 1
    if "v4" in kind or "v5p" in kind:
        return 512, 2               # megacore parts
    return 512, 1                   # v5e / unknown: conservative tile


# ----------------------------------------------------------------------------
# Kernel
# ----------------------------------------------------------------------------
def _make_kernel(has_scale):
    """Build the MLP kernel for a given per-layer parameter layout.

    has_scale[i] == False -> layer i params are (w_bf16[in,out], b_f32[1,out])
    has_scale[i] == True  -> layer i params are (w_int8[in,out],
                                                 scale_f32[1,out], b_f32[1,out])
    Kernel signature: (z_ref, *flat_param_refs, out_ref).
    """
    def kernel(z_ref, *refs):
        out_ref = refs[-1]
        params = refs[:-1]
        h = z_ref[...]                                   # (TB, Z_DIM) bf16
        idx = 0
        for layer in range(NUM_LAYERS):
            w = params[idx][...]
            idx += 1
            scale = None
            if has_scale[layer]:
                scale = params[idx][...]                 # (1, out) f32
                idx += 1
            b = params[idx][...]                         # (1, out) f32
            idx += 1
            # bf16 operands on the MXU, f32 accumulation.
            acc = jnp.dot(h.astype(jnp.bfloat16), w.astype(jnp.bfloat16),
                          preferred_element_type=jnp.float32)
            if scale is not None:
                acc = acc * scale                        # per-channel dequant (VPU)
            h = acc + b
            if layer < NUM_LAYERS - 1:
                # LeakyReLU(0.2) as a single vmul + vmax on the VPU.
                h = jnp.maximum(h, NEG_SLOPE * h)
        out_ref[...] = h.astype(out_ref.dtype)           # (TB, OUT_PAD)
    return kernel


# ----------------------------------------------------------------------------
# Parameters
# ----------------------------------------------------------------------------
def make_params(key, z_dim=Z_DIM):
    """normal_init: W ~ N(0, 0.02), b = 0 (matches weight_init(mode='normal'))."""
    dims = [z_dim, HIDDEN, HIDDEN, HIDDEN, HIDDEN, HIDDEN, OUT]
    params = []
    for i in range(NUM_LAYERS):
        key, wkey = jax.random.split(key)
        w = 0.02 * jax.random.normal(wkey, (dims[i], dims[i + 1]), dtype=jnp.float32)
        b = jnp.zeros((1, dims[i + 1]), dtype=jnp.float32)
        params += [w, b]
    return params


def prepare_params(params_f32, *, int8_hidden=False):
    """One-time prep of kernel-resident parameters.

    - weights stored bf16 (intentional precision choice; f32 accumulation kept),
      last layer zero-padded 2 -> 128 output lanes for lane-dense stores.
    - int8_hidden=True: the 400x400 hidden weights are stored as int8 with a
      per-output-channel f32 scale (applied after the f32 MXU accumulation).
      Halves the dominant weight HBM stream for small-batch inference on
      v5e/v6e; harmless elsewhere since the MXU still sees bf16 operands.
    Returns (flat_params, has_scale) where has_scale drives the kernel layout.
    """
    prepared, has_scale = [], []
    for layer in range(NUM_LAYERS):
        w = params_f32[2 * layer]
        b = params_f32[2 * layer + 1]
        if layer == NUM_LAYERS - 1:
            w = jnp.pad(w, ((0, 0), (0, OUT_PAD - OUT)))
            b = jnp.pad(b, ((0, 0), (0, OUT_PAD - OUT)))
        if int8_hidden and w.shape == (HIDDEN, HIDDEN):
            s = jnp.max(jnp.abs(w), axis=0, keepdims=True) / 127.0   # (1, out)
            s = jnp.maximum(s, 1e-12)
            wq = jnp.clip(jnp.round(w / s), -127, 127).astype(jnp.int8)
            prepared += [wq, s.astype(jnp.float32), b.astype(jnp.float32)]
            has_scale.append(True)
        else:
            prepared += [w.astype(jnp.bfloat16), b.astype(jnp.float32)]
            has_scale.append(False)
    return prepared, tuple(has_scale)


# ----------------------------------------------------------------------------
# Wrapper
# ----------------------------------------------------------------------------
def _const_spec(shape, single_buffer):
    """Constant block index -> fetched into VMEM once, resident across tiles.
    Single-buffered when supported: a second buffer for never-changing data is
    wasted VMEM headroom."""
    if single_buffer and hasattr(pl, "Buffered"):
        return pl.BlockSpec(shape, lambda i: (0, 0),
                            pipeline_mode=pl.Buffered(buffer_count=1))
    return pl.BlockSpec(shape, lambda i: (0, 0))


def mlp_forward(z, prepared_params, has_scale, *, tb_max=None, num_cores=None):
    """z: [B, z_dim] f32 -> squeezed logits (matches net(z).squeeze())."""
    B = z.shape[0]
    if tb_max is None or num_cores is None:
        d_tb, d_nc = _device_info()
        tb_max = d_tb if tb_max is None else tb_max
        num_cores = d_nc if num_cores is None else num_cores

    # Balanced tiles: pad batch to a multiple of 16 (bf16 sublane packing),
    # split into the fewest tiles of <= tb_max rows, then even them out.
    b16 = _round_up(max(B, SUBLANE), SUBLANE)
    n_tiles = _cdiv(b16, tb_max)
    if num_cores > 1 and n_tiles < num_cores and b16 >= num_cores * SUBLANE:
        n_tiles = num_cores                    # keep both v7x TensorCores busy
    tb = _round_up(_cdiv(b16, n_tiles), SUBLANE)
    b_pad = tb * n_tiles

    zb = z.astype(jnp.bfloat16)                # halve the z DMA; MXU takes bf16
    if b_pad != B:
        zb = jnp.pad(zb, ((0, b_pad - B), (0, 0)))

    kernel = _make_kernel(has_scale)
    grid = (n_tiles,)

    def call(single_buffer_consts):
        # z / out tiles move with the grid; weights, scales & biases use a
        # constant block index so they are fetched into VMEM exactly once.
        in_specs = [pl.BlockSpec((tb, Z_DIM), lambda i: (i, 0))]
        for p in prepared_params:
            in_specs.append(_const_spec(p.shape, single_buffer_consts))
        out_specs = pl.BlockSpec((tb, OUT_PAD), lambda i: (i, 0))
        return pl.pallas_call(
            kernel,
            out_shape=jax.ShapeDtypeStruct((b_pad, OUT_PAD), jnp.float32),
            grid=grid,
            in_specs=in_specs,
            out_specs=out_specs,
            compiler_params=pltpu.CompilerParams(
                dimension_semantics=("parallel",),   # batch tiles across TCs
            ),
        )(zb, *prepared_params)

    try:
        out = call(True)                       # single-buffer resident params
    except Exception:                          # Buffered(1) unsupported -> default
        out = call(False)

    out = out[:B, :OUT]
    # PyTorch .squeeze(): drops size-1 dims (no-op for B>1, -> (2,) for B==1)
    return jnp.squeeze(out)


# ----------------------------------------------------------------------------
# Reference (mirrors the kernel's dtype recipe exactly, so comparison is tight)
# ----------------------------------------------------------------------------
def ref_forward(z, prepared_params, has_scale):
    h = z.astype(jnp.bfloat16)
    idx = 0
    for layer in range(NUM_LAYERS):
        w = prepared_params[idx]; idx += 1
        scale = None
        if has_scale[layer]:
            scale = prepared_params[idx]; idx += 1
        b = prepared_params[idx]; idx += 1
        acc = jnp.dot(h.astype(jnp.bfloat16), w.astype(jnp.bfloat16),
                      preferred_element_type=jnp.float32)
        if scale is not None:
            acc = acc * scale
        h = acc + b
        if layer < NUM_LAYERS - 1:
            h = jnp.maximum(h, NEG_SLOPE * h)
    return h[:, :OUT]


if __name__ == "__main__":
    key = jax.random.PRNGKey(0)
    pkey, zkey, zkey2 = jax.random.split(key, 3)

    params = make_params(pkey, Z_DIM)
    z = jax.random.normal(zkey, (2, Z_DIM), dtype=jnp.float32)         # batch=2

    # --- default bf16-weight path ------------------------------------------
    prepared, has_scale = prepare_params(params)
    logits = mlp_forward(z, prepared, has_scale)
    jax.block_until_ready(logits)
    ref = jnp.squeeze(ref_forward(z, prepared, has_scale))
    assert logits.shape == (2, OUT), logits.shape
    assert jnp.allclose(logits, ref, atol=1e-2, rtol=1e-2), (logits, ref)

    # --- int8-stored hidden weights (small-batch weight-bandwidth path) ----
    prepared_q, has_scale_q = prepare_params(params, int8_hidden=True)
    logits_q = mlp_forward(z, prepared_q, has_scale_q)
    jax.block_until_ready(logits_q)
    ref_q = jnp.squeeze(ref_forward(z, prepared_q, has_scale_q))
    assert logits_q.shape == (2, OUT), logits_q.shape
    assert jnp.allclose(logits_q, ref_q, atol=1e-2, rtol=1e-2), (logits_q, ref_q)

    # --- multi-tile / balanced-tiling path (forced small tile, 2-core split)
    z50 = jax.random.normal(zkey2, (50, Z_DIM), dtype=jnp.float32)     # batch=50
    logits50 = mlp_forward(z50, prepared, has_scale, tb_max=16, num_cores=2)
    jax.block_until_ready(logits50)
    ref50 = ref_forward(z50, prepared, has_scale)
    assert logits50.shape == (50, OUT), logits50.shape
    assert jnp.allclose(logits50, ref50, atol=1e-2, rtol=1e-2)

    print("KERNEL_OK")
</pallas_src>

<mosaic_0001>
module attributes {stable_mosaic.version = 11 : i64} {
  func.func @kernel(%arg0: i32, %arg1: memref<16x32xbf16, #tpu.memory_space<vmem>>, %arg2: memref<32x400xbf16, #tpu.memory_space<vmem>>, %arg3: memref<1x400xf32, #tpu.memory_space<vmem>>, %arg4: memref<400x400xbf16, #tpu.memory_space<vmem>>, %arg5: memref<1x400xf32, #tpu.memory_space<vmem>>, %arg6: memref<400x400xbf16, #tpu.memory_space<vmem>>, %arg7: memref<1x400xf32, #tpu.memory_space<vmem>>, %arg8: memref<400x400xbf16, #tpu.memory_space<vmem>>, %arg9: memref<1x400xf32, #tpu.memory_space<vmem>>, %arg10: memref<400x400xbf16, #tpu.memory_space<vmem>>, %arg11: memref<1x400xf32, #tpu.memory_space<vmem>>, %arg12: memref<400x128xbf16, #tpu.memory_space<vmem>>, %arg13: memref<1x128xf32, #tpu.memory_space<vmem>>, %arg14: memref<16x128xf32, #tpu.memory_space<vmem>>) attributes {dimension_semantics = [#tpu.dimension_semantics<parallel>], iteration_bounds = array<i64: 1>, scalar_prefetch = 0 : i64, scratch_operands = 0 : i64, tpu.core_type = #tpu.core_type<tc>, window_params = [{transform_indices = @transform_0, window_bounds = array<i64: 16, 32>}, {pipeline_mode = #tpu.pipeline_mode<synchronous>, transform_indices = @transform_1, window_bounds = array<i64: 32, 400>}, {pipeline_mode = #tpu.pipeline_mode<synchronous>, transform_indices = @transform_2, window_bounds = array<i64: 1, 400>}, {pipeline_mode = #tpu.pipeline_mode<synchronous>, transform_indices = @transform_3, window_bounds = array<i64: 400, 400>}, {pipeline_mode = #tpu.pipeline_mode<synchronous>, transform_indices = @transform_4, window_bounds = array<i64: 1, 400>}, {pipeline_mode = #tpu.pipeline_mode<synchronous>, transform_indices = @transform_5, window_bounds = array<i64: 400, 400>}, {pipeline_mode = #tpu.pipeline_mode<synchronous>, transform_indices = @transform_6, window_bounds = array<i64: 1, 400>}, {pipeline_mode = #tpu.pipeline_mode<synchronous>, transform_indices = @transform_7, window_bounds = array<i64: 400, 400>}, {pipeline_mode = #tpu.pipeline_mode<synchronous>, transform_indices = @transform_8, window_bounds = array<i64: 1, 400>}, {pipeline_mode = #tpu.pipeline_mode<synchronous>, transform_indices = @transform_9, window_bounds = array<i64: 400, 400>}, {pipeline_mode = #tpu.pipeline_mode<synchronous>, transform_indices = @transform_10, window_bounds = array<i64: 1, 400>}, {pipeline_mode = #tpu.pipeline_mode<synchronous>, transform_indices = @transform_11, window_bounds = array<i64: 400, 128>}, {pipeline_mode = #tpu.pipeline_mode<synchronous>, transform_indices = @transform_12, window_bounds = array<i64: 1, 128>}, {transform_indices = @transform_13, window_bounds = array<i64: 16, 128>}]} {
    %c0 = arith.constant 0 : index
    %c0_0 = arith.constant 0 : index
    %0 = vector.load %arg1[%c0, %c0_0] : memref<16x32xbf16, #tpu.memory_space<vmem>>, vector<16x32xbf16>
    %c0_1 = arith.constant 0 : index
    %c0_2 = arith.constant 0 : index
    %1 = vector.load %arg2[%c0_1, %c0_2] : memref<32x400xbf16, #tpu.memory_space<vmem>>, vector<32x400xbf16>
    %c0_3 = arith.constant 0 : index
    %c0_4 = arith.constant 0 : index
    %2 = vector.load %arg3[%c0_3, %c0_4] : memref<1x400xf32, #tpu.memory_space<vmem>>, vector<1x400xf32>
    %cst = arith.constant dense<0.000000e+00> : vector<16x400xf32>
    %3 = tpu.matmul %0, %1, %cst {dimension_numbers = #tpu.dot_dimension_numbers<[1], [0], [0], [1], [0, 0, 1, 1], [], []>} : vector<16x32xbf16>, vector<32x400xbf16>, vector<16x400xf32> -> vector<16x400xf32>
    %4 = vector.broadcast %2 : vector<1x400xf32> to vector<16x400xf32>
    %5 = arith.addf %3, %4 : vector<16x400xf32>
    %cst_5 = arith.constant 2.000000e-01 : f32
    %6 = vector.broadcast %cst_5 : f32 to vector<16x400xf32>
    %7 = arith.mulf %6, %5 : vector<16x400xf32>
    %8 = arith.maximumf %5, %7 : vector<16x400xf32>
    %c0_6 = arith.constant 0 : index
    %c0_7 = arith.constant 0 : index
    %9 = vector.load %arg4[%c0_6, %c0_7] : memref<400x400xbf16, #tpu.memory_space<vmem>>, vector<400x400xbf16>
    %c0_8 = arith.constant 0 : index
    %c0_9 = arith.constant 0 : index
    %10 = vector.load %arg5[%c0_8, %c0_9] : memref<1x400xf32, #tpu.memory_space<vmem>>, vector<1x400xf32>
    %11 = arith.truncf %8 : vector<16x400xf32> to vector<16x400xbf16>
    %cst_10 = arith.constant dense<0.000000e+00> : vector<16x400xf32>
    %12 = tpu.matmul %11, %9, %cst_10 {dimension_numbers = #tpu.dot_dimension_numbers<[1], [0], [0], [1], [0, 0, 1, 1], [], []>} : vector<16x400xbf16>, vector<400x400xbf16>, vector<16x400xf32> -> vector<16x400xf32>
    %13 = vector.broadcast %10 : vector<1x400xf32> to vector<16x400xf32>
    %14 = arith.addf %12, %13 : vector<16x400xf32>
    %cst_11 = arith.constant 2.000000e-01 : f32
    %15 = vector.broadcast %cst_11 : f32 to vector<16x400xf32>
    %16 = arith.mulf %15, %14 : vector<16x400xf32>
    %17 = arith.maximumf %14, %16 : vector<16x400xf32>
    %c0_12 = arith.constant 0 : index
    %c0_13 = arith.constant 0 : index
    %18 = vector.load %arg6[%c0_12, %c0_13] : memref<400x400xbf16, #tpu.memory_space<vmem>>, vector<400x400xbf16>
    %c0_14 = arith.constant 0 : index
    %c0_15 = arith.constant 0 : index
    %19 = vector.load %arg7[%c0_14, %c0_15] : memref<1x400xf32, #tpu.memory_space<vmem>>, vector<1x400xf32>
    %20 = arith.truncf %17 : vector<16x400xf32> to vector<16x400xbf16>
    %cst_16 = arith.constant dense<0.000000e+00> : vector<16x400xf32>
    %21 = tpu.matmul %20, %18, %cst_16 {dimension_numbers = #tpu.dot_dimension_numbers<[1], [0], [0], [1], [0, 0, 1, 1], [], []>} : vector<16x400xbf16>, vector<400x400xbf16>, vector<16x400xf32> -> vector<16x400xf32>
    %22 = vector.broadcast %19 : vector<1x400xf32> to vector<16x400xf32>
    %23 = arith.addf %21, %22 : vector<16x400xf32>
    %cst_17 = arith.constant 2.000000e-01 : f32
    %24 = vector.broadcast %cst_17 : f32 to vector<16x400xf32>
    %25 = arith.mulf %24, %23 : vector<16x400xf32>
    %26 = arith.maximumf %23, %25 : vector<16x400xf32>
    %c0_18 = arith.constant 0 : index
    %c0_19 = arith.constant 0 : index
    %27 = vector.load %arg8[%c0_18, %c0_19] : memref<400x400xbf16, #tpu.memory_space<vmem>>, vector<400x400xbf16>
    %c0_20 = arith.constant 0 : index
    %c0_21 = arith.constant 0 : index
    %28 = vector.load %arg9[%c0_20, %c0_21] : memref<1x400xf32, #tpu.memory_space<vmem>>, vector<1x400xf32>
    %29 = arith.truncf %26 : vector<16x400xf32> to vector<16x400xbf16>
    %cst_22 = arith.constant dense<0.000000e+00> : vector<16x400xf32>
    %30 = tpu.matmul %29, %27, %cst_22 {dimension_numbers = #tpu.dot_dimension_numbers<[1], [0], [0], [1], [0, 0, 1, 1], [], []>} : vector<16x400xbf16>, vector<400x400xbf16>, vector<16x400xf32> -> vector<16x400xf32>
    %31 = vector.broadcast %28 : vector<1x400xf32> to vector<16x400xf32>
    %32 = arith.addf %30, %31 : vector<16x400xf32>
    %cst_23 = arith.constant 2.000000e-01 : f32
    %33 = vector.broadcast %cst_23 : f32 to vector<16x400xf32>
    %34 = arith.mulf %33, %32 : vector<16x400xf32>
    %35 = arith.maximumf %32, %34 : vector<16x400xf32>
    %c0_24 = arith.constant 0 : index
    %c0_25 = arith.constant 0 : index
    %36 = vector.load %arg10[%c0_24, %c0_25] : memref<400x400xbf16, #tpu.memory_space<vmem>>, vector<400x400xbf16>
    %c0_26 = arith.constant 0 : index
    %c0_27 = arith.constant 0 : index
    %37 = vector.load %arg11[%c0_26, %c0_27] : memref<1x400xf32, #tpu.memory_space<vmem>>, vector<1x400xf32>
    %38 = arith.truncf %35 : vector<16x400xf32> to vector<16x400xbf16>
    %cst_28 = arith.constant dense<0.000000e+00> : vector<16x400xf32>
    %39 = tpu.matmul %38, %36, %cst_28 {dimension_numbers = #tpu.dot_dimension_numbers<[1], [0], [0], [1], [0, 0, 1, 1], [], []>} : vector<16x400xbf16>, vector<400x400xbf16>, vector<16x400xf32> -> vector<16x400xf32>
    %40 = vector.broadcast %37 : vector<1x400xf32> to vector<16x400xf32>
    %41 = arith.addf %39, %40 : vector<16x400xf32>
    %cst_29 = arith.constant 2.000000e-01 : f32
    %42 = vector.broadcast %cst_29 : f32 to vector<16x400xf32>
    %43 = arith.mulf %42, %41 : vector<16x400xf32>
    %44 = arith.maximumf %41, %43 : vector<16x400xf32>
    %c0_30 = arith.constant 0 : index
    %c0_31 = arith.constant 0 : index
    %45 = vector.load %arg12[%c0_30, %c0_31] : memref<400x128xbf16, #tpu.memory_space<vmem>>, vector<400x128xbf16>
    %c0_32 = arith.constant 0 : index
    %c0_33 = arith.constant 0 : index
    %46 = vector.load %arg13[%c0_32, %c0_33] : memref<1x128xf32, #tpu.memory_space<vmem>>, vector<1x128xf32>
    %47 = arith.truncf %44 : vector<16x400xf32> to vector<16x400xbf16>
    %cst_34 = arith.constant dense<0.000000e+00> : vector<16x128xf32>
    %48 = tpu.matmul %47, %45, %cst_34 {dimension_numbers = #tpu.dot_dimension_numbers<[1], [0], [0], [1], [0, 0, 1, 1], [], []>} : vector<16x400xbf16>, vector<400x128xbf16>, vector<16x128xf32> -> vector<16x128xf32>
    %49 = vector.broadcast %46 : vector<1x128xf32> to vector<16x128xf32>
    %50 = arith.addf %48, %49 : vector<16x128xf32>
    %c0_35 = arith.constant 0 : index
    %c0_36 = arith.constant 0 : index
    %51 = vector.load %arg14[%c0_35, %c0_36] : memref<16x128xf32, #tpu.memory_space<vmem>>, vector<16x128xf32>
    tpu.vector_store %arg14[%c0_35, %c0_36], %50 {strides = array<i32>} : memref<16x128xf32, #tpu.memory_space<vmem>>, vector<16x128xf32>,
    return
  }
  func.func @transform_0(%arg0: i32) -> (i32, i32) {
    %c0_i32 = arith.constant 0 : i32
    %c0_i32_0 = arith.constant 0 : i32
    return %arg0, %c0_i32 : i32, i32
  }
  func.func @transform_1(%arg0: i32) -> (i32, i32) {
    %c0_i32 = arith.constant 0 : i32
    %c0_i32_0 = arith.constant 0 : i32
    %c0_i32_1 = arith.constant 0 : i32
    return %c0_i32, %c0_i32_0 : i32, i32
  }
  func.func @transform_2(%arg0: i32) -> (i32, i32) {
    %c0_i32 = arith.constant 0 : i32
    %c0_i32_0 = arith.constant 0 : i32
    %c0_i32_1 = arith.constant 0 : i32
    return %c0_i32, %c0_i32_0 : i32, i32
  }
  func.func @transform_3(%arg0: i32) -> (i32, i32) {
    %c0_i32 = arith.constant 0 : i32
    %c0_i32_0 = arith.constant 0 : i32
    %c0_i32_1 = arith.constant 0 : i32
    return %c0_i32, %c0_i32_0 : i32, i32
  }
  func.func @transform_4(%arg0: i32) -> (i32, i32) {
    %c0_i32 = arith.constant 0 : i32
    %c0_i32_0 = arith.constant 0 : i32
    %c0_i32_1 = arith.constant 0 : i32
    return %c0_i32, %c0_i32_0 : i32, i32
  }
  func.func @transform_5(%arg0: i32) -> (i32, i32) {
    %c0_i32 = arith.constant 0 : i32
    %c0_i32_0 = arith.constant 0 : i32
    %c0_i32_1 = arith.constant 0 : i32
    return %c0_i32, %c0_i32_0 : i32, i32
  }
  func.func @transform_6(%arg0: i32) -> (i32, i32) {
    %c0_i32 = arith.constant 0 : i32
    %c0_i32_0 = arith.constant 0 : i32
    %c0_i32_1 = arith.constant 0 : i32
    return %c0_i32, %c0_i32_0 : i32, i32
  }
  func.func @transform_7(%arg0: i32) -> (i32, i32) {
    %c0_i32 = arith.constant 0 : i32
    %c0_i32_0 = arith.constant 0 : i32
    %c0_i32_1 = arith.constant 0 : i32
    return %c0_i32, %c0_i32_0 : i32, i32
  }
  func.func @transform_8(%arg0: i32) -> (i32, i32) {
    %c0_i32 = arith.constant 0 : i32
    %c0_i32_0 = arith.constant 0 : i32
    %c0_i32_1 = arith.constant 0 : i32
    return %c0_i32, %c0_i32_0 : i32, i32
  }
  func.func @transform_9(%arg0: i32) -> (i32, i32) {
    %c0_i32 = arith.constant 0 : i32
    %c0_i32_0 = arith.constant 0 : i32
    %c0_i32_1 = arith.constant 0 : i32
    return %c0_i32, %c0_i32_0 : i32, i32
  }
  func.func @transform_10(%arg0: i32) -> (i32, i32) {
    %c0_i32 = arith.constant 0 : i32
    %c0_i32_0 = arith.constant 0 : i32
    %c0_i32_1 = arith.constant 0 : i32
    return %c0_i32, %c0_i32_0 : i32, i32
  }
  func.func @transform_11(%arg0: i32) -> (i32, i32) {
    %c0_i32 = arith.constant 0 : i32
    %c0_i32_0 = arith.constant 0 : i32
    %c0_i32_1 = arith.constant 0 : i32
    return %c0_i32, %c0_i32_0 : i32, i32
  }
  func.func @transform_12(%arg0: i32) -> (i32, i32) {
    %c0_i32 = arith.constant 0 : i32
    %c0_i32_0 = arith.constant 0 : i32
    %c0_i32_1 = arith.constant 0 : i32
    return %c0_i32, %c0_i32_0 : i32, i32
  }
  func.func @transform_13(%arg0: i32) -> (i32, i32) {
    %c0_i32 = arith.constant 0 : i32
    %c0_i32_0 = arith.constant 0 : i32
    return %arg0, %c0_i32 : i32, i32
  }
}

module attributes {stable_mosaic.version = 11 : i64} {
  func.func @kernel(%arg0: i32, %arg1: memref<16x32xbf16, #tpu.memory_space<vmem>>, %arg2: memref<32x400xbf16, #tpu.memory_space<vmem>>, %arg3: memref<1x400xf32, #tpu.memory_space<vmem>>, %arg4: memref<400x400xbf16, #tpu.memory_space<vmem>>, %arg5: memref<1x400xf32, #tpu.memory_space<vmem>>, %arg6: memref<400x400xbf16, #tpu.memory_space<vmem>>, %arg7: memref<1x400xf32, #tpu.memory_space<vmem>>, %arg8: memref<400x400xbf16, #tpu.memory_space<vmem>>, %arg9: memref<1x400xf32, #tpu.memory_space<vmem>>, %arg10: memref<400x400xbf16, #tpu.memory_space<vmem>>, %arg11: memref<1x400xf32, #tpu.memory_space<vmem>>, %arg12: memref<400x128xbf16, #tpu.memory_space<vmem>>, %arg13: memref<1x128xf32, #tpu.memory_space<vmem>>, %arg14: memref<16x128xf32, #tpu.memory_space<vmem>>) attributes {dimension_semantics = [#tpu.dimension_semantics<parallel>], iteration_bounds = array<i64: 1>, scalar_prefetch = 0 : i64, scratch_operands = 0 : i64, tpu.core_type = #tpu.core_type<tc>, window_params = [{transform_indices = @transform_0, window_bounds = array<i64: 16, 32>}, {pipeline_mode = #tpu.pipeline_mode<synchronous>, transform_indices = @transform_1, window_bounds = array<i64: 32, 400>}, {pipeline_mode = #tpu.pipeline_mode<synchronous>, transform_indices = @transform_2, window_bounds = array<i64: 1, 400>}, {pipeline_mode = #tpu.pipeline_mode<synchronous>, transform_indices = @transform_3, window_bounds = array<i64: 400, 400>}, {pipeline_mode = #tpu.pipeline_mode<synchronous>, transform_indices = @transform_4, window_bounds = array<i64: 1, 400>}, {pipeline_mode = #tpu.pipeline_mode<synchronous>, transform_indices = @transform_5, window_bounds = array<i64: 400, 400>}, {pipeline_mode = #tpu.pipeline_mode<synchronous>, transform_indices = @transform_6, window_bounds = array<i64: 1, 400>}, {pipeline_mode = #tpu.pipeline_mode<synchronous>, transform_indices = @transform_7, window_bounds = array<i64: 400, 400>}, {pipeline_mode = #tpu.pipeline_mode<synchronous>, transform_indices = @transform_8, window_bounds = array<i64: 1, 400>}, {pipeline_mode = #tpu.pipeline_mode<synchronous>, transform_indices = @transform_9, window_bounds = array<i64: 400, 400>}, {pipeline_mode = #tpu.pipeline_mode<synchronous>, transform_indices = @transform_10, window_bounds = array<i64: 1, 400>}, {pipeline_mode = #tpu.pipeline_mode<synchronous>, transform_indices = @transform_11, window_bounds = array<i64: 400, 128>}, {pipeline_mode = #tpu.pipeline_mode<synchronous>, transform_indices = @transform_12, window_bounds = array<i64: 1, 128>}, {transform_indices = @transform_13, window_bounds = array<i64: 16, 128>}]} {
    %c0 = arith.constant 0 : index
    %c0_0 = arith.constant 0 : index
    %0 = vector.load %arg1[%c0, %c0_0] : memref<16x32xbf16, #tpu.memory_space<vmem>>, vector<16x32xbf16>
    %c0_1 = arith.constant 0 : index
    %c0_2 = arith.constant 0 : index
    %1 = vector.load %arg2[%c0_1, %c0_2] : memref<32x400xbf16, #tpu.memory_space<vmem>>, vector<32x400xbf16>
    %c0_3 = arith.constant 0 : index
    %c0_4 = arith.constant 0 : index
    %2 = vector.load %arg3[%c0_3, %c0_4] : memref<1x400xf32, #tpu.memory_space<vmem>>, vector<1x400xf32>
    %cst = arith.constant dense<0.000000e+00> : vector<16x400xf32>
    %3 = tpu.matmul %0, %1, %cst {dimension_numbers = #tpu.dot_dimension_numbers<[1], [0], [0], [1], [0, 0, 1, 1], [], []>} : vector<16x32xbf16>, vector<32x400xbf16>, vector<16x400xf32> -> vector<16x400xf32>
    %4 = vector.broadcast %2 : vector<1x400xf32> to vector<16x400xf32>
    %5 = arith.addf %3, %4 : vector<16x400xf32>
    %cst_5 = arith.constant 2.000000e-01 : f32
    %6 = vector.broadcast %cst_5 : f32 to vector<16x400xf32>
    %7 = arith.mulf %6, %5 : vector<16x400xf32>
    %8 = arith.maximumf %5, %7 : vector<16x400xf32>
    %c0_6 = arith.constant 0 : index
    %c0_7 = arith.constant 0 : index
    %9 = vector.load %arg4[%c0_6, %c0_7] : memref<400x400xbf16, #tpu.memory_space<vmem>>, vector<400x400xbf16>
    %c0_8 = arith.constant 0 : index
    %c0_9 = arith.constant 0 : index
    %10 = vector.load %arg5[%c0_8, %c0_9] : memref<1x400xf32, #tpu.memory_space<vmem>>, vector<1x400xf32>
    %11 = arith.truncf %8 : vector<16x400xf32> to vector<16x400xbf16>
    %cst_10 = arith.constant dense<0.000000e+00> : vector<16x400xf32>
    %12 = tpu.matmul %11, %9, %cst_10 {dimension_numbers = #tpu.dot_dimension_numbers<[1], [0], [0], [1], [0, 0, 1, 1], [], []>} : vector<16x400xbf16>, vector<400x400xbf16>, vector<16x400xf32> -> vector<16x400xf32>
    %13 = vector.broadcast %10 : vector<1x400xf32> to vector<16x400xf32>
    %14 = arith.addf %12, %13 : vector<16x400xf32>
    %cst_11 = arith.constant 2.000000e-01 : f32
    %15 = vector.broadcast %cst_11 : f32 to vector<16x400xf32>
    %16 = arith.mulf %15, %14 : vector<16x400xf32>
    %17 = arith.maximumf %14, %16 : vector<16x400xf32>
    %c0_12 = arith.constant 0 : index
    %c0_13 = arith.constant 0 : index
    %18 = vector.load %arg6[%c0_12, %c0_13] : memref<400x400xbf16, #tpu.memory_space<vmem>>, vector<400x400xbf16>
    %c0_14 = arith.constant 0 : index
    %c0_15 = arith.constant 0 : index
    %19 = vector.load %arg7[%c0_14, %c0_15] : memref<1x400xf32, #tpu.memory_space<vmem>>, vector<1x400xf32>
    %20 = arith.truncf %17 : vector<16x400xf32> to vector<16x400xbf16>
    %cst_16 = arith.constant dense<0.000000e+00> : vector<16x400xf32>
    %21 = tpu.matmul %20, %18, %cst_16 {dimension_numbers = #tpu.dot_dimension_numbers<[1], [0], [0], [1], [0, 0, 1, 1], [], []>} : vector<16x400xbf16>, vector<400x400xbf16>, vector<16x400xf32> -> vector<16x400xf32>
    %22 = vector.broadcast %19 : vector<1x400xf32> to vector<16x400xf32>
    %23 = arith.addf %21, %22 : vector<16x400xf32>
    %cst_17 = arith.constant 2.000000e-01 : f32
    %24 = vector.broadcast %cst_17 : f32 to vector<16x400xf32>
    %25 = arith.mulf %24, %23 : vector<16x400xf32>
    %26 = arith.maximumf %23, %25 : vector<16x400xf32>
    %c0_18 = arith.constant 0 : index
    %c0_19 = arith.constant 0 : index
    %27 = vector.load %arg8[%c0_18, %c0_19] : memref<400x400xbf16, #tpu.memory_space<vmem>>, vector<400x400xbf16>
    %c0_20 = arith.constant 0 : index
    %c0_21 = arith.constant 0 : index
    %28 = vector.load %arg9[%c0_20, %c0_21] : memref<1x400xf32, #tpu.memory_space<vmem>>, vector<1x400xf32>
    %29 = arith.truncf %26 : vector<16x400xf32> to vector<16x400xbf16>
    %cst_22 = arith.constant dense<0.000000e+00> : vector<16x400xf32>
    %30 = tpu.matmul %29, %27, %cst_22 {dimension_numbers = #tpu.dot_dimension_numbers<[1], [0], [0], [1], [0, 0, 1, 1], [], []>} : vector<16x400xbf16>, vector<400x400xbf16>, vector<16x400xf32> -> vector<16x400xf32>
    %31 = vector.broadcast %28 : vector<1x400xf32> to vector<16x400xf32>
    %32 = arith.addf %30, %31 : vector<16x400xf32>
    %cst_23 = arith.constant 2.000000e-01 : f32
    %33 = vector.broadcast %cst_23 : f32 to vector<16x400xf32>
    %34 = arith.mulf %33, %32 : vector<16x400xf32>
    %35 = arith.maximumf %32, %34 : vector<16x400xf32>
    %c0_24 = arith.constant 0 : index
    %c0_25 = arith.constant 0 : index
    %36 = vector.load %arg10[%c0_24, %c0_25] : memref<400x400xbf16, #tpu.memory_space<vmem>>, vector<400x400xbf16>
    %c0_26 = arith.constant 0 : index
    %c0_27 = arith.constant 0 : index
    %37 = vector.load %arg11[%c0_26, %c0_27] : memref<1x400xf32, #tpu.memory_space<vmem>>, vector<1x400xf32>
    %38 = arith.truncf %35 : vector<16x400xf32> to vector<16x400xbf16>
    %cst_28 = arith.constant dense<0.000000e+00> : vector<16x400xf32>
    %39 = tpu.matmul %38, %36, %cst_28 {dimension_numbers = #tpu.dot_dimension_numbers<[1], [0], [0], [1], [0, 0, 1, 1], [], []>} : vector<16x400xbf16>, vector<400x400xbf16>, vector<16x400xf32> -> vector<16x400xf32>
    %40 = vector.broadcast %37 : vector<1x400xf32> to vector<16x400xf32>
    %41 = arith.addf %39, %40 : vector<16x400xf32>
    %cst_29 = arith.constant 2.000000e-01 : f32
    %42 = vector.broadcast %cst_29 : f32 to vector<16x400xf32>
    %43 = arith.mulf %42, %41 : vector<16x400xf32>
    %44 = arith.maximumf %41, %43 : vector<16x400xf32>
    %c0_30 = arith.constant 0 : index
    %c0_31 = arith.constant 0 : index
    %45 = vector.load %arg12[%c0_30, %c0_31] : memref<400x128xbf16, #tpu.memory_space<vmem>>, vector<400x128xbf16>
    %c0_32 = arith.constant 0 : index
    %c0_33 = arith.constant 0 : index
    %46 = vector.load %arg13[%c0_32, %c0_33] : memref<1x128xf32, #tpu.memory_space<vmem>>, vector<1x128xf32>
    %47 = arith.truncf %44 : vector<16x400xf32> to vector<16x400xbf16>
    %cst_34 = arith.constant dense<0.000000e+00> : vector<16x128xf32>
    %48 = tpu.matmul %47, %45, %cst_34 {dimension_numbers = #tpu.dot_dimension_numbers<[1], [0], [0], [1], [0, 0, 1, 1], [], []>} : vector<16x400xbf16>, vector<400x128xbf16>, vector<16x128xf32> -> vector<16x128xf32>
    %49 = vector.broadcast %46 : vector<1x128xf32> to vector<16x128xf32>
    %50 = arith.addf %48, %49 : vector<16x128xf32>
    %c0_35 = arith.constant 0 : index
    %c0_36 = arith.constant 0 : index
    %51 = vector.load %arg14[%c0_35, %c0_36] : memref<16x128xf32, #tpu.memory_space<vmem>>, vector<16x128xf32>
    tpu.vector_store %arg14[%c0_35, %c0_36], %50 {strides = array<i32>} : memref<16x128xf32, #tpu.memory_space<vmem>>, vector<16x128xf32>,
    return
  }
  func.func @transform_0(%arg0: i32) -> (i32, i32) {
    %c0_i32 = arith.constant 0 : i32
    %c0_i32_0 = arith.constant 0 : i32
    return %arg0, %c0_i32 : i32, i32
  }
  func.func @transform_1(%arg0: i32) -> (i32, i32) {
    %c0_i32 = arith.constant 0 : i32
    %c0_i32_0 = arith.constant 0 : i32
    %c0_i32_1 = arith.constant 0 : i32
    return %c0_i32, %c0_i32_0 : i32, i32
  }
  func.func @transform_2(%arg0: i32) -> (i32, i32) {
    %c0_i32 = arith.constant 0 : i32
    %c0_i32_0 = arith.constant 0 : i32
    %c0_i32_1 = arith.constant 0 : i32
    return %c0_i32, %c0_i32_0 : i32, i32
  }
  func.func @transform_3(%arg0: i32) -> (i32, i32) {
    %c0_i32 = arith.constant 0 : i32
    %c0_i32_0 = arith.constant 0 : i32
    %c0_i32_1 = arith.constant 0 : i32
    return %c0_i32, %c0_i32_0 : i32, i32
  }
  func.func @transform_4(%arg0: i32) -> (i32, i32) {
    %c0_i32 = arith.constant 0 : i32
    %c0_i32_0 = arith.constant 0 : i32
    %c0_i32_1 = arith.constant 0 : i32
    return %c0_i32, %c0_i32_0 : i32, i32
  }
  func.func @transform_5(%arg0: i32) -> (i32, i32) {
    %c0_i32 = arith.constant 0 : i32
    %c0_i32_0 = arith.constant 0 : i32
    %c0_i32_1 = arith.constant 0 : i32
    return %c0_i32, %c0_i32_0 : i32, i32
  }
  func.func @transform_6(%arg0: i32) -> (i32, i32) {
    %c0_i32 = arith.constant 0 : i32
    %c0_i32_0 = arith.constant 0 : i32
    %c0_i32_1 = arith.constant 0 : i32
    return %c0_i32, %c0_i32_0 : i32, i32
  }
  func.func @transform_7(%arg0: i32) -> (i32, i32) {
    %c0_i32 = arith.constant 0 : i32
    %c0_i32_0 = arith.constant 0 : i32
    %c0_i32_1 = arith.constant 0 : i32
    return %c0_i32, %c0_i32_0 : i32, i32
  }
  func.func @transform_8(%arg0: i32) -> (i32, i32) {
    %c0_i32 = arith.constant 0 : i32
    %c0_i32_0 = arith.constant 0 : i32
    %c0_i32_1 = arith.constant 0 : i32
    return %c0_i32, %c0_i32_0 : i32, i32
  }
  func.func @transform_9(%arg0: i32) -> (i32, i32) {
    %c0_i32 = arith.constant 0 : i32
    %c0_i32_0 = arith.constant 0 : i32
    %c0_i32_1 = arith.constant 0 : i32
    return %c0_i32, %c0_i32_0 : i32, i32
  }
  func.func @transform_10(%arg0: i32) -> (i32, i32) {
    %c0_i32 = arith.constant 0 : i32
    %c0_i32_0 = arith.constant 0 : i32
    %c0_i32_1 = arith.constant 0 : i32
    return %c0_i32, %c0_i32_0 : i32, i32
  }
  func.func @transform_11(%arg0: i32) -> (i32, i32) {
    %c0_i32 = arith.constant 0 : i32
    %c0_i32_0 = arith.constant 0 : i32
    %c0_i32_1 = arith.constant 0 : i32
    return %c0_i32, %c0_i32_0 : i32, i32
  }
  func.func @transform_12(%arg0: i32) -> (i32, i32) {
    %c0_i32 = arith.constant 0 : i32
    %c0_i32_0 = arith.constant 0 : i32
    %c0_i32_1 = arith.constant 0 : i32
    return %c0_i32, %c0_i32_0 : i32, i32
  }
  func.func @transform_13(%arg0: i32) -> (i32, i32) {
    %c0_i32 = arith.constant 0 : i32
    %c0_i32_0 = arith.constant 0 : i32
    return %arg0, %c0_i32 : i32, i32
  }
}

</mosaic_0001>

<bundles_post_ra>
// kernel: tpu_custom_call.1
= control target key start
LH: loop header
LB: loop body
LE: loop exit
PB: predicated region body
PF: predicated region fallthrough
CT: control target
= control target key end

     0   :  { %18 = vsyncpa [#allocation3], 0  ;;  %s5575_s0 = inlined_call_operand.hbm [shape: bf16[16,32], index: 0, kind: input, shape index: {}]   ;;  %s5576_s1 = inlined_call_operand.hbm [shape: bf16[32,400], index: 1, kind: input, shape index: {}]   ;;  %s5577_s2 = inlined_call_operand.vmem [shape: f32[1,400], index: 2, kind: input, shape index: {}]   ;;  %s5578_s3 = inlined_call_operand.hbm [shape: bf16[400,400], index: 3, kind: input, shape index: {}]   ;;  %s5579_s4 = inlined_call_operand.vmem [shape: f32[1,400], index: 4, kind: input, shape index: {}]   ;;  %s5580_s5 = inlined_call_operand.hbm [shape: bf16[400,400], index: 5, kind: input, shape index: {}]   ;;  %s5581_s6 = inlined_call_operand.vmem [shape: f32[1,400], index: 6, kind: input, shape index: {}]   ;;  %s5582_s7 = inlined_call_operand.hbm [shape: bf16[400,400], index: 7, kind: input, shape index: {}]   ;;  %s5583_s8 = inlined_call_operand.vmem [shape: f32[1,400], index: 8, kind: input, shape index: {}]   ;;  %s5584_s9 = inlined_call_operand.hbm [shape: bf16[400,400], index: 9, kind: input, shape index: {}]   ;;  %s5585_s10 = inlined_call_operand.vmem [shape: f32[1,400], index: 10, kind: input, shape index: {}]   ;;  %s5586_s11 = inlined_call_operand.hbm [shape: bf16[400,128], index: 11, kind: input, shape index: {}]   ;;  %s5587_s12 = inlined_call_operand.vmem [shape: f32[1,128], index: 12, kind: input, shape index: {}]   ;;  %s5588_s13 = inlined_call_operand.hbm [shape: f32[16,128], index: 13, kind: output, shape index: {}]  }
   0x1   :  { %19 = vsyncpa [#allocation6], 0 }
   0x2   :  { %20 = vsyncpa [#allocation9], 0 }
   0x3   :  { %21 = vsyncpa [#allocation12], 0 }
   0x4   :  { %22 = vsyncpa [#allocation4], 0  ;;  %s5282_s25 = smov [#allocation5]   ;;  %s5096_s29 = scalar_lea.hbm %s5576_s1, 1024 }
   0x5   :  { %s40_s26 = sshll.u32 %s5282_s25, 4  ;;  %p5097_p0 = scmp.ne.s32.totalorder %s5576_s1, %s5096_s29  ;;  %s41_s26 = int_to_ptr.vmem [resolvable:$true] %s40_s26 }
   0x6   :  { %p5100_p1 = scmp.lt.u32.totalorder %s5096_s29, %s5576_s1 }
   0x8   :  { %p5102_p2 = pnand %p5100_p1, %p5097_p0 }
   0xa   :  { %5105 = shalt.err (!%p5102_p2)
}
   0xb   :  { %s5106_s17 = scalar_lea.vmem %s41_s26, 1024  ;;  %p5111_p4 = scmp.lt.s32.totalorder %s41_s26, %s41_s26 }
   0xc   :  { %p5107_p3 = scmp.ne.s32.totalorder %s41_s26, %s5106_s17  ;;  %p5112_p5 = scmp.lt.s32.totalorder %s5106_s17, %s5106_s17 }
   0xe   :  { %p5113_p6 = por %p5112_p5, %p5111_p4 }
  0x10   :  { %p5114_p7 = pnand %p5113_p6, %p5107_p3 }
  0x12   :  { %5117 = shalt.err (!%p5114_p7)
}
  0x13   :  { %s5283_s18 = smov 256   ;;  %s5284_s19 = smov 16  }
  0x14   :  { %46 = dma.hbm_to_vmem [thread:$0]  %s5576_s1, 1024, %s41_s26, [#allocation6], %s5283_s18, %s5283_s18, %s5284_s19  }
  0x15   :  { %s5285_s22 = smov [#allocation8]   ;;  %s5286_s24 = smov [#allocation11]  }
  0x16   :  { %s68_s23 = sshll.u32 %s5285_s22, 4  ;;  %s96_s25 = sshll.u32 %s5286_s24, 4  ;;  %s69_s23 = int_to_ptr.vmem [resolvable:$true] %s68_s23  ;;  %s97_s25 = int_to_ptr.vmem [resolvable:$true] %s96_s25 }
  0x17   :  { %s5118_s29 = scalar_lea.hbm %s5580_s5, 12800 }
  0x18   :  { %p5119_p8 = scmp.ne.s32.totalorder %s5580_s5, %s5118_s29  ;;  %p5122_p9 = scmp.lt.u32.totalorder %s5118_s29, %s5580_s5 }
  0x1a   :  { %p5124_p10 = pnand %p5122_p9, %p5119_p8 }
  0x1c   :  { %5127 = shalt.err (!%p5124_p10)
}
  0x1d   :  { %s5128_s1 = scalar_lea.vmem %s69_s23, 12800  ;;  %p5133_p12 = scmp.lt.s32.totalorder %s69_s23, %s69_s23 }
  0x1e   :  { %p5129_p11 = scmp.ne.s32.totalorder %s69_s23, %s5128_s1  ;;  %p5134_p13 = scmp.lt.s32.totalorder %s5128_s1, %s5128_s1 }
  0x20   :  { %p5135_p0 = por %p5134_p13, %p5133_p12 }
  0x22   :  { %p5136_p1 = pnand %p5135_p0, %p5129_p11 }
  0x24   :  { %5139 = shalt.err (!%p5136_p1)
}
  0x25   :  { %74 = dma.hbm_to_vmem [thread:$0]  %s5580_s5, 12800, %s69_s23, [#allocation9], %s5283_s18, %s5283_s18, %s5284_s19  }
  0x26   :  { %s5140_s22 = scalar_lea.hbm %s5584_s9, 12800 }
  0x27   :  { %p5141_p2 = scmp.ne.s32.totalorder %s5584_s9, %s5140_s22  ;;  %p5144_p3 = scmp.lt.u32.totalorder %s5140_s22, %s5584_s9 }
  0x29   :  { %p5146_p4 = pnand %p5144_p3, %p5141_p2 }
  0x2b   :  { %5149 = shalt.err (!%p5146_p4)
}
  0x2c   :  { %s5150_s30 = scalar_lea.vmem %s97_s25, 12800  ;;  %p5155_p6 = scmp.lt.s32.totalorder %s97_s25, %s97_s25 }
  0x2d   :  { %p5151_p5 = scmp.ne.s32.totalorder %s97_s25, %s5150_s30  ;;  %p5156_p7 = scmp.lt.s32.totalorder %s5150_s30, %s5150_s30 }
  0x2f   :  { %p5157_p8 = por %p5156_p7, %p5155_p6 }
  0x31   :  { %p5158_p9 = pnand %p5157_p8, %p5151_p5 }
  0x33   :  { %5161 = shalt.err (!%p5158_p9)
}
  0x34   :  { %102 = dma.hbm_to_vmem [thread:$0]  %s5584_s9, 12800, %s97_s25, [#allocation12], %s5283_s18, %s5283_s18, %s5284_s19  }
  0x35   :  { %s5287_s14 = smov [#allocation2]   ;;  %s5162_s26 = scalar_lea.hbm %s5575_s0, 128 }
  0x36   :  { %s28_s15 = sshll.u32 %s5287_s14, 4  ;;  %p5163_p10 = scmp.ne.s32.totalorder %s5575_s0, %s5162_s26  ;;  %s29_s15 = int_to_ptr.vmem [resolvable:$true] %s28_s15 }
  0x37   :  { %p5166_p11 = scmp.lt.u32.totalorder %s5162_s26, %s5575_s0 }
  0x39   :  { %p5168_p12 = pnand %p5166_p11, %p5163_p10 }
  0x3b   :  { %5171 = shalt.err (!%p5168_p12)
}
  0x3c   :  { %s5172_s24 = scalar_lea.vmem %s29_s15, 128  ;;  %p5177_p0 = scmp.lt.s32.totalorder %s29_s15, %s29_s15 }
  0x3d   :  { %p5173_p13 = scmp.ne.s32.totalorder %s29_s15, %s5172_s24  ;;  %p5178_p1 = scmp.lt.s32.totalorder %s5172_s24, %s5172_s24 }
  0x3f   :  { %p5179_p2 = por %p5178_p1, %p5177_p0 }
  0x41   :  { %p5180_p3 = pnand %p5179_p2, %p5173_p13 }
  0x43   :  { %5183 = shalt.err (!%p5180_p3)
}
  0x44   :  { %s5288_s9 = smov 64   ;;  %s5289_s25 = smov 4  }
  0x45   :  { %34 = dma.hbm_to_vmem [thread:$0]  %s5575_s0, 128, %s29_s15, [#allocation3], %s5288_s9, %s5288_s9, %s5289_s25  }
  0x46   :  { %s5290_s29 = smov [#allocation7]   ;;  %s5291_s5 = smov [#allocation10]  }
  0x47   :  { %s54_s30 = sshll.u32 %s5290_s29, 4  ;;  %s82_s23 = sshll.u32 %s5291_s5, 4  ;;  %s55_s30 = int_to_ptr.vmem [resolvable:$true] %s54_s30  ;;  %s5427_s23 = int_to_ptr.vmem [resolvable:$true] %s82_s23 }
  0x48   :  { %s5184_s1 = scalar_lea.hbm %s5578_s3, 12800 }
  0x49   :  { %p5185_p4 = scmp.ne.s32.totalorder %s5578_s3, %s5184_s1  ;;  %p5188_p5 = scmp.lt.u32.totalorder %s5184_s1, %s5578_s3 }
  0x4b   :  { %p5190_p6 = pnand %p5188_p5, %p5185_p4 }
  0x4d   :  { %5193 = shalt.err (!%p5190_p6)
}
  0x4e   :  { %s5194_s0 = scalar_lea.vmem %s55_s30, 12800  ;;  %p5199_p8 = scmp.lt.s32.totalorder %s55_s30, %s55_s30 }
  0x4f   :  { %p5195_p7 = scmp.ne.s32.totalorder %s55_s30, %s5194_s0  ;;  %p5200_p9 = scmp.lt.s32.totalorder %s5194_s0, %s5194_s0 }
  0x51   :  { %p5201_p10 = por %p5200_p9, %p5199_p8 }
  0x53   :  { %p5202_p11 = pnand %p5201_p10, %p5195_p7 }
  0x55   :  { %5205 = shalt.err (!%p5202_p11)
}
  0x56   :  { %60 = dma.hbm_to_vmem [thread:$0]  %s5578_s3, 12800, %s55_s30, [#allocation6], %s5283_s18, %s5283_s18, %s5284_s19  }
  0x57   :  { %s5206_s28 = scalar_lea.hbm %s5582_s7, 12800 }
  0x58   :  { %p5207_p12 = scmp.ne.s32.totalorder %s5582_s7, %s5206_s28  ;;  %p5210_p13 = scmp.lt.u32.totalorder %s5206_s28, %s5582_s7 }
  0x5a   :  { %p5212_p0 = pnand %p5210_p13, %p5207_p12 }
  0x5c   :  { %5215 = shalt.err (!%p5212_p0)
}
  0x5d   :  { %s5216_s1 = scalar_lea.vmem %s5427_s23, 12800  ;;  %p5221_p2 = scmp.lt.s32.totalorder %s5427_s23, %s5427_s23 }
  0x5e   :  { %p5217_p1 = scmp.ne.s32.totalorder %s5427_s23, %s5216_s1  ;;  %p5222_p3 = scmp.lt.s32.totalorder %s5216_s1, %s5216_s1 }
  0x60   :  { %p5223_p4 = por %p5222_p3, %p5221_p2 }
  0x62   :  { %p5224_p5 = pnand %p5223_p4, %p5217_p1 }
  0x64   :  { %5227 = shalt.err (!%p5224_p5)
}
  0x65   :  { %88 = dma.hbm_to_vmem [thread:$0]  %s5582_s7, 12800, %s5427_s23, [#allocation9], %s5283_s18, %s5283_s18, %s5284_s19  }
  0x66   :  { %s5292_s26 = smov [#allocation13]   ;;  %s5228_s0 = scalar_lea.hbm %s5586_s11, 3200 }
  0x67   :  { %s110_s17 = sshll.u32 %s5292_s26, 4  ;;  %p5229_p6 = scmp.ne.s32.totalorder %s5586_s11, %s5228_s0  ;;  %s111_s17 = int_to_ptr.vmem [resolvable:$true] %s110_s17 }
  0x68   :  { %p5232_p7 = scmp.lt.u32.totalorder %s5228_s0, %s5586_s11 }
  0x6a   :  { %p5234_p8 = pnand %p5232_p7, %p5229_p6 }
  0x6c   :  { %5237 = shalt.err (!%p5234_p8)
}
  0x6d   :  { %s5238_s28 = scalar_lea.vmem %s111_s17, 3200  ;;  %p5243_p10 = scmp.lt.s32.totalorder %s111_s17, %s111_s17 }
  0x6e   :  { %p5239_p9 = scmp.ne.s32.totalorder %s111_s17, %s5238_s28  ;;  %p5244_p11 = scmp.lt.s32.totalorder %s5238_s28, %s5238_s28 }
  0x70   :  { %p5245_p12 = por %p5244_p11, %p5243_p10 }
  0x72   :  { %p5246_p13 = pnand %p5245_p12, %p5239_p9 }
  0x74   :  { %5249 = shalt.err (!%p5246_p13)
}
  0x75   :  { %116 = dma.hbm_to_vmem [thread:$0]  %s5586_s11, 3200, %s111_s17, [#allocation12], %s5288_s9, %s5288_s9, %s5289_s25  }
  0x76   :  { %5272 = dma.done.wait [#allocation3], 128  }
  0x77   :  { %5273 = vsyncadd [#allocation3], 4294967168 }
  0x78   :  { %5274 = dma.done.wait [#allocation6], 13824  }
  0x79   :  { %5275 = vsyncadd [#allocation6], 4294953472 }
  0x7a   :  { %5276 = dma.done.wait [#allocation9], 25600  }
  0x7b   :  { %5277 = vsyncadd [#allocation9], 4294941696 }
  0x7c   :  { %5278 = dma.done.wait [#allocation12], 16000  }
  0x7d   :  { %5279 = vsyncadd [#allocation12], 4294951296  ;;  %v5293_v0 = vmov 0   ;;  %v4458_v1 = vld [vmem:[#allocation5 + $0x4] ss:$16 sps:$4 sm:$0xff]   ;;  %v4464_v5 = vld [vmem:[#allocation2] sm:$0xff]  }
  0x7e   :  { %254 = vmatprep.mubr.bf16.mxu0 %v5293_v0  ;;  %297 = vmatprep.mubr.bf16.mxu1 %v5293_v0  ;;  %v4460_v2 = vld [vmem:[#allocation5] ss:$16 sps:$4 sm:$0xff]   ;;  %v4461_v3 = vld [vmem:[#allocation5 + $0x24] ss:$16 sps:$4 sm:$0xff]   ;;  %v4465_v6 = vld [vmem:[#allocation5 + $0xc] ss:$16 sps:$4 sm:$0xff]  }
  0x7f   :  { %222 = vmatprep.subr.bf16.mxu0 %v4458_v1  ;;  %v4463_v4 = vld [vmem:[#allocation5 + $0x20] ss:$16 sps:$4 sm:$0xff]   ;;  %v4467_v7 = vld [vmem:[#allocation5 + $0x8] ss:$16 sps:$4 sm:$0xff]   ;;  %v4468_v8 = vld [vmem:[#allocation5 + $0x2c] ss:$16 sps:$4 sm:$0xff]   ;;  %265 = vmatprep.subr.bf16.mxu1 %v4465_v6 }
  0x80   :  { %223 = vmatpush1.bf16.msra.mxu0 %v4460_v2  ;;  %v4470_v9 = vld [vmem:[#allocation5 + $0x28] ss:$16 sps:$4 sm:$0xff]   ;;  %vm218_vm0 = vcmask 261120   ;;  %266 = vmatpush1.bf16.msra.mxu1 %v4467_v7  ;;  %v4471_v10 = vld [vmem:[#allocation7] ss:$16 sps:$4 sm:$0xff]   ;;  %vm950_vm1 = vcmask 130048  }
  0x81   :  { %224 = vmatprep.subr.bf16.mxu0 %v4461_v3  ;;  %v4473_v11 = vld [vmem:[#allocation7 + $0x4] ss:$16 sps:$4 sm:$0xff]   ;;  %267 = vmatprep.subr.bf16.mxu1 %v4468_v8  ;;  %v4476_v12 = vld [vmem:[#allocation7 + $0xc] ss:$16 sps:$4 sm:$0xff]   ;;  %v4474_v14 = vld [vmem:[#allocation7 + $0x8] ss:$16 sps:$4 sm:$0xff]  }
  0x82   :  { %v4479_v13 = vld [vmem:[#allocation7 + $0x24] ss:$16 sps:$4 sm:$0xff]   ;;  %v4477_v15 = vld [vmem:[#allocation7 + $0x20] ss:$16 sps:$4 sm:$0xff]   ;;  %v4482_v16 = vld [vmem:[#allocation7 + $0x2c] ss:$16 sps:$4 sm:$0xff]  }
  0x83   :  { %v4485_v17 = vld [vmem:[#allocation7 + $0x44] ss:$16 sps:$4 sm:$0xff]   ;;  %v4480_v18 = vld [vmem:[#allocation7 + $0x28] ss:$16 sps:$4 sm:$0xff]   ;;  %v4483_v19 = vld [vmem:[#allocation7 + $0x40] ss:$16 sps:$4 sm:$0xff]  }
  0x84   :  { %225 = vmatpush1.bf16.msra.mxu0 %v4463_v4  ;;  %268 = vmatpush1.bf16.msra.mxu1 %v4470_v9  ;;  %v4488_v20 = vld [vmem:[#allocation7 + $0x4c] ss:$16 sps:$4 sm:$0xff]   ;;  %v4491_v21 = vld [vmem:[#allocation7 + $0x64] ss:$16 sps:$4 sm:$0xff]   ;;  %v4486_v22 = vld [vmem:[#allocation7 + $0x48] ss:$16 sps:$4 sm:$0xff]  }
  0x85   :  { %954 = vmatprep.subr.bf16.mxu0 %v4473_v11  ;;  %1040 = vmatprep.subr.bf16.mxu1 %v4476_v12  ;;  %v4489_v23 = vld [vmem:[#allocation7 + $0x60] ss:$16 sps:$4 sm:$0xff]   ;;  %v4494_v24 = vld [vmem:[#allocation7 + $0x6c] ss:$16 sps:$4 sm:$0xff]   ;;  %v4497_v25 = vld [vmem:[#allocation7 + $0x84] ss:$16 sps:$4 sm:$0xff]  }
  0x86   :  { %v4492_v26 = vld [vmem:[#allocation7 + $0x68] ss:$16 sps:$4 sm:$0xff]   ;;  %v4495_v27 = vld [vmem:[#allocation7 + $0x80] ss:$16 sps:$4 sm:$0xff]   ;;  %v4500_v28 = vld [vmem:[#allocation7 + $0x8c] ss:$16 sps:$4 sm:$0xff]  }
  0x87   :  { %3920 = vmatmul.mubr.msk.bf16.vlgmr.msra.gmra.mrb[0].mxu0 %vm218_vm0, %v4464_v5  ;;  %3921 = vmatmul.mubr.msk.bf16.vlgmr.msra.gmra.mrb[0].mxu1 %vm218_vm0, %v4464_v5  ;;  %v4503_v29 = vld [vmem:[#allocation7 + $0xa4] ss:$16 sps:$4 sm:$0xff]   ;;  %v4498_v30 = vld [vmem:[#allocation7 + $0x88] ss:$16 sps:$4 sm:$0xff]   ;;  %v4501_v31 = vld [vmem:[#allocation7 + $0xa0] ss:$16 sps:$4 sm:$0xff]  }
  0x88   :  { %955 = vmatpush1.bf16.msra.mxu0 %v4471_v10  ;;  %1041 = vmatpush1.bf16.msra.mxu1 %v4474_v14  ;;  %v4506_v32 = vld [vmem:[#allocation7 + $0xac] ss:$16 sps:$4 sm:$0xff]   ;;  %v4509_v33 = vld [vmem:[#allocation7 + $0xc4] ss:$16 sps:$4 sm:$0xff]   ;;  %v4504_v34 = vld [vmem:[#allocation7 + $0xa8] ss:$16 sps:$4 sm:$0xff]  }
  0x89   :  { %956 = vmatprep.subr.bf16.mxu0 %v4479_v13  ;;  %1042 = vmatprep.subr.bf16.mxu1 %v4482_v16  ;;  %v4507_v35 = vld [vmem:[#allocation7 + $0xc0] ss:$16 sps:$4 sm:$0xff]   ;;  %v4512_v36 = vld [vmem:[#allocation7 + $0xcc] ss:$16 sps:$4 sm:$0xff]   ;;  %v4515_v37 = vld [vmem:[#allocation7 + $0xe4] ss:$16 sps:$4 sm:$0xff]   ;;  %v153_v13 = vlaneseq }
  0x8a   :  { %v4510_v38 = vld [vmem:[#allocation7 + $0xc8] ss:$16 sps:$4 sm:$0xff]   ;;  %v4513_v39 = vld [vmem:[#allocation7 + $0xe0] ss:$16 sps:$4 sm:$0xff]   ;;  %v4518_v40 = vld [vmem:[#allocation7 + $0xec] ss:$16 sps:$4 sm:$0xff]  }
  0x8b   :  { %v4521_v41 = vld [vmem:[#allocation7 + $0x104] ss:$16 sps:$4 sm:$0xff]   ;;  %v4516_v42 = vld [vmem:[#allocation7 + $0xe8] ss:$16 sps:$4 sm:$0xff]   ;;  %v4519_v43 = vld [vmem:[#allocation7 + $0x100] ss:$16 sps:$4 sm:$0xff]  }
  0x8c   :  { %957 = vmatpush1.bf16.msra.mxu0 %v4477_v15  ;;  %1043 = vmatpush1.bf16.msra.mxu1 %v4480_v18  ;;  %v4524_v44 = vld [vmem:[#allocation7 + $0x10c] ss:$16 sps:$4 sm:$0xff]   ;;  %v4527_v45 = vld [vmem:[#allocation7 + $0x124] ss:$16 sps:$4 sm:$0xff]   ;;  %v4522_v46 = vld [vmem:[#allocation7 + $0x108] ss:$16 sps:$4 sm:$0xff]  }
  0x8d   :  { %958 = vmatprep.subr.bf16.mxu0 %v4485_v17  ;;  %1044 = vmatprep.subr.bf16.mxu1 %v4488_v20  ;;  %v4525_v47 = vld [vmem:[#allocation7 + $0x120] ss:$16 sps:$4 sm:$0xff]   ;;  %v4530_v48 = vld [vmem:[#allocation7 + $0x12c] ss:$16 sps:$4 sm:$0xff]   ;;  %v4533_v49 = vld [vmem:[#allocation7 + $0x144] ss:$16 sps:$4 sm:$0xff]  }
  0x8e   :  { %v4528_v50 = vld [vmem:[#allocation7 + $0x128] ss:$16 sps:$4 sm:$0xff]   ;;  %v4531_v51 = vld [vmem:[#allocation7 + $0x140] ss:$16 sps:$4 sm:$0xff]   ;;  %v4536_v52 = vld [vmem:[#allocation7 + $0x14c] ss:$16 sps:$4 sm:$0xff]  }
  0x8f   :  { %v4539_v53 = vld [vmem:[#allocation7 + $0x164] ss:$16 sps:$4 sm:$0xff]   ;;  %v4534_v54 = vld [vmem:[#allocation7 + $0x148] ss:$16 sps:$4 sm:$0xff]   ;;  %v4537_v55 = vld [vmem:[#allocation7 + $0x160] ss:$16 sps:$4 sm:$0xff]  }
  0x90   :  { %959 = vmatpush1.bf16.msra.mxu0 %v4483_v19  ;;  %1045 = vmatpush1.bf16.msra.mxu1 %v4486_v22  ;;  %v4542_v56 = vld [vmem:[#allocation7 + $0x16c] ss:$16 sps:$4 sm:$0xff]   ;;  %v4545_v57 = vld [vmem:[#allocation7 + $0x184] ss:$16 sps:$4 sm:$0xff]   ;;  %v4540_v58 = vld [vmem:[#allocation7 + $0x168] ss:$16 sps:$4 sm:$0xff]  }
  0x91   :  { %960 = vmatprep.subr.bf16.mxu0 %v4491_v21  ;;  %1046 = vmatprep.subr.bf16.mxu1 %v4494_v24  ;;  %v4543_v59 = vld [vmem:[#allocation7 + $0x180] ss:$16 sps:$4 sm:$0xff]   ;;  %v4548_v60 = vld [vmem:[#allocation7 + $0x18c] ss:$16 sps:$4 sm:$0xff]   ;;  %v4546_v61 = vld [vmem:[#allocation7 + $0x188] ss:$16 sps:$4 sm:$0xff]  }
  0x92   :  { %v4551_v62 = vld [vmem:[#allocation7 + $0x1a4] ss:$16 sps:$4 sm:$0xff]   ;;  %v4554_v63 = vld [vmem:[#allocation7 + $0x1ac] ss:$16 sps:$4 sm:$0xff]   ;;  %v4549_v1 = vld [vmem:[#allocation7 + $0x1a0] ss:$16 sps:$4 sm:$0xff]  }
  0x93   :  { %v4552_v2 = vld [vmem:[#allocation7 + $0x1a8] ss:$16 sps:$4 sm:$0xff]   ;;  %v4557_v3 = vld [vmem:[#allocation7 + $0x1c4] ss:$16 sps:$4 sm:$0xff]   ;;  %v4560_v4 = vld [vmem:[#allocation7 + $0x1cc] ss:$16 sps:$4 sm:$0xff]  }
  0x94   :  { %961 = vmatpush1.bf16.msra.mxu0 %v4489_v23  ;;  %1047 = vmatpush1.bf16.msra.mxu1 %v4492_v26  ;;  %v4555_v5 = vld [vmem:[#allocation7 + $0x1c0] ss:$16 sps:$4 sm:$0xff]   ;;  %v4558_v6 = vld [vmem:[#allocation7 + $0x1c8] ss:$16 sps:$4 sm:$0xff]   ;;  %v4563_v7 = vld [vmem:[#allocation7 + $0x1e4] ss:$16 sps:$4 sm:$0xff]  }
  0x95   :  { %962 = vmatprep.subr.bf16.mxu0 %v4497_v25  ;;  %1048 = vmatprep.subr.bf16.mxu1 %v4500_v28  ;;  %v4566_v8 = vld [vmem:[#allocation7 + $0x1ec] ss:$16 sps:$4 sm:$0xff]   ;;  %v4561_v9 = vld [vmem:[#allocation7 + $0x1e0] ss:$16 sps:$4 sm:$0xff]   ;;  %v4564_v10 = vld [vmem:[#allocation7 + $0x1e8] ss:$16 sps:$4 sm:$0xff]  }
  0x96   :  { %v4569_v11 = vld [vmem:[#allocation7 + $0x204] ss:$16 sps:$4 sm:$0xff]   ;;  %v4572_v12 = vld [vmem:[#allocation7 + $0x20c] ss:$16 sps:$4 sm:$0xff]   ;;  %v154_v14 = vshrl.u32 %v153_v13, 7  ;;  %s5294_s14 = smov [#allocation14]  }
  0x97   :  { %v151_v16 = vld [vmem:[%s5577_s2] sm:$0xf]  ;;  %v4591_v13 = vld [vmem:[#allocation7 + $0x280] ss:$16 sps:$4 sm:$0xff]   ;;  %s3896_s16 = sshll.u32 %s5294_s14, 4  ;;  %s3897_s16 = int_to_ptr.vmem [resolvable:$true] %s3896_s16 }
  0x98   :  { %963 = vmatpush1.bf16.msra.mxu0 %v4495_v27  ;;  %1049 = vmatpush1.bf16.msra.mxu1 %v4498_v30  ;;  %v5483_v15 = vsub.s32 0, %v154_v14  ;;  %v5488_v17 = vsub.s32 1, %v154_v14  ;;  %v5491_v19 = vsub.s32 2, %v154_v14  ;;  %v5494_v21 = vsub.s32 3, %v154_v14  ;;  %v4594_v14 = vld [vmem:[#allocation7 + $0x288] ss:$16 sps:$4 sm:$0xff]   ;;  %p5255_p1 = scmp.lt.s32.totalorder %s3897_s16, %s3897_s16 }
  0x99   :  { %964 = vmatprep.subr.bf16.mxu0 %v4503_v29  ;;  %1050 = vmatprep.subr.bf16.mxu1 %v4506_v32  ;;  %s5250_s1 = scalar_lea.vmem %s3897_s16, 256 }
  0x9a   :  { %v156_v18 = vrot.slane %v151_v16, %v5483_v15  ;;  %v160_v20 = vrot.slane %v151_v16, %v5488_v17  ;;  %v164_v25 = vrot.slane %v151_v16, %v5491_v19  ;;  %v168_v28 = vrot.slane %v151_v16, %v5494_v21  ;;  %v4599_v16 = vld [vmem:[#allocation7 + $0x2a4] ss:$16 sps:$4 sm:$0xff]   ;;  %p5251_p0 = scmp.ne.s32.totalorder %s3897_s16, %s5250_s1  ;;  %p5256_p2 = scmp.lt.s32.totalorder %s5250_s1, %s5250_s1 }
  0x9c   :  { %965 = vmatpush1.bf16.msra.mxu0 %v4501_v31  ;;  %1051 = vmatpush1.bf16.msra.mxu1 %v4504_v34  ;;  %p5257_p3 = por %p5256_p2, %p5255_p1 }
  0x9d   :  { %966 = vmatprep.subr.bf16.mxu0 %v4509_v33  ;;  %1052 = vmatprep.subr.bf16.mxu1 %v4512_v36 }
  0x9e   :  { %p5258_p4 = pnand %p5257_p3, %p5251_p0 }
  0xa0   :  { %967 = vmatpush1.bf16.msra.mxu0 %v4507_v35  ;;  %1053 = vmatpush1.bf16.msra.mxu1 %v4510_v38 }
  0xa1   :  { %968 = vmatprep.subr.bf16.mxu0 %v4515_v37  ;;  %1054 = vmatprep.subr.bf16.mxu1 %v4518_v40 }
  0xa4   :  { %969 = vmatpush1.bf16.msra.mxu0 %v4513_v39  ;;  %1055 = vmatpush1.bf16.msra.mxu1 %v4516_v42 }
  0xa5   :  { %970 = vmatprep.subr.bf16.mxu0 %v4521_v41  ;;  %1056 = vmatprep.subr.bf16.mxu1 %v4524_v44 }
  0xa8   :  { %971 = vmatpush1.bf16.msra.mxu0 %v4519_v43  ;;  %1057 = vmatpush1.bf16.msra.mxu1 %v4522_v46 }
  0xa9   :  { %972 = vmatprep.subr.bf16.mxu0 %v4527_v45  ;;  %1058 = vmatprep.subr.bf16.mxu1 %v4530_v48 }
  0xac   :  { %973 = vmatpush1.bf16.msra.mxu0 %v4525_v47  ;;  %1059 = vmatpush1.bf16.msra.mxu1 %v4528_v50 }
  0xad   :  { %974 = vmatprep.subr.bf16.mxu0 %v4533_v49  ;;  %1060 = vmatprep.subr.bf16.mxu1 %v4536_v52 }
  0xb0   :  { %975 = vmatpush1.bf16.msra.mxu0 %v4531_v51  ;;  %1061 = vmatpush1.bf16.msra.mxu1 %v4534_v54  ;;  %v4567_v54 = vld [vmem:[#allocation7 + $0x200] ss:$16 sps:$4 sm:$0xff]  }
  0xb1   :  { %976 = vmatprep.subr.bf16.mxu0 %v4539_v53  ;;  %1062 = vmatprep.subr.bf16.mxu1 %v4542_v56 }
  0xb4   :  { %977 = vmatpush1.bf16.msra.mxu0 %v4537_v55  ;;  %1063 = vmatpush1.bf16.msra.mxu1 %v4540_v58  ;;  %v4570_v55 = vld [vmem:[#allocation7 + $0x208] ss:$16 sps:$4 sm:$0xff]   ;;  %v4575_v58 = vld [vmem:[#allocation7 + $0x224] ss:$16 sps:$4 sm:$0xff]  }
  0xb5   :  { %978 = vmatprep.subr.bf16.mxu0 %v4545_v57  ;;  %1064 = vmatprep.subr.bf16.mxu1 %v4548_v60 }
  0xb8   :  { %979 = vmatpush1.bf16.msra.mxu0 %v4543_v59  ;;  %1065 = vmatpush1.bf16.msra.mxu1 %v4546_v61  ;;  %v4578_v59 = vld [vmem:[#allocation7 + $0x22c] ss:$16 sps:$4 sm:$0xff]  }
  0xb9   :  { %980 = vmatprep.subr.bf16.mxu0 %v4551_v62  ;;  %1066 = vmatprep.subr.bf16.mxu1 %v4554_v63  ;;  %v4573_v63 = vld [vmem:[#allocation7 + $0x220] ss:$16 sps:$4 sm:$0xff]  }
  0xbc   :  { %981 = vmatpush1.bf16.msra.mxu0 %v4549_v1  ;;  %1067 = vmatpush1.bf16.msra.mxu1 %v4552_v2  ;;  %v4576_v1 = vld [vmem:[#allocation7 + $0x228] ss:$16 sps:$4 sm:$0xff]  }
  0xbd   :  { %982 = vmatprep.subr.bf16.mxu0 %v4557_v3  ;;  %1068 = vmatprep.subr.bf16.mxu1 %v4560_v4  ;;  %v4581_v3 = vld [vmem:[#allocation7 + $0x244] ss:$16 sps:$4 sm:$0xff]   ;;  %v4584_v4 = vld [vmem:[#allocation7 + $0x24c] ss:$16 sps:$4 sm:$0xff]  }
  0xc0   :  { %983 = vmatpush1.bf16.msra.mxu0 %v4555_v5  ;;  %1069 = vmatpush1.bf16.msra.mxu1 %v4558_v6  ;;  %v4579_v5 = vld [vmem:[#allocation7 + $0x240] ss:$16 sps:$4 sm:$0xff]   ;;  %v4582_v6 = vld [vmem:[#allocation7 + $0x248] ss:$16 sps:$4 sm:$0xff]  }
  0xc1   :  { %984 = vmatprep.subr.bf16.mxu0 %v4563_v7  ;;  %1070 = vmatprep.subr.bf16.mxu1 %v4566_v8  ;;  %v4587_v7 = vld [vmem:[#allocation7 + $0x264] ss:$16 sps:$4 sm:$0xff]   ;;  %v4590_v8 = vld [vmem:[#allocation7 + $0x26c] ss:$16 sps:$4 sm:$0xff]  }
  0xc4   :  { %985 = vmatpush1.bf16.msra.mxu0 %v4561_v9  ;;  %1071 = vmatpush1.bf16.msra.mxu1 %v4564_v10  ;;  %v4585_v9 = vld [vmem:[#allocation7 + $0x260] ss:$16 sps:$4 sm:$0xff]   ;;  %v4588_v10 = vld [vmem:[#allocation7 + $0x268] ss:$16 sps:$4 sm:$0xff]  }
  0xc5   :  { %997 = vmatprep.subr.bf16.mxu0 %v4569_v11  ;;  %1083 = vmatprep.subr.bf16.mxu1 %v4572_v12  ;;  %v4593_v11 = vld [vmem:[#allocation7 + $0x284] ss:$16 sps:$4 sm:$0xff]   ;;  %v4596_v12 = vld [vmem:[#allocation7 + $0x28c] ss:$16 sps:$4 sm:$0xff]  }
 0x15a   :  { %v256_v22 = vpop.f32.mrb[0].mxu0  ;;  %v299_v34 = vpop.f32.mrb[0].mxu1 }
 0x15b   :  { %v257_v23 = vadd.f32 %v256_v22, %v156_v18  ;;  %v258_v24 = vpop.f32.mrb[1].mxu0  ;;  %v300_v36 = vadd.f32 %v299_v34, %v164_v25  ;;  %v301_v37 = vpop.f32.mrb[1].mxu1  ;;  %v4600_v22 = vld [vmem:[#allocation7 + $0x2a8] ss:$16 sps:$4 sm:$0xff]  }
 0x15c   :  { %v259_v26 = vadd.f32 %v258_v24, %v160_v20  ;;  %v260_v27 = vpop.f32.mrb[2].mxu0  ;;  %v302_v39 = vadd.f32 %v301_v37, %v168_v28  ;;  %v303_v40 = vpop.f32.mrb[2].mxu1  ;;  %v4608_v24 = vld [vmem:[#allocation7 + $0x2cc] ss:$16 sps:$4 sm:$0xff]   ;;  %v4618_v34 = vld [vmem:[#allocation7 + $0x308] ss:$16 sps:$4 sm:$0xff]  }
 0x15d   :  { %v308_v29 = vmul.f32 0.2, %v257_v23  ;;  %v261_v30 = vadd.f32 %v260_v27, %v156_v18  ;;  %v262_v31 = vpop.f32.mrb[3].mxu0  ;;  %v310_v43 = vmul.f32 0.2, %v300_v36  ;;  %v304_v44 = vadd.f32 %v303_v40, %v164_v25  ;;  %v305_v45 = vpop.f32.mrb[3].mxu1 }
 0x15e   :  { %v309_v32 = vmul.f32 0.2, %v259_v26  ;;  %v263_v33 = vadd.f32 %v262_v31, %v160_v20  ;;  %v311_v48 = vmul.f32 0.2, %v302_v39  ;;  %v306_v49 = vadd.f32 %v305_v45, %v168_v28  ;;  %v4602_v18 = vld [vmem:[#allocation7 + $0x2ac] ss:$16 sps:$4 sm:$0xff]  }
 0x15f   :  { %v312_v35 = vmul.f32 0.2, %v261_v30  ;;  %v316_v41 = vmax.f32 %v257_v23, %v308_v29  ;;  %v318_v51 = vmax.f32 %v300_v36, %v310_v43  ;;  %v314_v52 = vmul.f32 0.2, %v304_v44  ;;  %v4597_v20 = vld [vmem:[#allocation7 + $0x2a0] ss:$16 sps:$4 sm:$0xff]  }
 0x160   :  { %v313_v38 = vmul.f32 0.2, %v263_v33  ;;  %v317_v46 = vmax.f32 %v259_v26, %v309_v32  ;;  %v319_v56 = vmax.f32 %v302_v39, %v311_v48  ;;  %v315_v57 = vmul.f32 0.2, %v306_v49  ;;  %v4605_v23 = vld [vmem:[#allocation7 + $0x2c4] ss:$16 sps:$4 sm:$0xff]  }
 0x161   :  { %v320_v42 = vmax.f32 %v261_v30, %v312_v35  ;;  %v322_v60 = vmax.f32 %v304_v44, %v314_v52  ;;  %v4603_v25 = vld [vmem:[#allocation7 + $0x2c0] ss:$16 sps:$4 sm:$0xff]   ;;  %v4606_v26 = vld [vmem:[#allocation7 + $0x2c8] ss:$16 sps:$4 sm:$0xff]   ;;  %v4611_v27 = vld [vmem:[#allocation7 + $0x2e4] ss:$16 sps:$4 sm:$0xff]  }
 0x162   :  { %v321_v47 = vmax.f32 %v263_v33, %v313_v38  ;;  %v323_v61 = vmax.f32 %v306_v49, %v315_v57  ;;  %v4614_v28 = vld [vmem:[#allocation7 + $0x2ec] ss:$16 sps:$4 sm:$0xff]   ;;  %v4609_v29 = vld [vmem:[#allocation7 + $0x2e0] ss:$16 sps:$4 sm:$0xff]   ;;  %v4612_v30 = vld [vmem:[#allocation7 + $0x2e8] ss:$16 sps:$4 sm:$0xff]  }
 0x163   :  { %v425_v50 = vpack.c.bf16 %v320_v42, %v316_v41  ;;  %v5498_v62 = vpack.c.bf16 %v322_v60, %v318_v51  ;;  %v4617_v31 = vld [vmem:[#allocation7 + $0x304] ss:$16 sps:$4 sm:$0xff]   ;;  %v4620_v32 = vld [vmem:[#allocation7 + $0x30c] ss:$16 sps:$4 sm:$0xff]   ;;  %v4615_v33 = vld [vmem:[#allocation7 + $0x300] ss:$16 sps:$4 sm:$0xff]  }
 0x164   :  { %v426_v53 = vpack.c.bf16 %v321_v47, %v317_v46  ;;  %v428_v2 = vpack.c.bf16 %v323_v61, %v319_v56  ;;  %v4623_v35 = vld [vmem:[#allocation8 + $0x4] ss:$16 sps:$4 sm:$0xff]   ;;  %v4626_v36 = vld [vmem:[#allocation8 + $0xc] ss:$16 sps:$4 sm:$0xff]   ;;  %v4621_v37 = vld [vmem:[#allocation8] ss:$16 sps:$4 sm:$0xff]  }
 0x165   :  { %v4624_v38 = vld [vmem:[#allocation8 + $0x8] ss:$16 sps:$4 sm:$0xff]   ;;  %v4629_v39 = vld [vmem:[#allocation8 + $0x24] ss:$16 sps:$4 sm:$0xff]   ;;  %v4632_v40 = vld [vmem:[#allocation8 + $0x2c] ss:$16 sps:$4 sm:$0xff]  }
 0x166   :  { %986 = vmatprep.mubr.bf16.mxu0 %v426_v53  ;;  %1072 = vmatprep.mubr.bf16.mxu1 %v426_v53  ;;  %v4627_v41 = vld [vmem:[#allocation8 + $0x20] ss:$16 sps:$4 sm:$0xff]   ;;  %v4630_v42 = vld [vmem:[#allocation8 + $0x28] ss:$16 sps:$4 sm:$0xff]   ;;  %v4635_v43 = vld [vmem:[#allocation8 + $0x44] ss:$16 sps:$4 sm:$0xff]  }
 0x167   :  { %987 = vmatmul.mubr.bf16.vlgmr.msra.gmra.mrb[4].mxu0 %v425_v50  ;;  %1073 = vmatmul.mubr.bf16.vlgmr.msra.gmra.mrb[4].mxu1 %v425_v50  ;;  %v4638_v44 = vld [vmem:[#allocation8 + $0x4c] ss:$16 sps:$4 sm:$0xff]   ;;  %v4633_v45 = vld [vmem:[#allocation8 + $0x40] ss:$16 sps:$4 sm:$0xff]   ;;  %v4636_v46 = vld [vmem:[#allocation8 + $0x48] ss:$16 sps:$4 sm:$0xff]  }
 0x168   :  { %998 = vmatpush1.bf16.msra.mxu0 %v4567_v54  ;;  %1084 = vmatpush1.bf16.msra.mxu1 %v4570_v55  ;;  %v4641_v47 = vld [vmem:[#allocation8 + $0x64] ss:$16 sps:$4 sm:$0xff]   ;;  %v4644_v48 = vld [vmem:[#allocation8 + $0x6c] ss:$16 sps:$4 sm:$0xff]   ;;  %v4639_v49 = vld [vmem:[#allocation8 + $0x60] ss:$16 sps:$4 sm:$0xff]  }
 0x169   :  { %999 = vmatprep.subr.bf16.mxu0 %v4575_v58  ;;  %1085 = vmatprep.subr.bf16.mxu1 %v4578_v59  ;;  %v4642_v50 = vld [vmem:[#allocation8 + $0x68] ss:$16 sps:$4 sm:$0xff]   ;;  %v4647_v51 = vld [vmem:[#allocation8 + $0x84] ss:$16 sps:$4 sm:$0xff]   ;;  %v4650_v52 = vld [vmem:[#allocation8 + $0x8c] ss:$16 sps:$4 sm:$0xff]  }
 0x16a   :  { %4022 = vmatprep.mubr.msk.bf16.mxu0 %vm950_vm1, %v428_v2  ;;  %4023 = vmatprep.mubr.msk.bf16.mxu1 %vm950_vm1, %v428_v2  ;;  %v4645_v53 = vld [vmem:[#allocation8 + $0x80] ss:$16 sps:$4 sm:$0xff]   ;;  %v4648_v54 = vld [vmem:[#allocation8 + $0x88] ss:$16 sps:$4 sm:$0xff]   ;;  %v4653_v55 = vld [vmem:[#allocation8 + $0xa4] ss:$16 sps:$4 sm:$0xff]  }
 0x16b   :  { %v4656_v56 = vld [vmem:[#allocation8 + $0xac] ss:$16 sps:$4 sm:$0xff]   ;;  %v4651_v57 = vld [vmem:[#allocation8 + $0xa0] ss:$16 sps:$4 sm:$0xff]   ;;  %v4654_v58 = vld [vmem:[#allocation8 + $0xa8] ss:$16 sps:$4 sm:$0xff]  }
 0x16c   :  { %1000 = vmatpush1.bf16.msra.mxu0 %v4573_v63  ;;  %1086 = vmatpush1.bf16.msra.mxu1 %v4576_v1  ;;  %v4659_v59 = vld [vmem:[#allocation8 + $0xc4] ss:$16 sps:$4 sm:$0xff]   ;;  %v4662_v60 = vld [vmem:[#allocation8 + $0xcc] ss:$16 sps:$4 sm:$0xff]   ;;  %v4657_v61 = vld [vmem:[#allocation8 + $0xc0] ss:$16 sps:$4 sm:$0xff]  }
 0x16d   :  { %1001 = vmatprep.subr.bf16.mxu0 %v4581_v3  ;;  %1087 = vmatprep.subr.bf16.mxu1 %v4584_v4  ;;  %v4665_v63 = vld [vmem:[#allocation8 + $0xe4] ss:$16 sps:$4 sm:$0xff]   ;;  %v4668_v1 = vld [vmem:[#allocation8 + $0xec] ss:$16 sps:$4 sm:$0xff]   ;;  %v4663_v2 = vld [vmem:[#allocation8 + $0xe0] ss:$16 sps:$4 sm:$0xff]  }
 0x16e   :  { %v4666_v3 = vld [vmem:[#allocation8 + $0xe8] ss:$16 sps:$4 sm:$0xff]   ;;  %v4671_v4 = vld [vmem:[#allocation8 + $0x104] ss:$16 sps:$4 sm:$0xff]  }
 0x170   :  { %1002 = vmatpush1.bf16.msra.mxu0 %v4579_v5  ;;  %1088 = vmatpush1.bf16.msra.mxu1 %v4582_v6  ;;  %v4674_v5 = vld [vmem:[#allocation8 + $0x10c] ss:$16 sps:$4 sm:$0xff]   ;;  %v4669_v6 = vld [vmem:[#allocation8 + $0x100] ss:$16 sps:$4 sm:$0xff]  }
 0x171   :  { %1003 = vmatprep.subr.bf16.mxu0 %v4587_v7  ;;  %1089 = vmatprep.subr.bf16.mxu1 %v4590_v8  ;;  %v4672_v7 = vld [vmem:[#allocation8 + $0x108] ss:$16 sps:$4 sm:$0xff]   ;;  %v4677_v8 = vld [vmem:[#allocation8 + $0x124] ss:$16 sps:$4 sm:$0xff]  }
 0x174   :  { %1004 = vmatpush1.bf16.msra.mxu0 %v4585_v9  ;;  %1090 = vmatpush1.bf16.msra.mxu1 %v4588_v10  ;;  %v4680_v9 = vld [vmem:[#allocation8 + $0x12c] ss:$16 sps:$4 sm:$0xff]   ;;  %v4675_v10 = vld [vmem:[#allocation8 + $0x120] ss:$16 sps:$4 sm:$0xff]  }
 0x175   :  { %1005 = vmatprep.subr.bf16.mxu0 %v4593_v11  ;;  %1091 = vmatprep.subr.bf16.mxu1 %v4596_v12  ;;  %v4678_v11 = vld [vmem:[#allocation8 + $0x128] ss:$16 sps:$4 sm:$0xff]   ;;  %v4683_v12 = vld [vmem:[#allocation8 + $0x144] ss:$16 sps:$4 sm:$0xff]  }
 0x178   :  { %1006 = vmatpush1.bf16.msra.mxu0 %v4591_v13  ;;  %1092 = vmatpush1.bf16.msra.mxu1 %v4594_v14  ;;  %v4686_v13 = vld [vmem:[#allocation8 + $0x14c] ss:$16 sps:$4 sm:$0xff]   ;;  %v4681_v14 = vld [vmem:[#allocation8 + $0x140] ss:$16 sps:$4 sm:$0xff]  }
 0x179   :  { %1007 = vmatprep.subr.bf16.mxu0 %v4599_v16  ;;  %1093 = vmatprep.subr.bf16.mxu1 %v4602_v18  ;;  %v4684_v16 = vld [vmem:[#allocation8 + $0x148] ss:$16 sps:$4 sm:$0xff]   ;;  %v4689_v18 = vld [vmem:[#allocation8 + $0x164] ss:$16 sps:$4 sm:$0xff]  }
 0x17c   :  { %1008 = vmatpush1.bf16.msra.mxu0 %v4597_v20  ;;  %1094 = vmatpush1.bf16.msra.mxu1 %v4600_v22  ;;  %v4692_v20 = vld [vmem:[#allocation8 + $0x16c] ss:$16 sps:$4 sm:$0xff]   ;;  %v4687_v22 = vld [vmem:[#allocation8 + $0x160] ss:$16 sps:$4 sm:$0xff]  }
 0x17d   :  { %1009 = vmatprep.subr.bf16.mxu0 %v4605_v23  ;;  %1095 = vmatprep.subr.bf16.mxu1 %v4608_v24  ;;  %v4690_v23 = vld [vmem:[#allocation8 + $0x168] ss:$16 sps:$4 sm:$0xff]   ;;  %v4695_v24 = vld [vmem:[#allocation8 + $0x184] ss:$16 sps:$4 sm:$0xff]  }
 0x180   :  { %1010 = vmatpush1.bf16.msra.mxu0 %v4603_v25  ;;  %1096 = vmatpush1.bf16.msra.mxu1 %v4606_v26  ;;  %v4698_v25 = vld [vmem:[#allocation8 + $0x18c] ss:$16 sps:$4 sm:$0xff]   ;;  %v4693_v26 = vld [vmem:[#allocation8 + $0x180] ss:$16 sps:$4 sm:$0xff]  }
 0x181   :  { %1011 = vmatprep.subr.bf16.mxu0 %v4611_v27  ;;  %1097 = vmatprep.subr.bf16.mxu1 %v4614_v28  ;;  %v4696_v27 = vld [vmem:[#allocation8 + $0x188] ss:$16 sps:$4 sm:$0xff]   ;;  %v4701_v28 = vld [vmem:[#allocation8 + $0x1a4] ss:$16 sps:$4 sm:$0xff]  }
 0x184   :  { %1012 = vmatpush1.bf16.msra.mxu0 %v4609_v29  ;;  %1098 = vmatpush1.bf16.msra.mxu1 %v4612_v30  ;;  %v4704_v29 = vld [vmem:[#allocation8 + $0x1ac] ss:$16 sps:$4 sm:$0xff]   ;;  %v4699_v30 = vld [vmem:[#allocation8 + $0x1a0] ss:$16 sps:$4 sm:$0xff]  }
 0x185   :  { %1013 = vmatprep.subr.bf16.mxu0 %v4617_v31  ;;  %1099 = vmatprep.subr.bf16.mxu1 %v4620_v32  ;;  %v4702_v31 = vld [vmem:[#allocation8 + $0x1a8] ss:$16 sps:$4 sm:$0xff]   ;;  %v4707_v32 = vld [vmem:[#allocation8 + $0x1c4] ss:$16 sps:$4 sm:$0xff]  }
 0x188   :  { %1014 = vmatpush1.bf16.msra.mxu0 %v4615_v33  ;;  %1100 = vmatpush1.bf16.msra.mxu1 %v4618_v34  ;;  %v4710_v33 = vld [vmem:[#allocation8 + $0x1cc] ss:$16 sps:$4 sm:$0xff]   ;;  %v4705_v34 = vld [vmem:[#allocation8 + $0x1c0] ss:$16 sps:$4 sm:$0xff]  }
 0x189   :  { %1771 = vmatprep.subr.bf16.mxu0 %v4623_v35  ;;  %1857 = vmatprep.subr.bf16.mxu1 %v4626_v36  ;;  %v4708_v35 = vld [vmem:[#allocation8 + $0x1c8] ss:$16 sps:$4 sm:$0xff]   ;;  %v4713_v36 = vld [vmem:[#allocation8 + $0x1e4] ss:$16 sps:$4 sm:$0xff]  }
 0x18b   :  { %1030 = vmatmul.mubr.bf16.vlgmr.msra.gmra.mrb[4].mxu0 %v5498_v62  ;;  %1116 = vmatmul.mubr.bf16.vlgmr.msra.gmra.mrb[4].mxu1 %v5498_v62  ;;  %v4660_v62 = vld [vmem:[#allocation8 + $0xc8] ss:$16 sps:$4 sm:$0xff]  }
 0x18c   :  { %1772 = vmatpush1.bf16.msra.mxu0 %v4621_v37  ;;  %1858 = vmatpush1.bf16.msra.mxu1 %v4624_v38  ;;  %v4716_v37 = vld [vmem:[#allocation8 + $0x1ec] ss:$16 sps:$4 sm:$0xff]   ;;  %v4711_v38 = vld [vmem:[#allocation8 + $0x1e0] ss:$16 sps:$4 sm:$0xff]  }
 0x18d   :  { %1773 = vmatprep.subr.bf16.mxu0 %v4629_v39  ;;  %1859 = vmatprep.subr.bf16.mxu1 %v4632_v40  ;;  %v4714_v39 = vld [vmem:[#allocation8 + $0x1e8] ss:$16 sps:$4 sm:$0xff]   ;;  %v4719_v40 = vld [vmem:[#allocation8 + $0x204] ss:$16 sps:$4 sm:$0xff]  }
 0x190   :  { %1774 = vmatpush1.bf16.msra.mxu0 %v4627_v41  ;;  %1860 = vmatpush1.bf16.msra.mxu1 %v4630_v42  ;;  %v4722_v41 = vld [vmem:[#allocation8 + $0x20c] ss:$16 sps:$4 sm:$0xff]   ;;  %v424_v42 = vld [vmem:[%s5579_s4] sm:$0xf] }
 0x191   :  { %1775 = vmatprep.subr.bf16.mxu0 %v4635_v43  ;;  %1861 = vmatprep.subr.bf16.mxu1 %v4638_v44  ;;  %v433_v43 = vrot.slane %v424_v42, %v5483_v15  ;;  %v441_v44 = vrot.slane %v424_v42, %v5491_v19 }
 0x194   :  { %1776 = vmatpush1.bf16.msra.mxu0 %v4633_v45  ;;  %1862 = vmatpush1.bf16.msra.mxu1 %v4636_v46  ;;  %v437_v45 = vrot.slane %v424_v42, %v5488_v17  ;;  %v445_v46 = vrot.slane %v424_v42, %v5494_v21  ;;  %v4749_v42 = vld [vmem:[#allocation8 + $0x2a4] ss:$16 sps:$4 sm:$0xff]  }
 0x195   :  { %1777 = vmatprep.subr.bf16.mxu0 %v4641_v47  ;;  %1863 = vmatprep.subr.bf16.mxu1 %v4644_v48 }
 0x198   :  { %1778 = vmatpush1.bf16.msra.mxu0 %v4639_v49  ;;  %1864 = vmatpush1.bf16.msra.mxu1 %v4642_v50 }
 0x199   :  { %1779 = vmatprep.subr.bf16.mxu0 %v4647_v51  ;;  %1865 = vmatprep.subr.bf16.mxu1 %v4650_v52 }
 0x19c   :  { %1780 = vmatpush1.bf16.msra.mxu0 %v4645_v53  ;;  %1866 = vmatpush1.bf16.msra.mxu1 %v4648_v54 }
 0x19d   :  { %1781 = vmatprep.subr.bf16.mxu0 %v4653_v55  ;;  %1867 = vmatprep.subr.bf16.mxu1 %v4656_v56 }
 0x1a0   :  { %1782 = vmatpush1.bf16.msra.mxu0 %v4651_v57  ;;  %1868 = vmatpush1.bf16.msra.mxu1 %v4654_v58 }
 0x1a1   :  { %1783 = vmatprep.subr.bf16.mxu0 %v4659_v59  ;;  %1869 = vmatprep.subr.bf16.mxu1 %v4662_v60 }
 0x1a4   :  { %1784 = vmatpush1.bf16.msra.mxu0 %v4657_v61  ;;  %1870 = vmatpush1.bf16.msra.mxu1 %v4660_v62 }
 0x1a5   :  { %1785 = vmatprep.subr.bf16.mxu0 %v4665_v63  ;;  %1871 = vmatprep.subr.bf16.mxu1 %v4668_v1 }
 0x1a8   :  { %1786 = vmatpush1.bf16.msra.mxu0 %v4663_v2  ;;  %1872 = vmatpush1.bf16.msra.mxu1 %v4666_v3 }
 0x1a9   :  { %1787 = vmatprep.subr.bf16.mxu0 %v4671_v4  ;;  %1873 = vmatprep.subr.bf16.mxu1 %v4674_v5 }
 0x1ac   :  { %1788 = vmatpush1.bf16.msra.mxu0 %v4669_v6  ;;  %1874 = vmatpush1.bf16.msra.mxu1 %v4672_v7 }
 0x1ad   :  { %1789 = vmatprep.subr.bf16.mxu0 %v4677_v8  ;;  %1875 = vmatprep.subr.bf16.mxu1 %v4680_v9 }
 0x1b0   :  { %1790 = vmatpush1.bf16.msra.mxu0 %v4675_v10  ;;  %1876 = vmatpush1.bf16.msra.mxu1 %v4678_v11 }
 0x1b1   :  { %1791 = vmatprep.subr.bf16.mxu0 %v4683_v12  ;;  %1877 = vmatprep.subr.bf16.mxu1 %v4686_v13 }
 0x1b4   :  { %1792 = vmatpush1.bf16.msra.mxu0 %v4681_v14  ;;  %1878 = vmatpush1.bf16.msra.mxu1 %v4684_v16 }
 0x1b5   :  { %1793 = vmatprep.subr.bf16.mxu0 %v4689_v18  ;;  %1879 = vmatprep.subr.bf16.mxu1 %v4692_v20 }
 0x1b8   :  { %1794 = vmatpush1.bf16.msra.mxu0 %v4687_v22  ;;  %1880 = vmatpush1.bf16.msra.mxu1 %v4690_v23 }
 0x1b9   :  { %1795 = vmatprep.subr.bf16.mxu0 %v4695_v24  ;;  %1881 = vmatprep.subr.bf16.mxu1 %v4698_v25  ;;  %v4717_v24 = vld [vmem:[#allocation8 + $0x200] ss:$16 sps:$4 sm:$0xff]   ;;  %v4720_v25 = vld [vmem:[#allocation8 + $0x208] ss:$16 sps:$4 sm:$0xff]  }
 0x1bc   :  { %1796 = vmatpush1.bf16.msra.mxu0 %v4693_v26  ;;  %1882 = vmatpush1.bf16.msra.mxu1 %v4696_v27  ;;  %v4725_v26 = vld [vmem:[#allocation8 + $0x224] ss:$16 sps:$4 sm:$0xff]   ;;  %v4728_v27 = vld [vmem:[#allocation8 + $0x22c] ss:$16 sps:$4 sm:$0xff]  }
 0x1bd   :  { %1797 = vmatprep.subr.bf16.mxu0 %v4701_v28  ;;  %1883 = vmatprep.subr.bf16.mxu1 %v4704_v29  ;;  %v4723_v28 = vld [vmem:[#allocation8 + $0x220] ss:$16 sps:$4 sm:$0xff]   ;;  %v4726_v29 = vld [vmem:[#allocation8 + $0x228] ss:$16 sps:$4 sm:$0xff]  }
 0x1c0   :  { %1798 = vmatpush1.bf16.msra.mxu0 %v4699_v30  ;;  %1884 = vmatpush1.bf16.msra.mxu1 %v4702_v31  ;;  %v4731_v30 = vld [vmem:[#allocation8 + $0x244] ss:$16 sps:$4 sm:$0xff]   ;;  %v4734_v31 = vld [vmem:[#allocation8 + $0x24c] ss:$16 sps:$4 sm:$0xff]  }
 0x1c1   :  { %1799 = vmatprep.subr.bf16.mxu0 %v4707_v32  ;;  %1885 = vmatprep.subr.bf16.mxu1 %v4710_v33  ;;  %v4729_v32 = vld [vmem:[#allocation8 + $0x240] ss:$16 sps:$4 sm:$0xff]   ;;  %v4732_v33 = vld [vmem:[#allocation8 + $0x248] ss:$16 sps:$4 sm:$0xff]  }
 0x1c4   :  { %1800 = vmatpush1.bf16.msra.mxu0 %v4705_v34  ;;  %1886 = vmatpush1.bf16.msra.mxu1 %v4708_v35  ;;  %v4737_v34 = vld [vmem:[#allocation8 + $0x264] ss:$16 sps:$4 sm:$0xff]   ;;  %v4740_v35 = vld [vmem:[#allocation8 + $0x26c] ss:$16 sps:$4 sm:$0xff]  }
 0x1c5   :  { %1801 = vmatprep.subr.bf16.mxu0 %v4713_v36  ;;  %1887 = vmatprep.subr.bf16.mxu1 %v4716_v37  ;;  %v4735_v36 = vld [vmem:[#allocation8 + $0x260] ss:$16 sps:$4 sm:$0xff]   ;;  %v4738_v37 = vld [vmem:[#allocation8 + $0x268] ss:$16 sps:$4 sm:$0xff]  }
 0x1c8   :  { %1802 = vmatpush1.bf16.msra.mxu0 %v4711_v38  ;;  %1888 = vmatpush1.bf16.msra.mxu1 %v4714_v39  ;;  %v4743_v38 = vld [vmem:[#allocation8 + $0x284] ss:$16 sps:$4 sm:$0xff]   ;;  %v4746_v39 = vld [vmem:[#allocation8 + $0x28c] ss:$16 sps:$4 sm:$0xff]  }
 0x1c9   :  { %1814 = vmatprep.subr.bf16.mxu0 %v4719_v40  ;;  %1900 = vmatprep.subr.bf16.mxu1 %v4722_v41  ;;  %v4741_v40 = vld [vmem:[#allocation8 + $0x280] ss:$16 sps:$4 sm:$0xff]   ;;  %v4744_v41 = vld [vmem:[#allocation8 + $0x288] ss:$16 sps:$4 sm:$0xff]  }
 0x25e   :  { %v1031_v47 = vpop.f32.mrb[4].mxu0  ;;  %v1117_v48 = vpop.f32.mrb[4].mxu1 }
 0x25f   :  { %v4379_v49 = vadd.f32 %v1031_v47, %v433_v43  ;;  %v4383_v50 = vadd.f32 %v1117_v48, %v441_v44  ;;  %v1033_v51 = vpop.f32.mrb[5].mxu0  ;;  %v1119_v52 = vpop.f32.mrb[5].mxu1  ;;  %v4758_v47 = vld [vmem:[#allocation8 + $0x2cc] ss:$16 sps:$4 sm:$0xff]   ;;  %v4753_v48 = vld [vmem:[#allocation8 + $0x2c0] ss:$16 sps:$4 sm:$0xff]  }
 0x260   :  { %v4380_v53 = vadd.f32 %v1033_v51, %v437_v45  ;;  %v4384_v54 = vadd.f32 %v1119_v52, %v445_v46  ;;  %v1035_v55 = vpop.f32.mrb[6].mxu0  ;;  %v1121_v56 = vpop.f32.mrb[6].mxu1  ;;  %v4764_v51 = vld [vmem:[#allocation8 + $0x2ec] ss:$16 sps:$4 sm:$0xff]   ;;  %v4759_v52 = vld [vmem:[#allocation8 + $0x2e0] ss:$16 sps:$4 sm:$0xff]  }
 0x261   :  { %v1126_v57 = vmul.f32 0.2, %v4379_v49  ;;  %v1128_v58 = vmul.f32 0.2, %v4383_v50  ;;  %v4381_v59 = vadd.f32 %v1035_v55, %v433_v43  ;;  %v4385_v60 = vadd.f32 %v1121_v56, %v441_v44  ;;  %v1037_v61 = vpop.f32.mrb[7].mxu0  ;;  %v1123_v62 = vpop.f32.mrb[7].mxu1 }
 0x262   :  { %v1127_v63 = vmul.f32 0.2, %v4380_v53  ;;  %v1129_v1 = vmul.f32 0.2, %v4384_v54  ;;  %v4382_v2 = vadd.f32 %v1037_v61, %v437_v45  ;;  %v4386_v3 = vadd.f32 %v1123_v62, %v445_v46  ;;  %v4752_v43 = vld [vmem:[#allocation8 + $0x2ac] ss:$16 sps:$4 sm:$0xff]  }
 0x263   :  { %v1130_v4 = vmul.f32 0.2, %v4381_v59  ;;  %v1132_v5 = vmul.f32 0.2, %v4385_v60  ;;  %v1134_v8 = vmax.f32 %v4379_v49, %v1126_v57  ;;  %v1136_v9 = vmax.f32 %v4383_v50, %v1128_v58  ;;  %v4747_v44 = vld [vmem:[#allocation8 + $0x2a0] ss:$16 sps:$4 sm:$0xff]  }
 0x264   :  { %v1131_v6 = vmul.f32 0.2, %v4382_v2  ;;  %v1133_v7 = vmul.f32 0.2, %v4386_v3  ;;  %v1135_v12 = vmax.f32 %v4380_v53, %v1127_v63  ;;  %v1137_v13 = vmax.f32 %v4384_v54, %v1129_v1  ;;  %v4750_v45 = vld [vmem:[#allocation8 + $0x2a8] ss:$16 sps:$4 sm:$0xff]  }
 0x265   :  { %v1138_v10 = vmax.f32 %v4381_v59, %v1130_v4  ;;  %v1140_v11 = vmax.f32 %v4385_v60, %v1132_v5  ;;  %v4755_v46 = vld [vmem:[#allocation8 + $0x2c4] ss:$16 sps:$4 sm:$0xff]   ;;  %v4756_v49 = vld [vmem:[#allocation8 + $0x2c8] ss:$16 sps:$4 sm:$0xff]   ;;  %v4770_v55 = vld [vmem:[#allocation8 + $0x30c] ss:$16 sps:$4 sm:$0xff]  }
 0x266   :  { %v1139_v14 = vmax.f32 %v4382_v2, %v1131_v6  ;;  %v1141_v16 = vmax.f32 %v4386_v3, %v1133_v7  ;;  %v4761_v50 = vld [vmem:[#allocation8 + $0x2e4] ss:$16 sps:$4 sm:$0xff]   ;;  %v4762_v53 = vld [vmem:[#allocation8 + $0x2e8] ss:$16 sps:$4 sm:$0xff]   ;;  %v4765_v56 = vld [vmem:[#allocation8 + $0x300] ss:$16 sps:$4 sm:$0xff]  }
 0x267   :  { %v1243_v18 = vpack.c.bf16 %v1138_v10, %v1134_v8  ;;  %v5511_v20 = vpack.c.bf16 %v1140_v11, %v1136_v9  ;;  %v4767_v54 = vld [vmem:[#allocation8 + $0x304] ss:$16 sps:$4 sm:$0xff]   ;;  %v4768_v57 = vld [vmem:[#allocation8 + $0x308] ss:$16 sps:$4 sm:$0xff]   ;;  %v4776_v59 = vld [vmem:[#allocation10 + $0xc] ss:$16 sps:$4 sm:$0xff]  }
 0x268   :  { %v1246_v22 = vpack.c.bf16 %v1141_v16, %v1137_v13  ;;  %v1244_v23 = vpack.c.bf16 %v1139_v14, %v1135_v12  ;;  %v4773_v58 = vld [vmem:[#allocation10 + $0x4] ss:$16 sps:$4 sm:$0xff]   ;;  %v4771_v60 = vld [vmem:[#allocation10] ss:$16 sps:$4 sm:$0xff]   ;;  %v4774_v61 = vld [vmem:[#allocation10 + $0x8] ss:$16 sps:$4 sm:$0xff]  }
 0x269   :  { %v4779_v62 = vld [vmem:[#allocation10 + $0x24] ss:$16 sps:$4 sm:$0xff]   ;;  %v4782_v63 = vld [vmem:[#allocation10 + $0x2c] ss:$16 sps:$4 sm:$0xff]   ;;  %v4777_v1 = vld [vmem:[#allocation10 + $0x20] ss:$16 sps:$4 sm:$0xff]  }
 0x26a   :  { %1803 = vmatprep.mubr.bf16.mxu0 %v1244_v23  ;;  %1889 = vmatprep.mubr.bf16.mxu1 %v1244_v23  ;;  %v4780_v2 = vld [vmem:[#allocation10 + $0x28] ss:$16 sps:$4 sm:$0xff]   ;;  %v4785_v3 = vld [vmem:[#allocation10 + $0x44] ss:$16 sps:$4 sm:$0xff]   ;;  %v4788_v4 = vld [vmem:[#allocation10 + $0x4c] ss:$16 sps:$4 sm:$0xff]  }
 0x26b   :  { %1804 = vmatmul.mubr.bf16.vlgmr.msra.gmra.mrb[8].mxu0 %v1243_v18  ;;  %1890 = vmatmul.mubr.bf16.vlgmr.msra.gmra.mrb[8].mxu1 %v1243_v18  ;;  %v4783_v5 = vld [vmem:[#allocation10 + $0x40] ss:$16 sps:$4 sm:$0xff]   ;;  %v4786_v6 = vld [vmem:[#allocation10 + $0x48] ss:$16 sps:$4 sm:$0xff]   ;;  %v4791_v7 = vld [vmem:[#allocation10 + $0x64] ss:$16 sps:$4 sm:$0xff]  }
 0x26c   :  { %1815 = vmatpush1.bf16.msra.mxu0 %v4717_v24  ;;  %1901 = vmatpush1.bf16.msra.mxu1 %v4720_v25  ;;  %v4794_v8 = vld [vmem:[#allocation10 + $0x6c] ss:$16 sps:$4 sm:$0xff]   ;;  %v4789_v9 = vld [vmem:[#allocation10 + $0x60] ss:$16 sps:$4 sm:$0xff]   ;;  %v4792_v10 = vld [vmem:[#allocation10 + $0x68] ss:$16 sps:$4 sm:$0xff]  }
 0x26d   :  { %4124 = vmatprep.mubr.msk.bf16.mxu0 %vm950_vm1, %v1246_v22  ;;  %4125 = vmatprep.mubr.msk.bf16.mxu1 %vm950_vm1, %v1246_v22  ;;  %v4797_v11 = vld [vmem:[#allocation10 + $0x84] ss:$16 sps:$4 sm:$0xff]   ;;  %v4800_v12 = vld [vmem:[#allocation10 + $0x8c] ss:$16 sps:$4 sm:$0xff]   ;;  %v4795_v13 = vld [vmem:[#allocation10 + $0x80] ss:$16 sps:$4 sm:$0xff]  }
 0x26e   :  { %1816 = vmatprep.subr.bf16.mxu0 %v4725_v26  ;;  %1902 = vmatprep.subr.bf16.mxu1 %v4728_v27  ;;  %v4798_v14 = vld [vmem:[#allocation10 + $0x88] ss:$16 sps:$4 sm:$0xff]   ;;  %v4803_v16 = vld [vmem:[#allocation10 + $0xa4] ss:$16 sps:$4 sm:$0xff]   ;;  %v4806_v18 = vld [vmem:[#allocation10 + $0xac] ss:$16 sps:$4 sm:$0xff]  }
 0x26f   :  { %v4804_v22 = vld [vmem:[#allocation10 + $0xa8] ss:$16 sps:$4 sm:$0xff]   ;;  %v4809_v23 = vld [vmem:[#allocation10 + $0xc4] ss:$16 sps:$4 sm:$0xff]   ;;  %v4812_v24 = vld [vmem:[#allocation10 + $0xcc] ss:$16 sps:$4 sm:$0xff]  }
 0x270   :  { %1817 = vmatpush1.bf16.msra.mxu0 %v4723_v28  ;;  %1903 = vmatpush1.bf16.msra.mxu1 %v4726_v29  ;;  %v4807_v25 = vld [vmem:[#allocation10 + $0xc0] ss:$16 sps:$4 sm:$0xff]   ;;  %v4810_v26 = vld [vmem:[#allocation10 + $0xc8] ss:$16 sps:$4 sm:$0xff]   ;;  %v4815_v27 = vld [vmem:[#allocation10 + $0xe4] ss:$16 sps:$4 sm:$0xff]  }
 0x271   :  { %1818 = vmatprep.subr.bf16.mxu0 %v4731_v30  ;;  %1904 = vmatprep.subr.bf16.mxu1 %v4734_v31  ;;  %v4818_v28 = vld [vmem:[#allocation10 + $0xec] ss:$16 sps:$4 sm:$0xff]   ;;  %v4813_v29 = vld [vmem:[#allocation10 + $0xe0] ss:$16 sps:$4 sm:$0xff]   ;;  %v4816_v30 = vld [vmem:[#allocation10 + $0xe8] ss:$16 sps:$4 sm:$0xff]  }
 0x272   :  { %v4821_v31 = vld [vmem:[#allocation10 + $0x104] ss:$16 sps:$4 sm:$0xff]  }
 0x274   :  { %1819 = vmatpush1.bf16.msra.mxu0 %v4729_v32  ;;  %1905 = vmatpush1.bf16.msra.mxu1 %v4732_v33  ;;  %v4824_v32 = vld [vmem:[#allocation10 + $0x10c] ss:$16 sps:$4 sm:$0xff]   ;;  %v4819_v33 = vld [vmem:[#allocation10 + $0x100] ss:$16 sps:$4 sm:$0xff]  }
 0x275   :  { %1820 = vmatprep.subr.bf16.mxu0 %v4737_v34  ;;  %1906 = vmatprep.subr.bf16.mxu1 %v4740_v35  ;;  %v4822_v34 = vld [vmem:[#allocation10 + $0x108] ss:$16 sps:$4 sm:$0xff]   ;;  %v4827_v35 = vld [vmem:[#allocation10 + $0x124] ss:$16 sps:$4 sm:$0xff]  }
 0x278   :  { %1821 = vmatpush1.bf16.msra.mxu0 %v4735_v36  ;;  %1907 = vmatpush1.bf16.msra.mxu1 %v4738_v37  ;;  %v4830_v36 = vld [vmem:[#allocation10 + $0x12c] ss:$16 sps:$4 sm:$0xff]   ;;  %v4825_v37 = vld [vmem:[#allocation10 + $0x120] ss:$16 sps:$4 sm:$0xff]  }
 0x279   :  { %1822 = vmatprep.subr.bf16.mxu0 %v4743_v38  ;;  %1908 = vmatprep.subr.bf16.mxu1 %v4746_v39  ;;  %v4828_v38 = vld [vmem:[#allocation10 + $0x128] ss:$16 sps:$4 sm:$0xff]   ;;  %v4833_v39 = vld [vmem:[#allocation10 + $0x144] ss:$16 sps:$4 sm:$0xff]  }
 0x27c   :  { %1823 = vmatpush1.bf16.msra.mxu0 %v4741_v40  ;;  %1909 = vmatpush1.bf16.msra.mxu1 %v4744_v41  ;;  %v4836_v40 = vld [vmem:[#allocation10 + $0x14c] ss:$16 sps:$4 sm:$0xff]   ;;  %v4831_v41 = vld [vmem:[#allocation10 + $0x140] ss:$16 sps:$4 sm:$0xff]  }
 0x27d   :  { %1824 = vmatprep.subr.bf16.mxu0 %v4749_v42  ;;  %1910 = vmatprep.subr.bf16.mxu1 %v4752_v43  ;;  %v4834_v42 = vld [vmem:[#allocation10 + $0x148] ss:$16 sps:$4 sm:$0xff]   ;;  %v4839_v43 = vld [vmem:[#allocation10 + $0x164] ss:$16 sps:$4 sm:$0xff]  }
 0x280   :  { %1825 = vmatpush1.bf16.msra.mxu0 %v4747_v44  ;;  %1911 = vmatpush1.bf16.msra.mxu1 %v4750_v45  ;;  %v4842_v44 = vld [vmem:[#allocation10 + $0x16c] ss:$16 sps:$4 sm:$0xff]   ;;  %v4837_v45 = vld [vmem:[#allocation10 + $0x160] ss:$16 sps:$4 sm:$0xff]  }
 0x281   :  { %1826 = vmatprep.subr.bf16.mxu0 %v4755_v46  ;;  %1912 = vmatprep.subr.bf16.mxu1 %v4758_v47  ;;  %v4840_v46 = vld [vmem:[#allocation10 + $0x168] ss:$16 sps:$4 sm:$0xff]   ;;  %v4845_v47 = vld [vmem:[#allocation10 + $0x184] ss:$16 sps:$4 sm:$0xff]  }
 0x284   :  { %1827 = vmatpush1.bf16.msra.mxu0 %v4753_v48  ;;  %1913 = vmatpush1.bf16.msra.mxu1 %v4756_v49  ;;  %v4848_v48 = vld [vmem:[#allocation10 + $0x18c] ss:$16 sps:$4 sm:$0xff]   ;;  %v4843_v49 = vld [vmem:[#allocation10 + $0x180] ss:$16 sps:$4 sm:$0xff]  }
 0x285   :  { %1828 = vmatprep.subr.bf16.mxu0 %v4761_v50  ;;  %1914 = vmatprep.subr.bf16.mxu1 %v4764_v51  ;;  %v4846_v50 = vld [vmem:[#allocation10 + $0x188] ss:$16 sps:$4 sm:$0xff]   ;;  %v4851_v51 = vld [vmem:[#allocation10 + $0x1a4] ss:$16 sps:$4 sm:$0xff]  }
 0x288   :  { %1829 = vmatpush1.bf16.msra.mxu0 %v4759_v52  ;;  %1915 = vmatpush1.bf16.msra.mxu1 %v4762_v53  ;;  %v4854_v52 = vld [vmem:[#allocation10 + $0x1ac] ss:$16 sps:$4 sm:$0xff]   ;;  %v4849_v53 = vld [vmem:[#allocation10 + $0x1a0] ss:$16 sps:$4 sm:$0xff]  }
 0x289   :  { %1830 = vmatprep.subr.bf16.mxu0 %v4767_v54  ;;  %1916 = vmatprep.subr.bf16.mxu1 %v4770_v55  ;;  %v4852_v54 = vld [vmem:[#allocation10 + $0x1a8] ss:$16 sps:$4 sm:$0xff]   ;;  %v4857_v55 = vld [vmem:[#allocation10 + $0x1c4] ss:$16 sps:$4 sm:$0xff]  }
 0x28c   :  { %1831 = vmatpush1.bf16.msra.mxu0 %v4765_v56  ;;  %1917 = vmatpush1.bf16.msra.mxu1 %v4768_v57  ;;  %v4860_v56 = vld [vmem:[#allocation10 + $0x1cc] ss:$16 sps:$4 sm:$0xff]   ;;  %v4855_v57 = vld [vmem:[#allocation10 + $0x1c0] ss:$16 sps:$4 sm:$0xff]  }
 0x28d   :  { %2588 = vmatprep.subr.bf16.mxu0 %v4773_v58  ;;  %2674 = vmatprep.subr.bf16.mxu1 %v4776_v59  ;;  %v4858_v58 = vld [vmem:[#allocation10 + $0x1c8] ss:$16 sps:$4 sm:$0xff]   ;;  %v4863_v59 = vld [vmem:[#allocation10 + $0x1e4] ss:$16 sps:$4 sm:$0xff]  }
 0x28f   :  { %1847 = vmatmul.mubr.bf16.vlgmr.msra.gmra.mrb[8].mxu0 %v5511_v20  ;;  %1933 = vmatmul.mubr.bf16.vlgmr.msra.gmra.mrb[8].mxu1 %v5511_v20  ;;  %v4801_v20 = vld [vmem:[#allocation10 + $0xa0] ss:$16 sps:$4 sm:$0xff]  }
 0x290   :  { %2589 = vmatpush1.bf16.msra.mxu0 %v4771_v60  ;;  %2675 = vmatpush1.bf16.msra.mxu1 %v4774_v61  ;;  %v4866_v60 = vld [vmem:[#allocation10 + $0x1ec] ss:$16 sps:$4 sm:$0xff]   ;;  %v4861_v61 = vld [vmem:[#allocation10 + $0x1e0] ss:$16 sps:$4 sm:$0xff]  }
 0x291   :  { %2590 = vmatprep.subr.bf16.mxu0 %v4779_v62  ;;  %2676 = vmatprep.subr.bf16.mxu1 %v4782_v63  ;;  %v4864_v62 = vld [vmem:[#allocation10 + $0x1e8] ss:$16 sps:$4 sm:$0xff]   ;;  %v4869_v63 = vld [vmem:[#allocation10 + $0x204] ss:$16 sps:$4 sm:$0xff]  }
 0x294   :  { %2591 = vmatpush1.bf16.msra.mxu0 %v4777_v1  ;;  %2677 = vmatpush1.bf16.msra.mxu1 %v4780_v2  ;;  %v4872_v1 = vld [vmem:[#allocation10 + $0x20c] ss:$16 sps:$4 sm:$0xff]   ;;  %v1242_v2 = vld [vmem:[%s5581_s6] sm:$0xf] }
 0x295   :  { %2592 = vmatprep.subr.bf16.mxu0 %v4785_v3  ;;  %2678 = vmatprep.subr.bf16.mxu1 %v4788_v4  ;;  %v1251_v3 = vrot.slane %v1242_v2, %v5483_v15  ;;  %v1259_v4 = vrot.slane %v1242_v2, %v5491_v19 }
 0x298   :  { %2593 = vmatpush1.bf16.msra.mxu0 %v4783_v5  ;;  %2679 = vmatpush1.bf16.msra.mxu1 %v4786_v6  ;;  %v1255_v5 = vrot.slane %v1242_v2, %v5488_v17  ;;  %v1263_v6 = vrot.slane %v1242_v2, %v5494_v21  ;;  %v4899_v2 = vld [vmem:[#allocation10 + $0x2a4] ss:$16 sps:$4 sm:$0xff]  }
 0x299   :  { %2594 = vmatprep.subr.bf16.mxu0 %v4791_v7  ;;  %2680 = vmatprep.subr.bf16.mxu1 %v4794_v8 }
 0x29c   :  { %2595 = vmatpush1.bf16.msra.mxu0 %v4789_v9  ;;  %2681 = vmatpush1.bf16.msra.mxu1 %v4792_v10 }
 0x29d   :  { %2596 = vmatprep.subr.bf16.mxu0 %v4797_v11  ;;  %2682 = vmatprep.subr.bf16.mxu1 %v4800_v12 }
 0x2a0   :  { %2597 = vmatpush1.bf16.msra.mxu0 %v4795_v13  ;;  %2683 = vmatpush1.bf16.msra.mxu1 %v4798_v14 }
 0x2a1   :  { %2598 = vmatprep.subr.bf16.mxu0 %v4803_v16  ;;  %2684 = vmatprep.subr.bf16.mxu1 %v4806_v18 }
 0x2a4   :  { %2599 = vmatpush1.bf16.msra.mxu0 %v4801_v20  ;;  %2685 = vmatpush1.bf16.msra.mxu1 %v4804_v22 }
 0x2a5   :  { %2600 = vmatprep.subr.bf16.mxu0 %v4809_v23  ;;  %2686 = vmatprep.subr.bf16.mxu1 %v4812_v24 }
 0x2a8   :  { %2601 = vmatpush1.bf16.msra.mxu0 %v4807_v25  ;;  %2687 = vmatpush1.bf16.msra.mxu1 %v4810_v26 }
 0x2a9   :  { %2602 = vmatprep.subr.bf16.mxu0 %v4815_v27  ;;  %2688 = vmatprep.subr.bf16.mxu1 %v4818_v28 }
 0x2ac   :  { %2603 = vmatpush1.bf16.msra.mxu0 %v4813_v29  ;;  %2689 = vmatpush1.bf16.msra.mxu1 %v4816_v30 }
 0x2ad   :  { %2604 = vmatprep.subr.bf16.mxu0 %v4821_v31  ;;  %2690 = vmatprep.subr.bf16.mxu1 %v4824_v32 }
 0x2b0   :  { %2605 = vmatpush1.bf16.msra.mxu0 %v4819_v33  ;;  %2691 = vmatpush1.bf16.msra.mxu1 %v4822_v34 }
 0x2b1   :  { %2606 = vmatprep.subr.bf16.mxu0 %v4827_v35  ;;  %2692 = vmatprep.subr.bf16.mxu1 %v4830_v36 }
 0x2b4   :  { %2607 = vmatpush1.bf16.msra.mxu0 %v4825_v37  ;;  %2693 = vmatpush1.bf16.msra.mxu1 %v4828_v38 }
 0x2b5   :  { %2608 = vmatprep.subr.bf16.mxu0 %v4833_v39  ;;  %2694 = vmatprep.subr.bf16.mxu1 %v4836_v40 }
 0x2b8   :  { %2609 = vmatpush1.bf16.msra.mxu0 %v4831_v41  ;;  %2695 = vmatpush1.bf16.msra.mxu1 %v4834_v42 }
 0x2b9   :  { %2610 = vmatprep.subr.bf16.mxu0 %v4839_v43  ;;  %2696 = vmatprep.subr.bf16.mxu1 %v4842_v44 }
 0x2bc   :  { %2611 = vmatpush1.bf16.msra.mxu0 %v4837_v45  ;;  %2697 = vmatpush1.bf16.msra.mxu1 %v4840_v46 }
 0x2bd   :  { %2612 = vmatprep.subr.bf16.mxu0 %v4845_v47  ;;  %2698 = vmatprep.subr.bf16.mxu1 %v4848_v48  ;;  %v4867_v47 = vld [vmem:[#allocation10 + $0x200] ss:$16 sps:$4 sm:$0xff]   ;;  %v4870_v48 = vld [vmem:[#allocation10 + $0x208] ss:$16 sps:$4 sm:$0xff]  }
 0x2c0   :  { %2613 = vmatpush1.bf16.msra.mxu0 %v4843_v49  ;;  %2699 = vmatpush1.bf16.msra.mxu1 %v4846_v50  ;;  %v4875_v49 = vld [vmem:[#allocation10 + $0x224] ss:$16 sps:$4 sm:$0xff]   ;;  %v4878_v50 = vld [vmem:[#allocation10 + $0x22c] ss:$16 sps:$4 sm:$0xff]  }
 0x2c1   :  { %2614 = vmatprep.subr.bf16.mxu0 %v4851_v51  ;;  %2700 = vmatprep.subr.bf16.mxu1 %v4854_v52  ;;  %v4873_v51 = vld [vmem:[#allocation10 + $0x220] ss:$16 sps:$4 sm:$0xff]   ;;  %v4876_v52 = vld [vmem:[#allocation10 + $0x228] ss:$16 sps:$4 sm:$0xff]  }
 0x2c4   :  { %2615 = vmatpush1.bf16.msra.mxu0 %v4849_v53  ;;  %2701 = vmatpush1.bf16.msra.mxu1 %v4852_v54  ;;  %v4881_v53 = vld [vmem:[#allocation10 + $0x244] ss:$16 sps:$4 sm:$0xff]   ;;  %v4884_v54 = vld [vmem:[#allocation10 + $0x24c] ss:$16 sps:$4 sm:$0xff]  }
 0x2c5   :  { %2616 = vmatprep.subr.bf16.mxu0 %v4857_v55  ;;  %2702 = vmatprep.subr.bf16.mxu1 %v4860_v56  ;;  %v4879_v55 = vld [vmem:[#allocation10 + $0x240] ss:$16 sps:$4 sm:$0xff]   ;;  %v4882_v56 = vld [vmem:[#allocation10 + $0x248] ss:$16 sps:$4 sm:$0xff]  }
 0x2c8   :  { %2617 = vmatpush1.bf16.msra.mxu0 %v4855_v57  ;;  %2703 = vmatpush1.bf16.msra.mxu1 %v4858_v58  ;;  %v4887_v57 = vld [vmem:[#allocation10 + $0x264] ss:$16 sps:$4 sm:$0xff]   ;;  %v4890_v58 = vld [vmem:[#allocation10 + $0x26c] ss:$16 sps:$4 sm:$0xff]  }
 0x2c9   :  { %2618 = vmatprep.subr.bf16.mxu0 %v4863_v59  ;;  %2704 = vmatprep.subr.bf16.mxu1 %v4866_v60  ;;  %v4885_v59 = vld [vmem:[#allocation10 + $0x260] ss:$16 sps:$4 sm:$0xff]   ;;  %v4888_v60 = vld [vmem:[#allocation10 + $0x268] ss:$16 sps:$4 sm:$0xff]  }
 0x2cc   :  { %2619 = vmatpush1.bf16.msra.mxu0 %v4861_v61  ;;  %2705 = vmatpush1.bf16.msra.mxu1 %v4864_v62  ;;  %v4893_v61 = vld [vmem:[#allocation10 + $0x284] ss:$16 sps:$4 sm:$0xff]   ;;  %v4896_v62 = vld [vmem:[#allocation10 + $0x28c] ss:$16 sps:$4 sm:$0xff]  }
 0x2cd   :  { %2631 = vmatprep.subr.bf16.mxu0 %v4869_v63  ;;  %2717 = vmatprep.subr.bf16.mxu1 %v4872_v1  ;;  %v4891_v63 = vld [vmem:[#allocation10 + $0x280] ss:$16 sps:$4 sm:$0xff]   ;;  %v4894_v1 = vld [vmem:[#allocation10 + $0x288] ss:$16 sps:$4 sm:$0xff]  }
 0x362   :  { %v1848_v7 = vpop.f32.mrb[8].mxu0  ;;  %v1934_v8 = vpop.f32.mrb[8].mxu1 }
 0x363   :  { %v4387_v9 = vadd.f32 %v1848_v7, %v1251_v3  ;;  %v4391_v10 = vadd.f32 %v1934_v8, %v1259_v4  ;;  %v1850_v11 = vpop.f32.mrb[9].mxu0  ;;  %v1936_v12 = vpop.f32.mrb[9].mxu1  ;;  %v4908_v7 = vld [vmem:[#allocation10 + $0x2cc] ss:$16 sps:$4 sm:$0xff]   ;;  %v4903_v8 = vld [vmem:[#allocation10 + $0x2c0] ss:$16 sps:$4 sm:$0xff]  }
 0x364   :  { %v4388_v13 = vadd.f32 %v1850_v11, %v1255_v5  ;;  %v4392_v14 = vadd.f32 %v1936_v12, %v1263_v6  ;;  %v1852_v16 = vpop.f32.mrb[10].mxu0  ;;  %v1938_v18 = vpop.f32.mrb[10].mxu1  ;;  %v4914_v11 = vld [vmem:[#allocation10 + $0x2ec] ss:$16 sps:$4 sm:$0xff]   ;;  %v4909_v12 = vld [vmem:[#allocation10 + $0x2e0] ss:$16 sps:$4 sm:$0xff]  }
 0x365   :  { %v1943_v20 = vmul.f32 0.2, %v4387_v9  ;;  %v1945_v22 = vmul.f32 0.2, %v4391_v10  ;;  %v4389_v23 = vadd.f32 %v1852_v16, %v1251_v3  ;;  %v4393_v24 = vadd.f32 %v1938_v18, %v1259_v4  ;;  %v1854_v25 = vpop.f32.mrb[11].mxu0  ;;  %v1940_v26 = vpop.f32.mrb[11].mxu1 }
 0x366   :  { %v1944_v27 = vmul.f32 0.2, %v4388_v13  ;;  %v1946_v28 = vmul.f32 0.2, %v4392_v14  ;;  %v4390_v29 = vadd.f32 %v1854_v25, %v1255_v5  ;;  %v4394_v30 = vadd.f32 %v1940_v26, %v1263_v6  ;;  %v4902_v3 = vld [vmem:[#allocation10 + $0x2ac] ss:$16 sps:$4 sm:$0xff]  }
 0x367   :  { %v1947_v31 = vmul.f32 0.2, %v4389_v23  ;;  %v1949_v32 = vmul.f32 0.2, %v4393_v24  ;;  %v1951_v35 = vmax.f32 %v4387_v9, %v1943_v20  ;;  %v1953_v36 = vmax.f32 %v4391_v10, %v1945_v22  ;;  %v4897_v4 = vld [vmem:[#allocation10 + $0x2a0] ss:$16 sps:$4 sm:$0xff]  }
 0x368   :  { %v1948_v33 = vmul.f32 0.2, %v4390_v29  ;;  %v1950_v34 = vmul.f32 0.2, %v4394_v30  ;;  %v1952_v39 = vmax.f32 %v4388_v13, %v1944_v27  ;;  %v1954_v40 = vmax.f32 %v4392_v14, %v1946_v28  ;;  %v4900_v5 = vld [vmem:[#allocation10 + $0x2a8] ss:$16 sps:$4 sm:$0xff]  }
 0x369   :  { %v1955_v37 = vmax.f32 %v4389_v23, %v1947_v31  ;;  %v1957_v38 = vmax.f32 %v4393_v24, %v1949_v32  ;;  %v4905_v6 = vld [vmem:[#allocation10 + $0x2c4] ss:$16 sps:$4 sm:$0xff]   ;;  %v4906_v9 = vld [vmem:[#allocation10 + $0x2c8] ss:$16 sps:$4 sm:$0xff]   ;;  %v4920_v16 = vld [vmem:[#allocation10 + $0x30c] ss:$16 sps:$4 sm:$0xff]  }
 0x36a   :  { %v1956_v41 = vmax.f32 %v4390_v29, %v1948_v33  ;;  %v1958_v42 = vmax.f32 %v4394_v30, %v1950_v34  ;;  %v4911_v10 = vld [vmem:[#allocation10 + $0x2e4] ss:$16 sps:$4 sm:$0xff]   ;;  %v4912_v13 = vld [vmem:[#allocation10 + $0x2e8] ss:$16 sps:$4 sm:$0xff]   ;;  %v4915_v18 = vld [vmem:[#allocation10 + $0x300] ss:$16 sps:$4 sm:$0xff]  }
 0x36b   :  { %v2060_v43 = vpack.c.bf16 %v1955_v37, %v1951_v35  ;;  %v5524_v44 = vpack.c.bf16 %v1957_v38, %v1953_v36  ;;  %v4917_v14 = vld [vmem:[#allocation10 + $0x304] ss:$16 sps:$4 sm:$0xff]   ;;  %v4918_v20 = vld [vmem:[#allocation10 + $0x308] ss:$16 sps:$4 sm:$0xff]   ;;  %v4926_v23 = vld [vmem:[#allocation11 + $0xc] ss:$16 sps:$4 sm:$0xff]  }
 0x36c   :  { %v2063_v45 = vpack.c.bf16 %v1958_v42, %v1954_v40  ;;  %v2061_v46 = vpack.c.bf16 %v1956_v41, %v1952_v39  ;;  %v4923_v22 = vld [vmem:[#allocation11 + $0x4] ss:$16 sps:$4 sm:$0xff]   ;;  %v4921_v24 = vld [vmem:[#allocation11] ss:$16 sps:$4 sm:$0xff]   ;;  %v4924_v25 = vld [vmem:[#allocation11 + $0x8] ss:$16 sps:$4 sm:$0xff]  }
 0x36d   :  { %v4929_v26 = vld [vmem:[#allocation11 + $0x24] ss:$16 sps:$4 sm:$0xff]   ;;  %v4932_v27 = vld [vmem:[#allocation11 + $0x2c] ss:$16 sps:$4 sm:$0xff]   ;;  %v4927_v28 = vld [vmem:[#allocation11 + $0x20] ss:$16 sps:$4 sm:$0xff]  }
 0x36e   :  { %2620 = vmatprep.mubr.bf16.mxu0 %v2061_v46  ;;  %2706 = vmatprep.mubr.bf16.mxu1 %v2061_v46  ;;  %v4930_v29 = vld [vmem:[#allocation11 + $0x28] ss:$16 sps:$4 sm:$0xff]   ;;  %v4935_v30 = vld [vmem:[#allocation11 + $0x44] ss:$16 sps:$4 sm:$0xff]   ;;  %v4938_v31 = vld [vmem:[#allocation11 + $0x4c] ss:$16 sps:$4 sm:$0xff]  }
 0x36f   :  { %2621 = vmatmul.mubr.bf16.vlgmr.msra.gmra.mrb[12].mxu0 %v2060_v43  ;;  %2707 = vmatmul.mubr.bf16.vlgmr.msra.gmra.mrb[12].mxu1 %v2060_v43  ;;  %v4933_v32 = vld [vmem:[#allocation11 + $0x40] ss:$16 sps:$4 sm:$0xff]   ;;  %v4936_v33 = vld [vmem:[#allocation11 + $0x48] ss:$16 sps:$4 sm:$0xff]   ;;  %v4941_v34 = vld [vmem:[#allocation11 + $0x64] ss:$16 sps:$4 sm:$0xff]  }
 0x370   :  { %2632 = vmatpush1.bf16.msra.mxu0 %v4867_v47  ;;  %2718 = vmatpush1.bf16.msra.mxu1 %v4870_v48  ;;  %v4944_v35 = vld [vmem:[#allocation11 + $0x6c] ss:$16 sps:$4 sm:$0xff]   ;;  %v4939_v36 = vld [vmem:[#allocation11 + $0x60] ss:$16 sps:$4 sm:$0xff]   ;;  %v4942_v37 = vld [vmem:[#allocation11 + $0x68] ss:$16 sps:$4 sm:$0xff]  }
 0x371   :  { %4226 = vmatprep.mubr.msk.bf16.mxu0 %vm950_vm1, %v2063_v45  ;;  %4227 = vmatprep.mubr.msk.bf16.mxu1 %vm950_vm1, %v2063_v45  ;;  %v4947_v38 = vld [vmem:[#allocation11 + $0x84] ss:$16 sps:$4 sm:$0xff]   ;;  %v4950_v39 = vld [vmem:[#allocation11 + $0x8c] ss:$16 sps:$4 sm:$0xff]   ;;  %v4945_v40 = vld [vmem:[#allocation11 + $0x80] ss:$16 sps:$4 sm:$0xff]  }
 0x372   :  { %2633 = vmatprep.subr.bf16.mxu0 %v4875_v49  ;;  %2719 = vmatprep.subr.bf16.mxu1 %v4878_v50  ;;  %v4948_v41 = vld [vmem:[#allocation11 + $0x88] ss:$16 sps:$4 sm:$0xff]   ;;  %v4953_v42 = vld [vmem:[#allocation11 + $0xa4] ss:$16 sps:$4 sm:$0xff]   ;;  %v4956_v43 = vld [vmem:[#allocation11 + $0xac] ss:$16 sps:$4 sm:$0xff]  }
 0x373   :  { %v4954_v45 = vld [vmem:[#allocation11 + $0xa8] ss:$16 sps:$4 sm:$0xff]   ;;  %v4959_v46 = vld [vmem:[#allocation11 + $0xc4] ss:$16 sps:$4 sm:$0xff]   ;;  %v4962_v47 = vld [vmem:[#allocation11 + $0xcc] ss:$16 sps:$4 sm:$0xff]  }
 0x374   :  { %2634 = vmatpush1.bf16.msra.mxu0 %v4873_v51  ;;  %2720 = vmatpush1.bf16.msra.mxu1 %v4876_v52  ;;  %v4957_v48 = vld [vmem:[#allocation11 + $0xc0] ss:$16 sps:$4 sm:$0xff]   ;;  %v4960_v49 = vld [vmem:[#allocation11 + $0xc8] ss:$16 sps:$4 sm:$0xff]   ;;  %v4965_v50 = vld [vmem:[#allocation11 + $0xe4] ss:$16 sps:$4 sm:$0xff]  }
 0x375   :  { %2635 = vmatprep.subr.bf16.mxu0 %v4881_v53  ;;  %2721 = vmatprep.subr.bf16.mxu1 %v4884_v54  ;;  %v4968_v51 = vld [vmem:[#allocation11 + $0xec] ss:$16 sps:$4 sm:$0xff]   ;;  %v4963_v52 = vld [vmem:[#allocation11 + $0xe0] ss:$16 sps:$4 sm:$0xff]   ;;  %v4966_v53 = vld [vmem:[#allocation11 + $0xe8] ss:$16 sps:$4 sm:$0xff]  }
 0x376   :  { %v4971_v54 = vld [vmem:[#allocation11 + $0x104] ss:$16 sps:$4 sm:$0xff]  }
 0x378   :  { %2636 = vmatpush1.bf16.msra.mxu0 %v4879_v55  ;;  %2722 = vmatpush1.bf16.msra.mxu1 %v4882_v56  ;;  %v4974_v55 = vld [vmem:[#allocation11 + $0x10c] ss:$16 sps:$4 sm:$0xff]   ;;  %v4969_v56 = vld [vmem:[#allocation11 + $0x100] ss:$16 sps:$4 sm:$0xff]  }
 0x379   :  { %2637 = vmatprep.subr.bf16.mxu0 %v4887_v57  ;;  %2723 = vmatprep.subr.bf16.mxu1 %v4890_v58  ;;  %v4972_v57 = vld [vmem:[#allocation11 + $0x108] ss:$16 sps:$4 sm:$0xff]   ;;  %v4977_v58 = vld [vmem:[#allocation11 + $0x124] ss:$16 sps:$4 sm:$0xff]  }
 0x37c   :  { %2638 = vmatpush1.bf16.msra.mxu0 %v4885_v59  ;;  %2724 = vmatpush1.bf16.msra.mxu1 %v4888_v60  ;;  %v4980_v59 = vld [vmem:[#allocation11 + $0x12c] ss:$16 sps:$4 sm:$0xff]   ;;  %v4975_v60 = vld [vmem:[#allocation11 + $0x120] ss:$16 sps:$4 sm:$0xff]  }
 0x37d   :  { %2639 = vmatprep.subr.bf16.mxu0 %v4893_v61  ;;  %2725 = vmatprep.subr.bf16.mxu1 %v4896_v62  ;;  %v4978_v61 = vld [vmem:[#allocation11 + $0x128] ss:$16 sps:$4 sm:$0xff]   ;;  %v4983_v62 = vld [vmem:[#allocation11 + $0x144] ss:$16 sps:$4 sm:$0xff]  }
 0x380   :  { %2640 = vmatpush1.bf16.msra.mxu0 %v4891_v63  ;;  %2726 = vmatpush1.bf16.msra.mxu1 %v4894_v1  ;;  %v4986_v63 = vld [vmem:[#allocation11 + $0x14c] ss:$16 sps:$4 sm:$0xff]   ;;  %v4981_v1 = vld [vmem:[#allocation11 + $0x140] ss:$16 sps:$4 sm:$0xff]  }
 0x381   :  { %2641 = vmatprep.subr.bf16.mxu0 %v4899_v2  ;;  %2727 = vmatprep.subr.bf16.mxu1 %v4902_v3  ;;  %v4984_v2 = vld [vmem:[#allocation11 + $0x148] ss:$16 sps:$4 sm:$0xff]   ;;  %v4989_v3 = vld [vmem:[#allocation11 + $0x164] ss:$16 sps:$4 sm:$0xff]  }
 0x384   :  { %2642 = vmatpush1.bf16.msra.mxu0 %v4897_v4  ;;  %2728 = vmatpush1.bf16.msra.mxu1 %v4900_v5  ;;  %v4992_v4 = vld [vmem:[#allocation11 + $0x16c] ss:$16 sps:$4 sm:$0xff]   ;;  %v4987_v5 = vld [vmem:[#allocation11 + $0x160] ss:$16 sps:$4 sm:$0xff]  }
 0x385   :  { %2643 = vmatprep.subr.bf16.mxu0 %v4905_v6  ;;  %2729 = vmatprep.subr.bf16.mxu1 %v4908_v7  ;;  %v4990_v6 = vld [vmem:[#allocation11 + $0x168] ss:$16 sps:$4 sm:$0xff]   ;;  %v4995_v7 = vld [vmem:[#allocation11 + $0x184] ss:$16 sps:$4 sm:$0xff]  }
 0x388   :  { %2644 = vmatpush1.bf16.msra.mxu0 %v4903_v8  ;;  %2730 = vmatpush1.bf16.msra.mxu1 %v4906_v9  ;;  %v4998_v8 = vld [vmem:[#allocation11 + $0x18c] ss:$16 sps:$4 sm:$0xff]   ;;  %v4993_v9 = vld [vmem:[#allocation11 + $0x180] ss:$16 sps:$4 sm:$0xff]  }
 0x389   :  { %2645 = vmatprep.subr.bf16.mxu0 %v4911_v10  ;;  %2731 = vmatprep.subr.bf16.mxu1 %v4914_v11  ;;  %v4996_v10 = vld [vmem:[#allocation11 + $0x188] ss:$16 sps:$4 sm:$0xff]   ;;  %v5001_v11 = vld [vmem:[#allocation11 + $0x1a4] ss:$16 sps:$4 sm:$0xff]  }
 0x38c   :  { %2646 = vmatpush1.bf16.msra.mxu0 %v4909_v12  ;;  %2732 = vmatpush1.bf16.msra.mxu1 %v4912_v13  ;;  %v5004_v12 = vld [vmem:[#allocation11 + $0x1ac] ss:$16 sps:$4 sm:$0xff]   ;;  %v4999_v13 = vld [vmem:[#allocation11 + $0x1a0] ss:$16 sps:$4 sm:$0xff]  }
 0x38d   :  { %2647 = vmatprep.subr.bf16.mxu0 %v4917_v14  ;;  %2733 = vmatprep.subr.bf16.mxu1 %v4920_v16  ;;  %v5002_v14 = vld [vmem:[#allocation11 + $0x1a8] ss:$16 sps:$4 sm:$0xff]   ;;  %v5007_v16 = vld [vmem:[#allocation11 + $0x1c4] ss:$16 sps:$4 sm:$0xff]  }
 0x390   :  { %2648 = vmatpush1.bf16.msra.mxu0 %v4915_v18  ;;  %2734 = vmatpush1.bf16.msra.mxu1 %v4918_v20  ;;  %v5010_v18 = vld [vmem:[#allocation11 + $0x1cc] ss:$16 sps:$4 sm:$0xff]   ;;  %v5005_v20 = vld [vmem:[#allocation11 + $0x1c0] ss:$16 sps:$4 sm:$0xff]  }
 0x391   :  { %3405 = vmatprep.subr.bf16.mxu0 %v4923_v22  ;;  %3491 = vmatprep.subr.bf16.mxu1 %v4926_v23  ;;  %v5008_v22 = vld [vmem:[#allocation11 + $0x1c8] ss:$16 sps:$4 sm:$0xff]   ;;  %v5013_v23 = vld [vmem:[#allocation11 + $0x1e4] ss:$16 sps:$4 sm:$0xff]  }
 0x393   :  { %2664 = vmatmul.mubr.bf16.vlgmr.msra.gmra.mrb[12].mxu0 %v5524_v44  ;;  %2750 = vmatmul.mubr.bf16.vlgmr.msra.gmra.mrb[12].mxu1 %v5524_v44  ;;  %v4951_v44 = vld [vmem:[#allocation11 + $0xa0] ss:$16 sps:$4 sm:$0xff]  }
 0x394   :  { %3406 = vmatpush1.bf16.msra.mxu0 %v4921_v24  ;;  %3492 = vmatpush1.bf16.msra.mxu1 %v4924_v25  ;;  %v5016_v24 = vld [vmem:[#allocation11 + $0x1ec] ss:$16 sps:$4 sm:$0xff]   ;;  %v5011_v25 = vld [vmem:[#allocation11 + $0x1e0] ss:$16 sps:$4 sm:$0xff]  }
 0x395   :  { %3407 = vmatprep.subr.bf16.mxu0 %v4929_v26  ;;  %3493 = vmatprep.subr.bf16.mxu1 %v4932_v27  ;;  %v5014_v26 = vld [vmem:[#allocation11 + $0x1e8] ss:$16 sps:$4 sm:$0xff]   ;;  %v5019_v27 = vld [vmem:[#allocation11 + $0x204] ss:$16 sps:$4 sm:$0xff]  }
 0x398   :  { %3408 = vmatpush1.bf16.msra.mxu0 %v4927_v28  ;;  %3494 = vmatpush1.bf16.msra.mxu1 %v4930_v29  ;;  %v5022_v28 = vld [vmem:[#allocation11 + $0x20c] ss:$16 sps:$4 sm:$0xff]   ;;  %v2059_v29 = vld [vmem:[%s5583_s8] sm:$0xf] }
 0x399   :  { %3409 = vmatprep.subr.bf16.mxu0 %v4935_v30  ;;  %3495 = vmatprep.subr.bf16.mxu1 %v4938_v31  ;;  %v2068_v30 = vrot.slane %v2059_v29, %v5483_v15  ;;  %v2076_v31 = vrot.slane %v2059_v29, %v5491_v19 }
 0x39c   :  { %3410 = vmatpush1.bf16.msra.mxu0 %v4933_v32  ;;  %3496 = vmatpush1.bf16.msra.mxu1 %v4936_v33  ;;  %v2072_v32 = vrot.slane %v2059_v29, %v5488_v17  ;;  %v2080_v33 = vrot.slane %v2059_v29, %v5494_v21  ;;  %v5049_v29 = vld [vmem:[#allocation11 + $0x2a4] ss:$16 sps:$4 sm:$0xff]  }
 0x39d   :  { %3411 = vmatprep.subr.bf16.mxu0 %v4941_v34  ;;  %3497 = vmatprep.subr.bf16.mxu1 %v4944_v35 }
 0x3a0   :  { %3412 = vmatpush1.bf16.msra.mxu0 %v4939_v36  ;;  %3498 = vmatpush1.bf16.msra.mxu1 %v4942_v37 }
 0x3a1   :  { %3413 = vmatprep.subr.bf16.mxu0 %v4947_v38  ;;  %3499 = vmatprep.subr.bf16.mxu1 %v4950_v39 }
 0x3a4   :  { %3414 = vmatpush1.bf16.msra.mxu0 %v4945_v40  ;;  %3500 = vmatpush1.bf16.msra.mxu1 %v4948_v41 }
 0x3a5   :  { %3415 = vmatprep.subr.bf16.mxu0 %v4953_v42  ;;  %3501 = vmatprep.subr.bf16.mxu1 %v4956_v43 }
 0x3a8   :  { %3416 = vmatpush1.bf16.msra.mxu0 %v4951_v44  ;;  %3502 = vmatpush1.bf16.msra.mxu1 %v4954_v45 }
 0x3a9   :  { %3417 = vmatprep.subr.bf16.mxu0 %v4959_v46  ;;  %3503 = vmatprep.subr.bf16.mxu1 %v4962_v47 }
 0x3ac   :  { %3418 = vmatpush1.bf16.msra.mxu0 %v4957_v48  ;;  %3504 = vmatpush1.bf16.msra.mxu1 %v4960_v49 }
 0x3ad   :  { %3419 = vmatprep.subr.bf16.mxu0 %v4965_v50  ;;  %3505 = vmatprep.subr.bf16.mxu1 %v4968_v51 }
 0x3b0   :  { %3420 = vmatpush1.bf16.msra.mxu0 %v4963_v52  ;;  %3506 = vmatpush1.bf16.msra.mxu1 %v4966_v53 }
 0x3b1   :  { %3421 = vmatprep.subr.bf16.mxu0 %v4971_v54  ;;  %3507 = vmatprep.subr.bf16.mxu1 %v4974_v55 }
 0x3b4   :  { %3422 = vmatpush1.bf16.msra.mxu0 %v4969_v56  ;;  %3508 = vmatpush1.bf16.msra.mxu1 %v4972_v57 }
 0x3b5   :  { %3423 = vmatprep.subr.bf16.mxu0 %v4977_v58  ;;  %3509 = vmatprep.subr.bf16.mxu1 %v4980_v59 }
 0x3b8   :  { %3424 = vmatpush1.bf16.msra.mxu0 %v4975_v60  ;;  %3510 = vmatpush1.bf16.msra.mxu1 %v4978_v61 }
 0x3b9   :  { %3425 = vmatprep.subr.bf16.mxu0 %v4983_v62  ;;  %3511 = vmatprep.subr.bf16.mxu1 %v4986_v63 }
 0x3bc   :  { %3426 = vmatpush1.bf16.msra.mxu0 %v4981_v1  ;;  %3512 = vmatpush1.bf16.msra.mxu1 %v4984_v2 }
 0x3bd   :  { %3427 = vmatprep.subr.bf16.mxu0 %v4989_v3  ;;  %3513 = vmatprep.subr.bf16.mxu1 %v4992_v4 }
 0x3c0   :  { %3428 = vmatpush1.bf16.msra.mxu0 %v4987_v5  ;;  %3514 = vmatpush1.bf16.msra.mxu1 %v4990_v6 }
 0x3c1   :  { %3429 = vmatprep.subr.bf16.mxu0 %v4995_v7  ;;  %3515 = vmatprep.subr.bf16.mxu1 %v4998_v8  ;;  %v5017_v7 = vld [vmem:[#allocation11 + $0x200] ss:$16 sps:$4 sm:$0xff]   ;;  %v5020_v8 = vld [vmem:[#allocation11 + $0x208] ss:$16 sps:$4 sm:$0xff]  }
 0x3c4   :  { %3430 = vmatpush1.bf16.msra.mxu0 %v4993_v9  ;;  %3516 = vmatpush1.bf16.msra.mxu1 %v4996_v10  ;;  %v5025_v9 = vld [vmem:[#allocation11 + $0x224] ss:$16 sps:$4 sm:$0xff]   ;;  %v5028_v10 = vld [vmem:[#allocation11 + $0x22c] ss:$16 sps:$4 sm:$0xff]  }
 0x3c5   :  { %3431 = vmatprep.subr.bf16.mxu0 %v5001_v11  ;;  %3517 = vmatprep.subr.bf16.mxu1 %v5004_v12  ;;  %v5023_v11 = vld [vmem:[#allocation11 + $0x220] ss:$16 sps:$4 sm:$0xff]   ;;  %v5026_v12 = vld [vmem:[#allocation11 + $0x228] ss:$16 sps:$4 sm:$0xff]  }
 0x3c8   :  { %3432 = vmatpush1.bf16.msra.mxu0 %v4999_v13  ;;  %3518 = vmatpush1.bf16.msra.mxu1 %v5002_v14  ;;  %v5031_v13 = vld [vmem:[#allocation11 + $0x244] ss:$16 sps:$4 sm:$0xff]   ;;  %v5034_v14 = vld [vmem:[#allocation11 + $0x24c] ss:$16 sps:$4 sm:$0xff]  }
 0x3c9   :  { %3433 = vmatprep.subr.bf16.mxu0 %v5007_v16  ;;  %3519 = vmatprep.subr.bf16.mxu1 %v5010_v18  ;;  %v5029_v16 = vld [vmem:[#allocation11 + $0x240] ss:$16 sps:$4 sm:$0xff]   ;;  %v5032_v18 = vld [vmem:[#allocation11 + $0x248] ss:$16 sps:$4 sm:$0xff]  }
 0x3cc   :  { %3434 = vmatpush1.bf16.msra.mxu0 %v5005_v20  ;;  %3520 = vmatpush1.bf16.msra.mxu1 %v5008_v22  ;;  %v5037_v20 = vld [vmem:[#allocation11 + $0x264] ss:$16 sps:$4 sm:$0xff]   ;;  %v5040_v22 = vld [vmem:[#allocation11 + $0x26c] ss:$16 sps:$4 sm:$0xff]  }
 0x3cd   :  { %3435 = vmatprep.subr.bf16.mxu0 %v5013_v23  ;;  %3521 = vmatprep.subr.bf16.mxu1 %v5016_v24  ;;  %v5035_v23 = vld [vmem:[#allocation11 + $0x260] ss:$16 sps:$4 sm:$0xff]   ;;  %v5038_v24 = vld [vmem:[#allocation11 + $0x268] ss:$16 sps:$4 sm:$0xff]  }
 0x3d0   :  { %3436 = vmatpush1.bf16.msra.mxu0 %v5011_v25  ;;  %3522 = vmatpush1.bf16.msra.mxu1 %v5014_v26  ;;  %v5043_v25 = vld [vmem:[#allocation11 + $0x284] ss:$16 sps:$4 sm:$0xff]   ;;  %v5046_v26 = vld [vmem:[#allocation11 + $0x28c] ss:$16 sps:$4 sm:$0xff]  }
 0x3d1   :  { %3448 = vmatprep.subr.bf16.mxu0 %v5019_v27  ;;  %3534 = vmatprep.subr.bf16.mxu1 %v5022_v28  ;;  %v5041_v27 = vld [vmem:[#allocation11 + $0x280] ss:$16 sps:$4 sm:$0xff]   ;;  %v5044_v28 = vld [vmem:[#allocation11 + $0x288] ss:$16 sps:$4 sm:$0xff]  }
 0x466   :  { %v2665_v34 = vpop.f32.mrb[12].mxu0  ;;  %v2751_v35 = vpop.f32.mrb[12].mxu1 }
 0x467   :  { %v4395_v36 = vadd.f32 %v2665_v34, %v2068_v30  ;;  %v4399_v37 = vadd.f32 %v2751_v35, %v2076_v31  ;;  %v2667_v38 = vpop.f32.mrb[13].mxu0  ;;  %v2753_v39 = vpop.f32.mrb[13].mxu1  ;;  %v5058_v34 = vld [vmem:[#allocation11 + $0x2cc] ss:$16 sps:$4 sm:$0xff]   ;;  %v5053_v35 = vld [vmem:[#allocation11 + $0x2c0] ss:$16 sps:$4 sm:$0xff]  }
 0x468   :  { %v4396_v40 = vadd.f32 %v2667_v38, %v2072_v32  ;;  %v4400_v41 = vadd.f32 %v2753_v39, %v2080_v33  ;;  %v2669_v42 = vpop.f32.mrb[14].mxu0  ;;  %v2755_v43 = vpop.f32.mrb[14].mxu1  ;;  %v5064_v38 = vld [vmem:[#allocation11 + $0x2ec] ss:$16 sps:$4 sm:$0xff]   ;;  %v5059_v39 = vld [vmem:[#allocation11 + $0x2e0] ss:$16 sps:$4 sm:$0xff]  }
 0x469   :  { %v2760_v44 = vmul.f32 0.2, %v4395_v36  ;;  %v2762_v45 = vmul.f32 0.2, %v4399_v37  ;;  %v4397_v46 = vadd.f32 %v2669_v42, %v2068_v30  ;;  %v4401_v47 = vadd.f32 %v2755_v43, %v2076_v31  ;;  %v2671_v48 = vpop.f32.mrb[15].mxu0  ;;  %v2757_v49 = vpop.f32.mrb[15].mxu1 }
 0x46a   :  { %v2761_v50 = vmul.f32 0.2, %v4396_v40  ;;  %v2763_v51 = vmul.f32 0.2, %v4400_v41  ;;  %v4398_v52 = vadd.f32 %v2671_v48, %v2072_v32  ;;  %v4402_v53 = vadd.f32 %v2757_v49, %v2080_v33  ;;  %v5052_v30 = vld [vmem:[#allocation11 + $0x2ac] ss:$16 sps:$4 sm:$0xff]  }
 0x46b   :  { %v2764_v54 = vmul.f32 0.2, %v4397_v46  ;;  %v2766_v55 = vmul.f32 0.2, %v4401_v47  ;;  %v2768_v58 = vmax.f32 %v4395_v36, %v2760_v44  ;;  %v2770_v59 = vmax.f32 %v4399_v37, %v2762_v45  ;;  %v5047_v31 = vld [vmem:[#allocation11 + $0x2a0] ss:$16 sps:$4 sm:$0xff]  }
 0x46c   :  { %v2765_v56 = vmul.f32 0.2, %v4398_v52  ;;  %v2767_v57 = vmul.f32 0.2, %v4402_v53  ;;  %v2769_v62 = vmax.f32 %v4396_v40, %v2761_v50  ;;  %v2771_v63 = vmax.f32 %v4400_v41, %v2763_v51  ;;  %v5050_v32 = vld [vmem:[#allocation11 + $0x2a8] ss:$16 sps:$4 sm:$0xff]  }
 0x46d   :  { %v2772_v60 = vmax.f32 %v4397_v46, %v2764_v54  ;;  %v2774_v61 = vmax.f32 %v4401_v47, %v2766_v55  ;;  %v5055_v33 = vld [vmem:[#allocation11 + $0x2c4] ss:$16 sps:$4 sm:$0xff]   ;;  %v5056_v36 = vld [vmem:[#allocation11 + $0x2c8] ss:$16 sps:$4 sm:$0xff]   ;;  %v5070_v42 = vld [vmem:[#allocation11 + $0x30c] ss:$16 sps:$4 sm:$0xff]  }
 0x46e   :  { %v2773_v1 = vmax.f32 %v4398_v52, %v2765_v56  ;;  %v2775_v2 = vmax.f32 %v4402_v53, %v2767_v57  ;;  %v5061_v37 = vld [vmem:[#allocation11 + $0x2e4] ss:$16 sps:$4 sm:$0xff]   ;;  %v5062_v40 = vld [vmem:[#allocation11 + $0x2e8] ss:$16 sps:$4 sm:$0xff]   ;;  %v5065_v43 = vld [vmem:[#allocation11 + $0x300] ss:$16 sps:$4 sm:$0xff]  }
 0x46f   :  { %v2877_v3 = vpack.c.bf16 %v2772_v60, %v2768_v58  ;;  %v5537_v4 = vpack.c.bf16 %v2774_v61, %v2770_v59  ;;  %v5067_v41 = vld [vmem:[#allocation11 + $0x304] ss:$16 sps:$4 sm:$0xff]   ;;  %v5068_v44 = vld [vmem:[#allocation11 + $0x308] ss:$16 sps:$4 sm:$0xff]  }
 0x470   :  { %v2880_v5 = vpack.c.bf16 %v2775_v2, %v2771_v63  ;;  %v2878_v6 = vpack.c.bf16 %v2773_v1, %v2769_v62  ;;  %v5072_v45 = vld [vmem:[#allocation13 + $0x40] sm:$0xff]   ;;  %v5075_v48 = vld [vmem:[#allocation13 + $0x48] sm:$0xff]   ;;  %v5078_v51 = vld [vmem:[#allocation13 + $0x50] sm:$0xff]  }
 0x471   :  { %v5071_v46 = vld [vmem:[#allocation13 + $0x80] sm:$0xff]   ;;  %v5074_v49 = vld [vmem:[#allocation13 + $0x88] sm:$0xff]   ;;  %v5077_v52 = vld [vmem:[#allocation13 + $0x90] sm:$0xff]  }
 0x472   :  { %3437 = vmatprep.mubr.bf16.mxu0 %v2878_v6  ;;  %3523 = vmatprep.mubr.bf16.mxu1 %v2878_v6  ;;  %v5073_v47 = vld [vmem:[#allocation13] sm:$0xff]   ;;  %v5076_v50 = vld [vmem:[#allocation13 + $0x8] sm:$0xff]   ;;  %v5079_v53 = vld [vmem:[#allocation13 + $0x10] sm:$0xff]  }
 0x473   :  { %3438 = vmatmul.mubr.bf16.vlgmr.msra.gmra.mrb[16].mxu0 %v2877_v3  ;;  %3524 = vmatmul.mubr.bf16.vlgmr.msra.gmra.mrb[16].mxu1 %v2877_v3  ;;  %v5081_v54 = vld [vmem:[#allocation13 + $0x58] sm:$0xff]   ;;  %v5084_v57 = vld [vmem:[#allocation13 + $0x60] sm:$0xff]   ;;  %v5086_v60 = vld [vmem:[#allocation13 + $0xa8] sm:$0xff]  }
 0x474   :  { %3449 = vmatpush1.bf16.msra.mxu0 %v5017_v7  ;;  %3535 = vmatpush1.bf16.msra.mxu1 %v5020_v8  ;;  %v5080_v55 = vld [vmem:[#allocation13 + $0x98] sm:$0xff]   ;;  %v5083_v58 = vld [vmem:[#allocation13 + $0xa0] sm:$0xff]   ;;  %v5087_v61 = vld [vmem:[#allocation13 + $0x68] sm:$0xff]  }
 0x475   :  { %4328 = vmatprep.mubr.msk.bf16.mxu0 %vm950_vm1, %v2880_v5  ;;  %4329 = vmatprep.mubr.msk.bf16.mxu1 %vm950_vm1, %v2880_v5  ;;  %v5082_v56 = vld [vmem:[#allocation13 + $0x18] sm:$0xff]   ;;  %v5085_v59 = vld [vmem:[#allocation13 + $0x20] sm:$0xff]   ;;  %v5088_v62 = vld [vmem:[#allocation13 + $0x28] sm:$0xff]  }
 0x476   :  { %3450 = vmatprep.subr.bf16.mxu0 %v5025_v9  ;;  %3536 = vmatprep.subr.bf16.mxu1 %v5028_v10  ;;  %v5089_v63 = vld [vmem:[#allocation13 + $0xb0] sm:$0xff]   ;;  %v5092_v3 = vld [vmem:[#allocation13 + $0xb8] sm:$0xff]   ;;  %v5095_v6 = vld [vmem:[#allocation13 + $0xc0] sm:$0xff]  }
 0x477   :  { %v5090_v1 = vld [vmem:[#allocation13 + $0x70] sm:$0xff]   ;;  %v5094_v5 = vld [vmem:[#allocation13 + $0x38] sm:$0xff]  }
 0x478   :  { %3451 = vmatpush1.bf16.msra.mxu0 %v5023_v11  ;;  %3537 = vmatpush1.bf16.msra.mxu1 %v5026_v12  ;;  %v5091_v2 = vld [vmem:[#allocation13 + $0x30] sm:$0xff]   ;;  %v2876_v7 = vld [vmem:[%s5585_s10] sm:$0xf] }
 0x479   :  { %3452 = vmatprep.subr.bf16.mxu0 %v5031_v13  ;;  %3538 = vmatprep.subr.bf16.mxu1 %v5034_v14  ;;  %v2885_v8 = vrot.slane %v2876_v7, %v5483_v15  ;;  %v2893_v9 = vrot.slane %v2876_v7, %v5491_v19  ;;  %v2889_v10 = vrot.slane %v2876_v7, %v5488_v17 }
 0x47a   :  { %v2897_v11 = vrot.slane %v2876_v7, %v5494_v21 }
 0x47c   :  { %3453 = vmatpush1.bf16.msra.mxu0 %v5029_v16  ;;  %3539 = vmatpush1.bf16.msra.mxu1 %v5032_v18 }
 0x47d   :  { %3454 = vmatprep.subr.bf16.mxu0 %v5037_v20  ;;  %3540 = vmatprep.subr.bf16.mxu1 %v5040_v22 }
 0x480   :  { %3455 = vmatpush1.bf16.msra.mxu0 %v5035_v23  ;;  %3541 = vmatpush1.bf16.msra.mxu1 %v5038_v24 }
 0x481   :  { %3456 = vmatprep.subr.bf16.mxu0 %v5043_v25  ;;  %3542 = vmatprep.subr.bf16.mxu1 %v5046_v26 }
 0x484   :  { %3457 = vmatpush1.bf16.msra.mxu0 %v5041_v27  ;;  %3543 = vmatpush1.bf16.msra.mxu1 %v5044_v28 }
 0x485   :  { %3458 = vmatprep.subr.bf16.mxu0 %v5049_v29  ;;  %3544 = vmatprep.subr.bf16.mxu1 %v5052_v30 }
 0x488   :  { %3459 = vmatpush1.bf16.msra.mxu0 %v5047_v31  ;;  %3545 = vmatpush1.bf16.msra.mxu1 %v5050_v32 }
 0x489   :  { %3460 = vmatprep.subr.bf16.mxu0 %v5055_v33  ;;  %3546 = vmatprep.subr.bf16.mxu1 %v5058_v34 }
 0x48c   :  { %3461 = vmatpush1.bf16.msra.mxu0 %v5053_v35  ;;  %3547 = vmatpush1.bf16.msra.mxu1 %v5056_v36 }
 0x48d   :  { %3462 = vmatprep.subr.bf16.mxu0 %v5061_v37  ;;  %3548 = vmatprep.subr.bf16.mxu1 %v5064_v38 }
 0x490   :  { %3463 = vmatpush1.bf16.msra.mxu0 %v5059_v39  ;;  %3549 = vmatpush1.bf16.msra.mxu1 %v5062_v40 }
 0x491   :  { %3464 = vmatprep.subr.bf16.mxu0 %v5067_v41  ;;  %3550 = vmatprep.subr.bf16.mxu1 %v5070_v42 }
 0x494   :  { %3465 = vmatpush1.bf16.msra.mxu0 %v5065_v43  ;;  %3551 = vmatpush1.bf16.msra.mxu1 %v5068_v44 }
 0x495   :  { %3848 = vmatprep.subr.bf16.mxu1 %v5293_v0  ;;  %4357 = vmatprep.subr.bf16.mxu0 %v5072_v45 }
 0x497   :  { %3481 = vmatmul.mubr.bf16.vlgmr.msra.gmra.mrb[16].mxu0 %v5537_v4  ;;  %3567 = vmatmul.mubr.bf16.vlgmr.msra.gmra.mrb[16].mxu1 %v5537_v4  ;;  %v5093_v4 = vld [vmem:[#allocation13 + $0x78] sm:$0xff]  }
 0x498   :  { %3849 = vmatpush1.bf16.msra.mxu1 %v5071_v46  ;;  %4358 = vmatpush3.bf16.msra.mxu0 %v5073_v47 }
 0x499   :  { %3850 = vmatprep.subr.bf16.mxu1 %v5293_v0  ;;  %4359 = vmatprep.subr.bf16.mxu0 %v5075_v48 }
 0x49c   :  { %3851 = vmatpush1.bf16.msra.mxu1 %v5074_v49  ;;  %4360 = vmatpush3.bf16.msra.mxu0 %v5076_v50  ;;  %v4330_v49 = vld [vmem:[%s5587_s12] ss:$0 sm:$0xff] }
 0x49d   :  { %3852 = vmatprep.subr.bf16.mxu1 %v5293_v0  ;;  %4361 = vmatprep.subr.bf16.mxu0 %v5078_v51 }
 0x4a0   :  { %3853 = vmatpush1.bf16.msra.mxu1 %v5077_v52  ;;  %4362 = vmatpush3.bf16.msra.mxu0 %v5079_v53 }
 0x4a1   :  { %3854 = vmatprep.subr.bf16.mxu1 %v5293_v0  ;;  %4363 = vmatprep.subr.bf16.mxu0 %v5081_v54 }
 0x4a4   :  { %3855 = vmatpush1.bf16.msra.mxu1 %v5080_v55  ;;  %4364 = vmatpush3.bf16.msra.mxu0 %v5082_v56 }
 0x4a5   :  { %3856 = vmatprep.subr.bf16.mxu1 %v5293_v0  ;;  %4365 = vmatprep.subr.bf16.mxu0 %v5084_v57 }
 0x4a8   :  { %3857 = vmatpush1.bf16.msra.mxu1 %v5083_v58  ;;  %4366 = vmatpush3.bf16.msra.mxu0 %v5085_v59 }
 0x4a9   :  { %3858 = vmatprep.subr.bf16.mxu1 %v5293_v0  ;;  %4367 = vmatprep.subr.bf16.mxu0 %v5087_v61 }
 0x4ac   :  { %3859 = vmatpush1.bf16.msra.mxu1 %v5086_v60  ;;  %4368 = vmatpush3.bf16.msra.mxu0 %v5088_v62 }
 0x4ad   :  { %3860 = vmatprep.subr.bf16.mxu1 %v5293_v0  ;;  %4369 = vmatprep.subr.bf16.mxu0 %v5090_v1 }
 0x4b0   :  { %3861 = vmatpush1.bf16.msra.mxu1 %v5089_v63  ;;  %4370 = vmatpush3.bf16.msra.mxu0 %v5091_v2 }
 0x4b1   :  { %3862 = vmatprep.subr.bf16.mxu1 %v5293_v0  ;;  %4371 = vmatprep.subr.bf16.mxu0 %v5093_v4 }
 0x4b4   :  { %3863 = vmatpush1.bf16.msra.mxu1 %v5092_v3  ;;  %4372 = vmatpush3.bf16.msra.mxu0 %v5094_v5 }
 0x4b5   :  { %3864 = vmatprep.subr.bf16.mxu1 %v5293_v0 }
 0x4b8   :  { %3865 = vmatpush1.bf16.msra.mxu1 %v5095_v6 }
 0x56a   :  { %v3482_v12 = vpop.f32.mrb[16].mxu0  ;;  %v3568_v13 = vpop.f32.mrb[16].mxu1 }
 0x56b   :  { %v4403_v0 = vadd.f32 %v3482_v12, %v2885_v8  ;;  %v4407_v14 = vadd.f32 %v3568_v13, %v2893_v9  ;;  %v3484_v16 = vpop.f32.mrb[17].mxu0  ;;  %v3570_v18 = vpop.f32.mrb[17].mxu1 }
 0x56c   :  { %v4404_v20 = vadd.f32 %v3484_v16, %v2889_v10  ;;  %v4408_v22 = vadd.f32 %v3570_v18, %v2897_v11  ;;  %v3486_v23 = vpop.f32.mrb[18].mxu0  ;;  %v3572_v24 = vpop.f32.mrb[18].mxu1 }
 0x56d   :  { %v3577_v25 = vmul.f32 0.2, %v4403_v0  ;;  %v3579_v26 = vmul.f32 0.2, %v4407_v14  ;;  %v4405_v27 = vadd.f32 %v3486_v23, %v2885_v8  ;;  %v4409_v15 = vadd.f32 %v3572_v24, %v2893_v9  ;;  %v3488_v28 = vpop.f32.mrb[19].mxu0  ;;  %v3574_v19 = vpop.f32.mrb[19].mxu1 }
 0x56e   :  { %v3578_v29 = vmul.f32 0.2, %v4404_v20  ;;  %v3580_v17 = vmul.f32 0.2, %v4408_v22  ;;  %v4406_v30 = vadd.f32 %v3488_v28, %v2889_v10  ;;  %v4410_v21 = vadd.f32 %v3574_v19, %v2897_v11 }
 0x56f   :  { %v3581_v31 = vmul.f32 0.2, %v4405_v27  ;;  %v3583_v32 = vmul.f32 0.2, %v4409_v15  ;;  %v3585_v35 = vmax.f32 %v4403_v0, %v3577_v25  ;;  %v3587_v36 = vmax.f32 %v4407_v14, %v3579_v26 }
 0x570   :  { %v3582_v33 = vmul.f32 0.2, %v4406_v30  ;;  %v3584_v34 = vmul.f32 0.2, %v4410_v21  ;;  %v3586_v39 = vmax.f32 %v4404_v20, %v3578_v29  ;;  %v3588_v40 = vmax.f32 %v4408_v22, %v3580_v17 }
 0x571   :  { %v3589_v37 = vmax.f32 %v4405_v27, %v3581_v31  ;;  %v3591_v38 = vmax.f32 %v4409_v15, %v3583_v32 }
 0x572   :  { %v3590_v41 = vmax.f32 %v4406_v30, %v3582_v33  ;;  %v3592_v42 = vmax.f32 %v4410_v21, %v3584_v34 }
 0x573   :  { %v3644_v43 = vpack.c.bf16 %v3589_v37, %v3585_v35  ;;  %v3646_v44 = vpack.c.bf16 %v3591_v38, %v3587_v36 }
 0x574   :  { %v3647_v45 = vpack.c.bf16 %v3592_v42, %v3588_v40  ;;  %v3645_v46 = vpack.c.bf16 %v3590_v41, %v3586_v39 }
 0x576   :  { %3839 = vmatprep.mubr.bf16.mxu0 %v3645_v46  ;;  %4356 = vmatprep.mubr.msk.bf16.mxu1 %vm950_vm1, %v3647_v45 }
 0x577   :  { %3840 = vmatmul.mubr.bf16.vlgmr.msra.gmra.mrb[20].mxu0 %v3644_v43  ;;  %3881 = vmatmul.mubr.bf16.vlgmr.msra.gmra.mrb[20].mxu1 %v3646_v44 }
 0x64a   :  { %v4373_v47 = vpop.f32.mrb[20].mxu0  ;;  %v3882_v48 = vpop.f32.mrb[20].mxu1 }
 0x64b   :  { %v4374_v50 = vpop.f32.mrb[21].mxu0  ;;  %v3884_v51 = vpop.f32.mrb[21].mxu1 }
 0x64c   :  { %v4375_v52 = vadd.f32 %v4374_v50, %v4373_v47  ;;  %v4376_v53 = vpop.f32.mrb[22].mxu0  ;;  %v3885_v54 = vpop.f32.mrb[22].mxu1 }
 0x64d   :  { %v4377_v55 = vpop.f32.mrb[23].mxu0  ;;  %v3887_v56 = vpop.f32.mrb[23].mxu1 }
 0x64e   :  { %v3842_v57 = vadd.f32 %v4375_v52, %v4330_v49  ;;  %v4378_v58 = vadd.f32 %v4377_v55, %v4376_v53 }
 0x650   :  { %v3883_v59 = vadd.f32 %v3882_v48, %v3842_v57  ;;  %v3845_v60 = vadd.f32 %v4378_v58, %v4330_v49 }
 0x652   :  { %3889 = vst [vmem:[#allocation14] sm:$0xff] %v3883_v59  ;;  %v3886_v61 = vadd.f32 %v3885_v54, %v3845_v60 }
 0x654   :  { %3890 = vst [vmem:[#allocation14 + $0x8] sm:$0xff] %v3886_v61 }
 0x655   :  { %5261 = shalt.err (!%p5258_p4)
}
 0x656   :  { %s5262_s30 = scalar_lea.hbm %s5588_s13, 256 }
 0x657   :  { %p5263_p5 = scmp.ne.s32.totalorder %s5588_s13, %s5262_s30  ;;  %p5266_p6 = scmp.lt.u32.totalorder %s5262_s30, %s5588_s13 }
 0x659   :  { %p5268_p7 = pnand %p5266_p6, %p5263_p5 }
 0x65b   :  { %5271 = shalt.err (!%p5268_p7)
}
 0x65c   :  { %s5295_s0 = smov 128   ;;  %s5296_s15 = smov 8  }
 0x65d   :  { %3902 = dma.vmem_to_hbm [thread:$0]  %s3897_s16, 256, %s5588_s13, [#allocation4], %s5295_s0, %s5295_s0, %s5296_s15  }
 0x65e   :  { %5280 = dma.done.wait [#allocation4], 256  }
 0x65f   :  { %5281 = vsyncadd [#allocation4], 4294967040 }
 0x660   :  { %3906 = vsyncpa [#allocation3], 1 }
 0x661   :  { %3907 = vsyncpa [#allocation6], 1 }
 0x662   :  { %3908 = vsyncpa [#allocation9], 1 }
 0x663   :  { %3909 = vsyncpa [#allocation12], 1 }
 0x664   :  { %3910 = vsyncpa [#allocation4], 1 }

// kernel: tpu_custom_call.1
= control target key start
LH: loop header
LB: loop body
LE: loop exit
PB: predicated region body
PF: predicated region fallthrough
CT: control target
= control target key end

     0   :  { %18 = vsyncpa [#allocation3], 0  ;;  %s5575_s0 = inlined_call_operand.hbm [shape: bf16[16,32], index: 0, kind: input, shape index: {}]   ;;  %s5576_s1 = inlined_call_operand.hbm [shape: bf16[32,400], index: 1, kind: input, shape index: {}]   ;;  %s5577_s2 = inlined_call_operand.vmem [shape: f32[1,400], index: 2, kind: input, shape index: {}]   ;;  %s5578_s3 = inlined_call_operand.hbm [shape: bf16[400,400], index: 3, kind: input, shape index: {}]   ;;  %s5579_s4 = inlined_call_operand.vmem [shape: f32[1,400], index: 4, kind: input, shape index: {}]   ;;  %s5580_s5 = inlined_call_operand.hbm [shape: bf16[400,400], index: 5, kind: input, shape index: {}]   ;;  %s5581_s6 = inlined_call_operand.vmem [shape: f32[1,400], index: 6, kind: input, shape index: {}]   ;;  %s5582_s7 = inlined_call_operand.hbm [shape: bf16[400,400], index: 7, kind: input, shape index: {}]   ;;  %s5583_s8 = inlined_call_operand.vmem [shape: f32[1,400], index: 8, kind: input, shape index: {}]   ;;  %s5584_s9 = inlined_call_operand.hbm [shape: bf16[400,400], index: 9, kind: input, shape index: {}]   ;;  %s5585_s10 = inlined_call_operand.vmem [shape: f32[1,400], index: 10, kind: input, shape index: {}]   ;;  %s5586_s11 = inlined_call_operand.hbm [shape: bf16[400,128], index: 11, kind: input, shape index: {}]   ;;  %s5587_s12 = inlined_call_operand.vmem [shape: f32[1,128], index: 12, kind: input, shape index: {}]   ;;  %s5588_s13 = inlined_call_operand.hbm [shape: f32[16,128], index: 13, kind: output, shape index: {}]  }
   0x1   :  { %19 = vsyncpa [#allocation6], 0 }
   0x2   :  { %20 = vsyncpa [#allocation9], 0 }
   0x3   :  { %21 = vsyncpa [#allocation12], 0 }
   0x4   :  { %22 = vsyncpa [#allocation4], 0  ;;  %s5282_s25 = smov [#allocation5]   ;;  %s5096_s29 = scalar_lea.hbm %s5576_s1, 1024 }
   0x5   :  { %s40_s26 = sshll.u32 %s5282_s25, 4  ;;  %p5097_p0 = scmp.ne.s32.totalorder %s5576_s1, %s5096_s29  ;;  %s41_s26 = int_to_ptr.vmem [resolvable:$true] %s40_s26 }
   0x6   :  { %p5100_p1 = scmp.lt.u32.totalorder %s5096_s29, %s5576_s1 }
   0x8   :  { %p5102_p2 = pnand %p5100_p1, %p5097_p0 }
   0xa   :  { %5105 = shalt.err (!%p5102_p2)
}
   0xb   :  { %s5106_s17 = scalar_lea.vmem %s41_s26, 1024  ;;  %p5111_p4 = scmp.lt.s32.totalorder %s41_s26, %s41_s26 }
   0xc   :  { %p5107_p3 = scmp.ne.s32.totalorder %s41_s26, %s5106_s17  ;;  %p5112_p5 = scmp.lt.s32.totalorder %s5106_s17, %s5106_s17 }
   0xe   :  { %p5113_p6 = por %p5112_p5, %p5111_p4 }
  0x10   :  { %p5114_p7 = pnand %p5113_p6, %p5107_p3 }
  0x12   :  { %5117 = shalt.err (!%p5114_p7)
}
  0x13   :  { %s5283_s18 = smov 256   ;;  %s5284_s19 = smov 16  }
  0x14   :  { %46 = dma.hbm_to_vmem [thread:$0]  %s5576_s1, 1024, %s41_s26, [#allocation6], %s5283_s18, %s5283_s18, %s5284_s19  }
  0x15   :  { %s5285_s22 = smov [#allocation8]   ;;  %s5286_s24 = smov [#allocation11]  }
  0x16   :  { %s68_s23 = sshll.u32 %s5285_s22, 4  ;;  %s96_s25 = sshll.u32 %s5286_s24, 4  ;;  %s69_s23 = int_to_ptr.vmem [resolvable:$true] %s68_s23  ;;  %s97_s25 = int_to_ptr.vmem [resolvable:$true] %s96_s25 }
  0x17   :  { %s5118_s29 = scalar_lea.hbm %s5580_s5, 12800 }
  0x18   :  { %p5119_p8 = scmp.ne.s32.totalorder %s5580_s5, %s5118_s29  ;;  %p5122_p9 = scmp.lt.u32.totalorder %s5118_s29, %s5580_s5 }
  0x1a   :  { %p5124_p10 = pnand %p5122_p9, %p5119_p8 }
  0x1c   :  { %5127 = shalt.err (!%p5124_p10)
}
  0x1d   :  { %s5128_s1 = scalar_lea.vmem %s69_s23, 12800  ;;  %p5133_p12 = scmp.lt.s32.totalorder %s69_s23, %s69_s23 }
  0x1e   :  { %p5129_p11 = scmp.ne.s32.totalorder %s69_s23, %s5128_s1  ;;  %p5134_p13 = scmp.lt.s32.totalorder %s5128_s1, %s5128_s1 }
  0x20   :  { %p5135_p0 = por %p5134_p13, %p5133_p12 }
  0x22   :  { %p5136_p1 = pnand %p5135_p0, %p5129_p11 }
  0x24   :  { %5139 = shalt.err (!%p5136_p1)
}
  0x25   :  { %74 = dma.hbm_to_vmem [thread:$0]  %s5580_s5, 12800, %s69_s23, [#allocation9], %s5283_s18, %s5283_s18, %s5284_s19  }
  0x26   :  { %s5140_s22 = scalar_lea.hbm %s5584_s9, 12800 }
  0x27   :  { %p5141_p2 = scmp.ne.s32.totalorder %s5584_s9, %s5140_s22  ;;  %p5144_p3 = scmp.lt.u32.totalorder %s5140_s22, %s5584_s9 }
  0x29   :  { %p5146_p4 = pnand %p5144_p3, %p5141_p2 }
  0x2b   :  { %5149 = shalt.err (!%p5146_p4)
}
  0x2c   :  { %s5150_s30 = scalar_lea.vmem %s97_s25, 12800  ;;  %p5155_p6 = scmp.lt.s32.totalorder %s97_s25, %s97_s25 }
  0x2d   :  { %p5151_p5 = scmp.ne.s32.totalorder %s97_s25, %s5150_s30  ;;  %p5156_p7 = scmp.lt.s32.totalorder %s5150_s30, %s5150_s30 }
  0x2f   :  { %p5157_p8 = por %p5156_p7, %p5155_p6 }
  0x31   :  { %p5158_p9 = pnand %p5157_p8, %p5151_p5 }
  0x33   :  { %5161 = shalt.err (!%p5158_p9)
}
  0x34   :  { %102 = dma.hbm_to_vmem [thread:$0]  %s5584_s9, 12800, %s97_s25, [#allocation12], %s5283_s18, %s5283_s18, %s5284_s19  }
  0x35   :  { %s5287_s14 = smov [#allocation2]   ;;  %s5162_s26 = scalar_lea.hbm %s5575_s0, 128 }
  0x36   :  { %s28_s15 = sshll.u32 %s5287_s14, 4  ;;  %p5163_p10 = scmp.ne.s32.totalorder %s5575_s0, %s5162_s26  ;;  %s29_s15 = int_to_ptr.vmem [resolvable:$true] %s28_s15 }
  0x37   :  { %p5166_p11 = scmp.lt.u32.totalorder %s5162_s26, %s5575_s0 }
  0x39   :  { %p5168_p12 = pnand %p5166_p11, %p5163_p10 }
  0x3b   :  { %5171 = shalt.err (!%p5168_p12)
}
  0x3c   :  { %s5172_s24 = scalar_lea.vmem %s29_s15, 128  ;;  %p5177_p0 = scmp.lt.s32.totalorder %s29_s15, %s29_s15 }
  0x3d   :  { %p5173_p13 = scmp.ne.s32.totalorder %s29_s15, %s5172_s24  ;;  %p5178_p1 = scmp.lt.s32.totalorder %s5172_s24, %s5172_s24 }
  0x3f   :  { %p5179_p2 = por %p5178_p1, %p5177_p0 }
  0x41   :  { %p5180_p3 = pnand %p5179_p2, %p5173_p13 }
  0x43   :  { %5183 = shalt.err (!%p5180_p3)
}
  0x44   :  { %s5288_s9 = smov 64   ;;  %s5289_s25 = smov 4  }
  0x45   :  { %34 = dma.hbm_to_vmem [thread:$0]  %s5575_s0, 128, %s29_s15, [#allocation3], %s5288_s9, %s5288_s9, %s5289_s25  }
  0x46   :  { %s5290_s29 = smov [#allocation7]   ;;  %s5291_s5 = smov [#allocation10]  }
  0x47   :  { %s54_s30 = sshll.u32 %s5290_s29, 4  ;;  %s82_s23 = sshll.u32 %s5291_s5, 4  ;;  %s55_s30 = int_to_ptr.vmem [resolvable:$true] %s54_s30  ;;  %s5427_s23 = int_to_ptr.vmem [resolvable:$true] %s82_s23 }
  0x48   :  { %s5184_s1 = scalar_lea.hbm %s5578_s3, 12800 }
  0x49   :  { %p5185_p4 = scmp.ne.s32.totalorder %s5578_s3, %s5184_s1  ;;  %p5188_p5 = scmp.lt.u32.totalorder %s5184_s1, %s5578_s3 }
  0x4b   :  { %p5190_p6 = pnand %p5188_p5, %p5185_p4 }
  0x4d   :  { %5193 = shalt.err (!%p5190_p6)
}
  0x4e   :  { %s5194_s0 = scalar_lea.vmem %s55_s30, 12800  ;;  %p5199_p8 = scmp.lt.s32.totalorder %s55_s30, %s55_s30 }
  0x4f   :  { %p5195_p7 = scmp.ne.s32.totalorder %s55_s30, %s5194_s0  ;;  %p5200_p9 = scmp.lt.s32.totalorder %s5194_s0, %s5194_s0 }
  0x51   :  { %p5201_p10 = por %p5200_p9, %p5199_p8 }
  0x53   :  { %p5202_p11 = pnand %p5201_p10, %p5195_p7 }
  0x55   :  { %5205 = shalt.err (!%p5202_p11)
}
  0x56   :  { %60 = dma.hbm_to_vmem [thread:$0]  %s5578_s3, 12800, %s55_s30, [#allocation6], %s5283_s18, %s5283_s18, %s5284_s19  }
  0x57   :  { %s5206_s28 = scalar_lea.hbm %s5582_s7, 12800 }
  0x58   :  { %p5207_p12 = scmp.ne.s32.totalorder %s5582_s7, %s5206_s28  ;;  %p5210_p13 = scmp.lt.u32.totalorder %s5206_s28, %s5582_s7 }
  0x5a   :  { %p5212_p0 = pnand %p5210_p13, %p5207_p12 }
  0x5c   :  { %5215 = shalt.err (!%p5212_p0)
}
  0x5d   :  { %s5216_s1 = scalar_lea.vmem %s5427_s23, 12800  ;;  %p5221_p2 = scmp.lt.s32.totalorder %s5427_s23, %s5427_s23 }
  0x5e   :  { %p5217_p1 = scmp.ne.s32.totalorder %s5427_s23, %s5216_s1  ;;  %p5222_p3 = scmp.lt.s32.totalorder %s5216_s1, %s5216_s1 }
  0x60   :  { %p5223_p4 = por %p5222_p3, %p5221_p2 }
  0x62   :  { %p5224_p5 = pnand %p5223_p4, %p5217_p1 }
  0x64   :  { %5227 = shalt.err (!%p5224_p5)
}
  0x65   :  { %88 = dma.hbm_to_vmem [thread:$0]  %s5582_s7, 12800, %s5427_s23, [#allocation9], %s5283_s18, %s5283_s18, %s5284_s19  }
  0x66   :  { %s5292_s26 = smov [#allocation13]   ;;  %s5228_s0 = scalar_lea.hbm %s5586_s11, 3200 }
  0x67   :  { %s110_s17 = sshll.u32 %s5292_s26, 4  ;;  %p5229_p6 = scmp.ne.s32.totalorder %s5586_s11, %s5228_s0  ;;  %s111_s17 = int_to_ptr.vmem [resolvable:$true] %s110_s17 }
  0x68   :  { %p5232_p7 = scmp.lt.u32.totalorder %s5228_s0, %s5586_s11 }
  0x6a   :  { %p5234_p8 = pnand %p5232_p7, %p5229_p6 }
  0x6c   :  { %5237 = shalt.err (!%p5234_p8)
}
  0x6d   :  { %s5238_s28 = scalar_lea.vmem %s111_s17, 3200  ;;  %p5243_p10 = scmp.lt.s32.totalorder %s111_s17, %s111_s17 }
  0x6e   :  { %p5239_p9 = scmp.ne.s32.totalorder %s111_s17, %s5238_s28  ;;  %p5244_p11 = scmp.lt.s32.totalorder %s5238_s28, %s5238_s28 }
  0x70   :  { %p5245_p12 = por %p5244_p11, %p5243_p10 }
  0x72   :  { %p5246_p13 = pnand %p5245_p12, %p5239_p9 }
  0x74   :  { %5249 = shalt.err (!%p5246_p13)
}
  0x75   :  { %116 = dma.hbm_to_vmem [thread:$0]  %s5586_s11, 3200, %s111_s17, [#allocation12], %s5288_s9, %s5288_s9, %s5289_s25  }
  0x76   :  { %5272 = dma.done.wait [#allocation3], 128  }
  0x77   :  { %5273 = vsyncadd [#allocation3], 4294967168 }
  0x78   :  { %5274 = dma.done.wait [#allocation6], 13824  }
  0x79   :  { %5275 = vsyncadd [#allocation6], 4294953472 }
  0x7a   :  { %5276 = dma.done.wait [#allocation9], 25600  }
  0x7b   :  { %5277 = vsyncadd [#allocation9], 4294941696 }
  0x7c   :  { %5278 = dma.done.wait [#allocation12], 16000  }
  0x7d   :  { %5279 = vsyncadd [#allocation12], 4294951296  ;;  %v5293_v0 = vmov 0   ;;  %v4458_v1 = vld [vmem:[#allocation5 + $0x4] ss:$16 sps:$4 sm:$0xff]   ;;  %v4464_v5 = vld [vmem:[#allocation2] sm:$0xff]  }
  0x7e   :  { %254 = vmatprep.mubr.bf16.mxu0 %v5293_v0  ;;  %297 = vmatprep.mubr.bf16.mxu1 %v5293_v0  ;;  %v4460_v2 = vld [vmem:[#allocation5] ss:$16 sps:$4 sm:$0xff]   ;;  %v4461_v3 = vld [vmem:[#allocation5 + $0x24] ss:$16 sps:$4 sm:$0xff]   ;;  %v4465_v6 = vld [vmem:[#allocation5 + $0xc] ss:$16 sps:$4 sm:$0xff]  }
  0x7f   :  { %222 = vmatprep.subr.bf16.mxu0 %v4458_v1  ;;  %v4463_v4 = vld [vmem:[#allocation5 + $0x20] ss:$16 sps:$4 sm:$0xff]   ;;  %v4467_v7 = vld [vmem:[#allocation5 + $0x8] ss:$16 sps:$4 sm:$0xff]   ;;  %v4468_v8 = vld [vmem:[#allocation5 + $0x2c] ss:$16 sps:$4 sm:$0xff]   ;;  %265 = vmatprep.subr.bf16.mxu1 %v4465_v6 }
  0x80   :  { %223 = vmatpush1.bf16.msra.mxu0 %v4460_v2  ;;  %v4470_v9 = vld [vmem:[#allocation5 + $0x28] ss:$16 sps:$4 sm:$0xff]   ;;  %vm218_vm0 = vcmask 261120   ;;  %266 = vmatpush1.bf16.msra.mxu1 %v4467_v7  ;;  %v4471_v10 = vld [vmem:[#allocation7] ss:$16 sps:$4 sm:$0xff]   ;;  %vm950_vm1 = vcmask 130048  }
  0x81   :  { %224 = vmatprep.subr.bf16.mxu0 %v4461_v3  ;;  %v4473_v11 = vld [vmem:[#allocation7 + $0x4] ss:$16 sps:$4 sm:$0xff]   ;;  %267 = vmatprep.subr.bf16.mxu1 %v4468_v8  ;;  %v4476_v12 = vld [vmem:[#allocation7 + $0xc] ss:$16 sps:$4 sm:$0xff]   ;;  %v4474_v14 = vld [vmem:[#allocation7 + $0x8] ss:$16 sps:$4 sm:$0xff]  }
  0x82   :  { %v4479_v13 = vld [vmem:[#allocation7 + $0x24] ss:$16 sps:$4 sm:$0xff]   ;;  %v4477_v15 = vld [vmem:[#allocation7 + $0x20] ss:$16 sps:$4 sm:$0xff]   ;;  %v4482_v16 = vld [vmem:[#allocation7 + $0x2c] ss:$16 sps:$4 sm:$0xff]  }
  0x83   :  { %v4485_v17 = vld [vmem:[#allocation7 + $0x44] ss:$16 sps:$4 sm:$0xff]   ;;  %v4480_v18 = vld [vmem:[#allocation7 + $0x28] ss:$16 sps:$4 sm:$0xff]   ;;  %v4483_v19 = vld [vmem:[#allocation7 + $0x40] ss:$16 sps:$4 sm:$0xff]  }
  0x84   :  { %225 = vmatpush1.bf16.msra.mxu0 %v4463_v4  ;;  %268 = vmatpush1.bf16.msra.mxu1 %v4470_v9  ;;  %v4488_v20 = vld [vmem:[#allocation7 + $0x4c] ss:$16 sps:$4 sm:$0xff]   ;;  %v4491_v21 = vld [vmem:[#allocation7 + $0x64] ss:$16 sps:$4 sm:$0xff]   ;;  %v4486_v22 = vld [vmem:[#allocation7 + $0x48] ss:$16 sps:$4 sm:$0xff]  }
  0x85   :  { %954 = vmatprep.subr.bf16.mxu0 %v4473_v11  ;;  %1040 = vmatprep.subr.bf16.mxu1 %v4476_v12  ;;  %v4489_v23 = vld [vmem:[#allocation7 + $0x60] ss:$16 sps:$4 sm:$0xff]   ;;  %v4494_v24 = vld [vmem:[#allocation7 + $0x6c] ss:$16 sps:$4 sm:$0xff]   ;;  %v4497_v25 = vld [vmem:[#allocation7 + $0x84] ss:$16 sps:$4 sm:$0xff]  }
  0x86   :  { %v4492_v26 = vld [vmem:[#allocation7 + $0x68] ss:$16 sps:$4 sm:$0xff]   ;;  %v4495_v27 = vld [vmem:[#allocation7 + $0x80] ss:$16 sps:$4 sm:$0xff]   ;;  %v4500_v28 = vld [vmem:[#allocation7 + $0x8c] ss:$16 sps:$4 sm:$0xff]  }
  0x87   :  { %3920 = vmatmul.mubr.msk.bf16.vlgmr.msra.gmra.mrb[0].mxu0 %vm218_vm0, %v4464_v5  ;;  %3921 = vmatmul.mubr.msk.bf16.vlgmr.msra.gmra.mrb[0].mxu1 %vm218_vm0, %v4464_v5  ;;  %v4503_v29 = vld [vmem:[#allocation7 + $0xa4] ss:$16 sps:$4 sm:$0xff]   ;;  %v4498_v30 = vld [vmem:[#allocation7 + $0x88] ss:$16 sps:$4 sm:$0xff]   ;;  %v4501_v31 = vld [vmem:[#allocation7 + $0xa0] ss:$16 sps:$4 sm:$0xff]  }
  0x88   :  { %955 = vmatpush1.bf16.msra.mxu0 %v4471_v10  ;;  %1041 = vmatpush1.bf16.msra.mxu1 %v4474_v14  ;;  %v4506_v32 = vld [vmem:[#allocation7 + $0xac] ss:$16 sps:$4 sm:$0xff]   ;;  %v4509_v33 = vld [vmem:[#allocation7 + $0xc4] ss:$16 sps:$4 sm:$0xff]   ;;  %v4504_v34 = vld [vmem:[#allocation7 + $0xa8] ss:$16 sps:$4 sm:$0xff]  }
  0x89   :  { %956 = vmatprep.subr.bf16.mxu0 %v4479_v13  ;;  %1042 = vmatprep.subr.bf16.mxu1 %v4482_v16  ;;  %v4507_v35 = vld [vmem:[#allocation7 + $0xc0] ss:$16 sps:$4 sm:$0xff]   ;;  %v4512_v36 = vld [vmem:[#allocation7 + $0xcc] ss:$16 sps:$4 sm:$0xff]   ;;  %v4515_v37 = vld [vmem:[#allocation7 + $0xe4] ss:$16 sps:$4 sm:$0xff]   ;;  %v153_v13 = vlaneseq }
  0x8a   :  { %v4510_v38 = vld [vmem:[#allocation7 + $0xc8] ss:$16 sps:$4 sm:$0xff]   ;;  %v4513_v39 = vld [vmem:[#allocation7 + $0xe0] ss:$16 sps:$4 sm:$0xff]   ;;  %v4518_v40 = vld [vmem:[#allocation7 + $0xec] ss:$16 sps:$4 sm:$0xff]  }
  0x8b   :  { %v4521_v41 = vld [vmem:[#allocation7 + $0x104] ss:$16 sps:$4 sm:$0xff]   ;;  %v4516_v42 = vld [vmem:[#allocation7 + $0xe8] ss:$16 sps:$4 sm:$0xff]   ;;  %v4519_v43 = vld [vmem:[#allocation7 + $0x100] ss:$16 sps:$4 sm:$0xff]  }
  0x8c   :  { %957 = vmatpush1.bf16.msra.mxu0 %v4477_v15  ;;  %1043 = vmatpush1.bf16.msra.mxu1 %v4480_v18  ;;  %v4524_v44 = vld [vmem:[#allocation7 + $0x10c] ss:$16 sps:$4 sm:$0xff]   ;;  %v4527_v45 = vld [vmem:[#allocation7 + $0x124] ss:$16 sps:$4 sm:$0xff]   ;;  %v4522_v46 = vld [vmem:[#allocation7 + $0x108] ss:$16 sps:$4 sm:$0xff]  }
  0x8d   :  { %958 = vmatprep.subr.bf16.mxu0 %v4485_v17  ;;  %1044 = vmatprep.subr.bf16.mxu1 %v4488_v20  ;;  %v4525_v47 = vld [vmem:[#allocation7 + $0x120] ss:$16 sps:$4 sm:$0xff]   ;;  %v4530_v48 = vld [vmem:[#allocation7 + $0x12c] ss:$16 sps:$4 sm:$0xff]   ;;  %v4533_v49 = vld [vmem:[#allocation7 + $0x144] ss:$16 sps:$4 sm:$0xff]  }
  0x8e   :  { %v4528_v50 = vld [vmem:[#allocation7 + $0x128] ss:$16 sps:$4 sm:$0xff]   ;;  %v4531_v51 = vld [vmem:[#allocation7 + $0x140] ss:$16 sps:$4 sm:$0xff]   ;;  %v4536_v52 = vld [vmem:[#allocation7 + $0x14c] ss:$16 sps:$4 sm:$0xff]  }
  0x8f   :  { %v4539_v53 = vld [vmem:[#allocation7 + $0x164] ss:$16 sps:$4 sm:$0xff]   ;;  %v4534_v54 = vld [vmem:[#allocation7 + $0x148] ss:$16 sps:$4 sm:$0xff]   ;;  %v4537_v55 = vld [vmem:[#allocation7 + $0x160] ss:$16 sps:$4 sm:$0xff]  }
  0x90   :  { %959 = vmatpush1.bf16.msra.mxu0 %v4483_v19  ;;  %1045 = vmatpush1.bf16.msra.mxu1 %v4486_v22  ;;  %v4542_v56 = vld [vmem:[#allocation7 + $0x16c] ss:$16 sps:$4 sm:$0xff]   ;;  %v4545_v57 = vld [vmem:[#allocation7 + $0x184] ss:$16 sps:$4 sm:$0xff]   ;;  %v4540_v58 = vld [vmem:[#allocation7 + $0x168] ss:$16 sps:$4 sm:$0xff]  }
  0x91   :  { %960 = vmatprep.subr.bf16.mxu0 %v4491_v21  ;;  %1046 = vmatprep.subr.bf16.mxu1 %v4494_v24  ;;  %v4543_v59 = vld [vmem:[#allocation7 + $0x180] ss:$16 sps:$4 sm:$0xff]   ;;  %v4548_v60 = vld [vmem:[#allocation7 + $0x18c] ss:$16 sps:$4 sm:$0xff]   ;;  %v4546_v61 = vld [vmem:[#allocation7 + $0x188] ss:$16 sps:$4 sm:$0xff]  }
  0x92   :  { %v4551_v62 = vld [vmem:[#allocation7 + $0x1a4] ss:$16 sps:$4 sm:$0xff]   ;;  %v4554_v63 = vld [vmem:[#allocation7 + $0x1ac] ss:$16 sps:$4 sm:$0xff]   ;;  %v4549_v1 = vld [vmem:[#allocation7 + $0x1a0] ss:$16 sps:$4 sm:$0xff]  }
  0x93   :  { %v4552_v2 = vld [vmem:[#allocation7 + $0x1a8] ss:$16 sps:$4 sm:$0xff]   ;;  %v4557_v3 = vld [vmem:[#allocation7 + $0x1c4] ss:$16 sps:$4 sm:$0xff]   ;;  %v4560_v4 = vld [vmem:[#allocation7 + $0x1cc] ss:$16 sps:$4 sm:$0xff]  }
  0x94   :  { %961 = vmatpush1.bf16.msra.mxu0 %v4489_v23  ;;  %1047 = vmatpush1.bf16.msra.mxu1 %v4492_v26  ;;  %v4555_v5 = vld [vmem:[#allocation7 + $0x1c0] ss:$16 sps:$4 sm:$0xff]   ;;  %v4558_v6 = vld [vmem:[#allocation7 + $0x1c8] ss:$16 sps:$4 sm:$0xff]   ;;  %v4563_v7 = vld [vmem:[#allocation7 + $0x1e4] ss:$16 sps:$4 sm:$0xff]  }
  0x95   :  { %962 = vmatprep.subr.bf16.mxu0 %v4497_v25  ;;  %1048 = vmatprep.subr.bf16.mxu1 %v4500_v28  ;;  %v4566_v8 = vld [vmem:[#allocation7 + $0x1ec] ss:$16 sps:$4 sm:$0xff]   ;;  %v4561_v9 = vld [vmem:[#allocation7 + $0x1e0] ss:$16 sps:$4 sm:$0xff]   ;;  %v4564_v10 = vld [vmem:[#allocation7 + $0x1e8] ss:$16 sps:$4 sm:$0xff]  }
  0x96   :  { %v4569_v11 = vld [vmem:[#allocation7 + $0x204] ss:$16 sps:$4 sm:$0xff]   ;;  %v4572_v12 = vld [vmem:[#allocation7 + $0x20c] ss:$16 sps:$4 sm:$0xff]   ;;  %v154_v14 = vshrl.u32 %v153_v13, 7  ;;  %s5294_s14 = smov [#allocation14]  }
  0x97   :  { %v151_v16 = vld [vmem:[%s5577_s2] sm:$0xf]  ;;  %v4591_v13 = vld [vmem:[#allocation7 + $0x280] ss:$16 sps:$4 sm:$0xff]   ;;  %s3896_s16 = sshll.u32 %s5294_s14, 4  ;;  %s3897_s16 = int_to_ptr.vmem [resolvable:$true] %s3896_s16 }
  0x98   :  { %963 = vmatpush1.bf16.msra.mxu0 %v4495_v27  ;;  %1049 = vmatpush1.bf16.msra.mxu1 %v4498_v30  ;;  %v5483_v15 = vsub.s32 0, %v154_v14  ;;  %v5488_v17 = vsub.s32 1, %v154_v14  ;;  %v5491_v19 = vsub.s32 2, %v154_v14  ;;  %v5494_v21 = vsub.s32 3, %v154_v14  ;;  %v4594_v14 = vld [vmem:[#allocation7 + $0x288] ss:$16 sps:$4 sm:$0xff]   ;;  %p5255_p1 = scmp.lt.s32.totalorder %s3897_s16, %s3897_s16 }
  0x99   :  { %964 = vmatprep.subr.bf16.mxu0 %v4503_v29  ;;  %1050 = vmatprep.subr.bf16.mxu1 %v4506_v32  ;;  %s5250_s1 = scalar_lea.vmem %s3897_s16, 256 }
  0x9a   :  { %v156_v18 = vrot.slane %v151_v16, %v5483_v15  ;;  %v160_v20 = vrot.slane %v151_v16, %v5488_v17  ;;  %v164_v25 = vrot.slane %v151_v16, %v5491_v19  ;;  %v168_v28 = vrot.slane %v151_v16, %v5494_v21  ;;  %v4599_v16 = vld [vmem:[#allocation7 + $0x2a4] ss:$16 sps:$4 sm:$0xff]   ;;  %p5251_p0 = scmp.ne.s32.totalorder %s3897_s16, %s5250_s1  ;;  %p5256_p2 = scmp.lt.s32.totalorder %s5250_s1, %s5250_s1 }
  0x9c   :  { %965 = vmatpush1.bf16.msra.mxu0 %v4501_v31  ;;  %1051 = vmatpush1.bf16.msra.mxu1 %v4504_v34  ;;  %p5257_p3 = por %p5256_p2, %p5255_p1 }
  0x9d   :  { %966 = vmatprep.subr.bf16.mxu0 %v4509_v33  ;;  %1052 = vmatprep.subr.bf16.mxu1 %v4512_v36 }
  0x9e   :  { %p5258_p4 = pnand %p5257_p3, %p5251_p0 }
  0xa0   :  { %967 = vmatpush1.bf16.msra.mxu0 %v4507_v35  ;;  %1053 = vmatpush1.bf16.msra.mxu1 %v4510_v38 }
  0xa1   :  { %968 = vmatprep.subr.bf16.mxu0 %v4515_v37  ;;  %1054 = vmatprep.subr.bf16.mxu1 %v4518_v40 }
  0xa4   :  { %969 = vmatpush1.bf16.msra.mxu0 %v4513_v39  ;;  %1055 = vmatpush1.bf16.msra.mxu1 %v4516_v42 }
  0xa5   :  { %970 = vmatprep.subr.bf16.mxu0 %v4521_v41  ;;  %1056 = vmatprep.subr.bf16.mxu1 %v4524_v44 }
  0xa8   :  { %971 = vmatpush1.bf16.msra.mxu0 %v4519_v43  ;;  %1057 = vmatpush1.bf16.msra.mxu1 %v4522_v46 }
  0xa9   :  { %972 = vmatprep.subr.bf16.mxu0 %v4527_v45  ;;  %1058 = vmatprep.subr.bf16.mxu1 %v4530_v48 }
  0xac   :  { %973 = vmatpush1.bf16.msra.mxu0 %v4525_v47  ;;  %1059 = vmatpush1.bf16.msra.mxu1 %v4528_v50 }
  0xad   :  { %974 = vmatprep.subr.bf16.mxu0 %v4533_v49  ;;  %1060 = vmatprep.subr.bf16.mxu1 %v4536_v52 }
  0xb0   :  { %975 = vmatpush1.bf16.msra.mxu0 %v4531_v51  ;;  %1061 = vmatpush1.bf16.msra.mxu1 %v4534_v54  ;;  %v4567_v54 = vld [vmem:[#allocation7 + $0x200] ss:$16 sps:$4 sm:$0xff]  }
  0xb1   :  { %976 = vmatprep.subr.bf16.mxu0 %v4539_v53  ;;  %1062 = vmatprep.subr.bf16.mxu1 %v4542_v56 }
  0xb4   :  { %977 = vmatpush1.bf16.msra.mxu0 %v4537_v55  ;;  %1063 = vmatpush1.bf16.msra.mxu1 %v4540_v58  ;;  %v4570_v55 = vld [vmem:[#allocation7 + $0x208] ss:$16 sps:$4 sm:$0xff]   ;;  %v4575_v58 = vld [vmem:[#allocation7 + $0x224] ss:$16 sps:$4 sm:$0xff]  }
  0xb5   :  { %978 = vmatprep.subr.bf16.mxu0 %v4545_v57  ;;  %1064 = vmatprep.subr.bf16.mxu1 %v4548_v60 }
  0xb8   :  { %979 = vmatpush1.bf16.msra.mxu0 %v4543_v59  ;;  %1065 = vmatpush1.bf16.msra.mxu1 %v4546_v61  ;;  %v4578_v59 = vld [vmem:[#allocation7 + $0x22c] ss:$16 sps:$4 sm:$0xff]  }
  0xb9   :  { %980 = vmatprep.subr.bf16.mxu0 %v4551_v62  ;;  %1066 = vmatprep.subr.bf16.mxu1 %v4554_v63  ;;  %v4573_v63 = vld [vmem:[#allocation7 + $0x220] ss:$16 sps:$4 sm:$0xff]  }
  0xbc   :  { %981 = vmatpush1.bf16.msra.mxu0 %v4549_v1  ;;  %1067 = vmatpush1.bf16.msra.mxu1 %v4552_v2  ;;  %v4576_v1 = vld [vmem:[#allocation7 + $0x228] ss:$16 sps:$4 sm:$0xff]  }
  0xbd   :  { %982 = vmatprep.subr.bf16.mxu0 %v4557_v3  ;;  %1068 = vmatprep.subr.bf16.mxu1 %v4560_v4  ;;  %v4581_v3 = vld [vmem:[#allocation7 + $0x244] ss:$16 sps:$4 sm:$0xff]   ;;  %v4584_v4 = vld [vmem:[#allocation7 + $0x24c] ss:$16 sps:$4 sm:$0xff]  }
  0xc0   :  { %983 = vmatpush1.bf16.msra.mxu0 %v4555_v5  ;;  %1069 = vmatpush1.bf16.msra.mxu1 %v4558_v6  ;;  %v4579_v5 = vld [vmem:[#allocation7 + $0x240] ss:$16 sps:$4 sm:$0xff]   ;;  %v4582_v6 = vld [vmem:[#allocation7 + $0x248] ss:$16 sps:$4 sm:$0xff]  }
  0xc1   :  { %984 = vmatprep.subr.bf16.mxu0 %v4563_v7  ;;  %1070 = vmatprep.subr.bf16.mxu1 %v4566_v8  ;;  %v4587_v7 = vld [vmem:[#allocation7 + $0x264] ss:$16 sps:$4 sm:$0xff]   ;;  %v4590_v8 = vld [vmem:[#allocation7 + $0x26c] ss:$16 sps:$4 sm:$0xff]  }
  0xc4   :  { %985 = vmatpush1.bf16.msra.mxu0 %v4561_v9  ;;  %1071 = vmatpush1.bf16.msra.mxu1 %v4564_v10  ;;  %v4585_v9 = vld [vmem:[#allocation7 + $0x260] ss:$16 sps:$4 sm:$0xff]   ;;  %v4588_v10 = vld [vmem:[#allocation7 + $0x268] ss:$16 sps:$4 sm:$0xff]  }
  0xc5   :  { %997 = vmatprep.subr.bf16.mxu0 %v4569_v11  ;;  %1083 = vmatprep.subr.bf16.mxu1 %v4572_v12  ;;  %v4593_v11 = vld [vmem:[#allocation7 + $0x284] ss:$16 sps:$4 sm:$0xff]   ;;  %v4596_v12 = vld [vmem:[#allocation7 + $0x28c] ss:$16 sps:$4 sm:$0xff]  }
 0x15a   :  { %v256_v22 = vpop.f32.mrb[0].mxu0  ;;  %v299_v34 = vpop.f32.mrb[0].mxu1 }
 0x15b   :  { %v257_v23 = vadd.f32 %v256_v22, %v156_v18  ;;  %v258_v24 = vpop.f32.mrb[1].mxu0  ;;  %v300_v36 = vadd.f32 %v299_v34, %v164_v25  ;;  %v301_v37 = vpop.f32.mrb[1].mxu1  ;;  %v4600_v22 = vld [vmem:[#allocation7 + $0x2a8] ss:$16 sps:$4 sm:$0xff]  }
 0x15c   :  { %v259_v26 = vadd.f32 %v258_v24, %v160_v20  ;;  %v260_v27 = vpop.f32.mrb[2].mxu0  ;;  %v302_v39 = vadd.f32 %v301_v37, %v168_v28  ;;  %v303_v40 = vpop.f32.mrb[2].mxu1  ;;  %v4608_v24 = vld [vmem:[#allocation7 + $0x2cc] ss:$16 sps:$4 sm:$0xff]   ;;  %v4618_v34 = vld [vmem:[#allocation7 + $0x308] ss:$16 sps:$4 sm:$0xff]  }
 0x15d   :  { %v308_v29 = vmul.f32 0.2, %v257_v23  ;;  %v261_v30 = vadd.f32 %v260_v27, %v156_v18  ;;  %v262_v31 = vpop.f32.mrb[3].mxu0  ;;  %v310_v43 = vmul.f32 0.2, %v300_v36  ;;  %v304_v44 = vadd.f32 %v303_v40, %v164_v25  ;;  %v305_v45 = vpop.f32.mrb[3].mxu1 }
 0x15e   :  { %v309_v32 = vmul.f32 0.2, %v259_v26  ;;  %v263_v33 = vadd.f32 %v262_v31, %v160_v20  ;;  %v311_v48 = vmul.f32 0.2, %v302_v39  ;;  %v306_v49 = vadd.f32 %v305_v45, %v168_v28  ;;  %v4602_v18 = vld [vmem:[#allocation7 + $0x2ac] ss:$16 sps:$4 sm:$0xff]  }
 0x15f   :  { %v312_v35 = vmul.f32 0.2, %v261_v30  ;;  %v316_v41 = vmax.f32 %v257_v23, %v308_v29  ;;  %v318_v51 = vmax.f32 %v300_v36, %v310_v43  ;;  %v314_v52 = vmul.f32 0.2, %v304_v44  ;;  %v4597_v20 = vld [vmem:[#allocation7 + $0x2a0] ss:$16 sps:$4 sm:$0xff]  }
 0x160   :  { %v313_v38 = vmul.f32 0.2, %v263_v33  ;;  %v317_v46 = vmax.f32 %v259_v26, %v309_v32  ;;  %v319_v56 = vmax.f32 %v302_v39, %v311_v48  ;;  %v315_v57 = vmul.f32 0.2, %v306_v49  ;;  %v4605_v23 = vld [vmem:[#allocation7 + $0x2c4] ss:$16 sps:$4 sm:$0xff]  }
 0x161   :  { %v320_v42 = vmax.f32 %v261_v30, %v312_v35  ;;  %v322_v60 = vmax.f32 %v304_v44, %v314_v52  ;;  %v4603_v25 = vld [vmem:[#allocation7 + $0x2c0] ss:$16 sps:$4 sm:$0xff]   ;;  %v4606_v26 = vld [vmem:[#allocation7 + $0x2c8] ss:$16 sps:$4 sm:$0xff]   ;;  %v4611_v27 = vld [vmem:[#allocation7 + $0x2e4] ss:$16 sps:$4 sm:$0xff]  }
 0x162   :  { %v321_v47 = vmax.f32 %v263_v33, %v313_v38  ;;  %v323_v61 = vmax.f32 %v306_v49, %v315_v57  ;;  %v4614_v28 = vld [vmem:[#allocation7 + $0x2ec] ss:$16 sps:$4 sm:$0xff]   ;;  %v4609_v29 = vld [vmem:[#allocation7 + $0x2e0] ss:$16 sps:$4 sm:$0xff]   ;;  %v4612_v30 = vld [vmem:[#allocation7 + $0x2e8] ss:$16 sps:$4 sm:$0xff]  }
 0x163   :  { %v425_v50 = vpack.c.bf16 %v320_v42, %v316_v41  ;;  %v5498_v62 = vpack.c.bf16 %v322_v60, %v318_v51  ;;  %v4617_v31 = vld [vmem:[#allocation7 + $0x304] ss:$16 sps:$4 sm:$0xff]   ;;  %v4620_v32 = vld [vmem:[#allocation7 + $0x30c] ss:$16 sps:$4 sm:$0xff]   ;;  %v4615_v33 = vld [vmem:[#allocation7 + $0x300] ss:$16 sps:$4 sm:$0xff]  }
 0x164   :  { %v426_v53 = vpack.c.bf16 %v321_v47, %v317_v46  ;;  %v428_v2 = vpack.c.bf16 %v323_v61, %v319_v56  ;;  %v4623_v35 = vld [vmem:[#allocation8 + $0x4] ss:$16 sps:$4 sm:$0xff]   ;;  %v4626_v36 = vld [vmem:[#allocation8 + $0xc] ss:$16 sps:$4 sm:$0xff]   ;;  %v4621_v37 = vld [vmem:[#allocation8] ss:$16 sps:$4 sm:$0xff]  }
 0x165   :  { %v4624_v38 = vld [vmem:[#allocation8 + $0x8] ss:$16 sps:$4 sm:$0xff]   ;;  %v4629_v39 = vld [vmem:[#allocation8 + $0x24] ss:$16 sps:$4 sm:$0xff]   ;;  %v4632_v40 = vld [vmem:[#allocation8 + $0x2c] ss:$16 sps:$4 sm:$0xff]  }
 0x166   :  { %986 = vmatprep.mubr.bf16.mxu0 %v426_v53  ;;  %1072 = vmatprep.mubr.bf16.mxu1 %v426_v53  ;;  %v4627_v41 = vld [vmem:[#allocation8 + $0x20] ss:$16 sps:$4 sm:$0xff]   ;;  %v4630_v42 = vld [vmem:[#allocation8 + $0x28] ss:$16 sps:$4 sm:$0xff]   ;;  %v4635_v43 = vld [vmem:[#allocation8 + $0x44] ss:$16 sps:$4 sm:$0xff]  }
 0x167   :  { %987 = vmatmul.mubr.bf16.vlgmr.msra.gmra.mrb[4].mxu0 %v425_v50  ;;  %1073 = vmatmul.mubr.bf16.vlgmr.msra.gmra.mrb[4].mxu1 %v425_v50  ;;  %v4638_v44 = vld [vmem:[#allocation8 + $0x4c] ss:$16 sps:$4 sm:$0xff]   ;;  %v4633_v45 = vld [vmem:[#allocation8 + $0x40] ss:$16 sps:$4 sm:$0xff]   ;;  %v4636_v46 = vld [vmem:[#allocation8 + $0x48] ss:$16 sps:$4 sm:$0xff]  }
 0x168   :  { %998 = vmatpush1.bf16.msra.mxu0 %v4567_v54  ;;  %1084 = vmatpush1.bf16.msra.mxu1 %v4570_v55  ;;  %v4641_v47 = vld [vmem:[#allocation8 + $0x64] ss:$16 sps:$4 sm:$0xff]   ;;  %v4644_v48 = vld [vmem:[#allocation8 + $0x6c] ss:$16 sps:$4 sm:$0xff]   ;;  %v4639_v49 = vld [vmem:[#allocation8 + $0x60] ss:$16 sps:$4 sm:$0xff]  }
 0x169   :  { %999 = vmatprep.subr.bf16.mxu0 %v4575_v58  ;;  %1085 = vmatprep.subr.bf16.mxu1 %v4578_v59  ;;  %v4642_v50 = vld [vmem:[#allocation8 + $0x68] ss:$16 sps:$4 sm:$0xff]   ;;  %v4647_v51 = vld [vmem:[#allocation8 + $0x84] ss:$16 sps:$4 sm:$0xff]   ;;  %v4650_v52 = vld [vmem:[#allocation8 + $0x8c] ss:$16 sps:$4 sm:$0xff]  }
 0x16a   :  { %4022 = vmatprep.mubr.msk.bf16.mxu0 %vm950_vm1, %v428_v2  ;;  %4023 = vmatprep.mubr.msk.bf16.mxu1 %vm950_vm1, %v428_v2  ;;  %v4645_v53 = vld [vmem:[#allocation8 + $0x80] ss:$16 sps:$4 sm:$0xff]   ;;  %v4648_v54 = vld [vmem:[#allocation8 + $0x88] ss:$16 sps:$4 sm:$0xff]   ;;  %v4653_v55 = vld [vmem:[#allocation8 + $0xa4] ss:$16 sps:$4 sm:$0xff]  }
 0x16b   :  { %v4656_v56 = vld [vmem:[#allocation8 + $0xac] ss:$16 sps:$4 sm:$0xff]   ;;  %v4651_v57 = vld [vmem:[#allocation8 + $0xa0] ss:$16 sps:$4 sm:$0xff]   ;;  %v4654_v58 = vld [vmem:[#allocation8 + $0xa8] ss:$16 sps:$4 sm:$0xff]  }
 0x16c   :  { %1000 = vmatpush1.bf16.msra.mxu0 %v4573_v63  ;;  %1086 = vmatpush1.bf16.msra.mxu1 %v4576_v1  ;;  %v4659_v59 = vld [vmem:[#allocation8 + $0xc4] ss:$16 sps:$4 sm:$0xff]   ;;  %v4662_v60 = vld [vmem:[#allocation8 + $0xcc] ss:$16 sps:$4 sm:$0xff]   ;;  %v4657_v61 = vld [vmem:[#allocation8 + $0xc0] ss:$16 sps:$4 sm:$0xff]  }
 0x16d   :  { %1001 = vmatprep.subr.bf16.mxu0 %v4581_v3  ;;  %1087 = vmatprep.subr.bf16.mxu1 %v4584_v4  ;;  %v4665_v63 = vld [vmem:[#allocation8 + $0xe4] ss:$16 sps:$4 sm:$0xff]   ;;  %v4668_v1 = vld [vmem:[#allocation8 + $0xec] ss:$16 sps:$4 sm:$0xff]   ;;  %v4663_v2 = vld [vmem:[#allocation8 + $0xe0] ss:$16 sps:$4 sm:$0xff]  }
 0x16e   :  { %v4666_v3 = vld [vmem:[#allocation8 + $0xe8] ss:$16 sps:$4 sm:$0xff]   ;;  %v4671_v4 = vld [vmem:[#allocation8 + $0x104] ss:$16 sps:$4 sm:$0xff]  }
 0x170   :  { %1002 = vmatpush1.bf16.msra.mxu0 %v4579_v5  ;;  %1088 = vmatpush1.bf16.msra.mxu1 %v4582_v6  ;;  %v4674_v5 = vld [vmem:[#allocation8 + $0x10c] ss:$16 sps:$4 sm:$0xff]   ;;  %v4669_v6 = vld [vmem:[#allocation8 + $0x100] ss:$16 sps:$4 sm:$0xff]  }
 0x171   :  { %1003 = vmatprep.subr.bf16.mxu0 %v4587_v7  ;;  %1089 = vmatprep.subr.bf16.mxu1 %v4590_v8  ;;  %v4672_v7 = vld [vmem:[#allocation8 + $0x108] ss:$16 sps:$4 sm:$0xff]   ;;  %v4677_v8 = vld [vmem:[#allocation8 + $0x124] ss:$16 sps:$4 sm:$0xff]  }
 0x174   :  { %1004 = vmatpush1.bf16.msra.mxu0 %v4585_v9  ;;  %1090 = vmatpush1.bf16.msra.mxu1 %v4588_v10  ;;  %v4680_v9 = vld [vmem:[#allocation8 + $0x12c] ss:$16 sps:$4 sm:$0xff]   ;;  %v4675_v10 = vld [vmem:[#allocation8 + $0x120] ss:$16 sps:$4 sm:$0xff]  }
 0x175   :  { %1005 = vmatprep.subr.bf16.mxu0 %v4593_v11  ;;  %1091 = vmatprep.subr.bf16.mxu1 %v4596_v12  ;;  %v4678_v11 = vld [vmem:[#allocation8 + $0x128] ss:$16 sps:$4 sm:$0xff]   ;;  %v4683_v12 = vld [vmem:[#allocation8 + $0x144] ss:$16 sps:$4 sm:$0xff]  }
 0x178   :  { %1006 = vmatpush1.bf16.msra.mxu0 %v4591_v13  ;;  %1092 = vmatpush1.bf16.msra.mxu1 %v4594_v14  ;;  %v4686_v13 = vld [vmem:[#allocation8 + $0x14c] ss:$16 sps:$4 sm:$0xff]   ;;  %v4681_v14 = vld [vmem:[#allocation8 + $0x140] ss:$16 sps:$4 sm:$0xff]  }
 0x179   :  { %1007 = vmatprep.subr.bf16.mxu0 %v4599_v16  ;;  %1093 = vmatprep.subr.bf16.mxu1 %v4602_v18  ;;  %v4684_v16 = vld [vmem:[#allocation8 + $0x148] ss:$16 sps:$4 sm:$0xff]   ;;  %v4689_v18 = vld [vmem:[#allocation8 + $0x164] ss:$16 sps:$4 sm:$0xff]  }
 0x17c   :  { %1008 = vmatpush1.bf16.msra.mxu0 %v4597_v20  ;;  %1094 = vmatpush1.bf16.msra.mxu1 %v4600_v22  ;;  %v4692_v20 = vld [vmem:[#allocation8 + $0x16c] ss:$16 sps:$4 sm:$0xff]   ;;  %v4687_v22 = vld [vmem:[#allocation8 + $0x160] ss:$16 sps:$4 sm:$0xff]  }
 0x17d   :  { %1009 = vmatprep.subr.bf16.mxu0 %v4605_v23  ;;  %1095 = vmatprep.subr.bf16.mxu1 %v4608_v24  ;;  %v4690_v23 = vld [vmem:[#allocation8 + $0x168] ss:$16 sps:$4 sm:$0xff]   ;;  %v4695_v24 = vld [vmem:[#allocation8 + $0x184] ss:$16 sps:$4 sm:$0xff]  }
 0x180   :  { %1010 = vmatpush1.bf16.msra.mxu0 %v4603_v25  ;;  %1096 = vmatpush1.bf16.msra.mxu1 %v4606_v26  ;;  %v4698_v25 = vld [vmem:[#allocation8 + $0x18c] ss:$16 sps:$4 sm:$0xff]   ;;  %v4693_v26 = vld [vmem:[#allocation8 + $0x180] ss:$16 sps:$4 sm:$0xff]  }
 0x181   :  { %1011 = vmatprep.subr.bf16.mxu0 %v4611_v27  ;;  %1097 = vmatprep.subr.bf16.mxu1 %v4614_v28  ;;  %v4696_v27 = vld [vmem:[#allocation8 + $0x188] ss:$16 sps:$4 sm:$0xff]   ;;  %v4701_v28 = vld [vmem:[#allocation8 + $0x1a4] ss:$16 sps:$4 sm:$0xff]  }
 0x184   :  { %1012 = vmatpush1.bf16.msra.mxu0 %v4609_v29  ;;  %1098 = vmatpush1.bf16.msra.mxu1 %v4612_v30  ;;  %v4704_v29 = vld [vmem:[#allocation8 + $0x1ac] ss:$16 sps:$4 sm:$0xff]   ;;  %v4699_v30 = vld [vmem:[#allocation8 + $0x1a0] ss:$16 sps:$4 sm:$0xff]  }
 0x185   :  { %1013 = vmatprep.subr.bf16.mxu0 %v4617_v31  ;;  %1099 = vmatprep.subr.bf16.mxu1 %v4620_v32  ;;  %v4702_v31 = vld [vmem:[#allocation8 + $0x1a8] ss:$16 sps:$4 sm:$0xff]   ;;  %v4707_v32 = vld [vmem:[#allocation8 + $0x1c4] ss:$16 sps:$4 sm:$0xff]  }
 0x188   :  { %1014 = vmatpush1.bf16.msra.mxu0 %v4615_v33  ;;  %1100 = vmatpush1.bf16.msra.mxu1 %v4618_v34  ;;  %v4710_v33 = vld [vmem:[#allocation8 + $0x1cc] ss:$16 sps:$4 sm:$0xff]   ;;  %v4705_v34 = vld [vmem:[#allocation8 + $0x1c0] ss:$16 sps:$4 sm:$0xff]  }
 0x189   :  { %1771 = vmatprep.subr.bf16.mxu0 %v4623_v35  ;;  %1857 = vmatprep.subr.bf16.mxu1 %v4626_v36  ;;  %v4708_v35 = vld [vmem:[#allocation8 + $0x1c8] ss:$16 sps:$4 sm:$0xff]   ;;  %v4713_v36 = vld [vmem:[#allocation8 + $0x1e4] ss:$16 sps:$4 sm:$0xff]  }
 0x18b   :  { %1030 = vmatmul.mubr.bf16.vlgmr.msra.gmra.mrb[4].mxu0 %v5498_v62  ;;  %1116 = vmatmul.mubr.bf16.vlgmr.msra.gmra.mrb[4].mxu1 %v5498_v62  ;;  %v4660_v62 = vld [vmem:[#allocation8 + $0xc8] ss:$16 sps:$4 sm:$0xff]  }
 0x18c   :  { %1772 = vmatpush1.bf16.msra.mxu0 %v4621_v37  ;;  %1858 = vmatpush1.bf16.msra.mxu1 %v4624_v38  ;;  %v4716_v37 = vld [vmem:[#allocation8 + $0x1ec] ss:$16 sps:$4 sm:$0xff]   ;;  %v4711_v38 = vld [vmem:[#allocation8 + $0x1e0] ss:$16 sps:$4 sm:$0xff]  }
 0x18d   :  { %1773 = vmatprep.subr.bf16.mxu0 %v4629_v39  ;;  %1859 = vmatprep.subr.bf16.mxu1 %v4632_v40  ;;  %v4714_v39 = vld [vmem:[#allocation8 + $0x1e8] ss:$16 sps:$4 sm:$0xff]   ;;  %v4719_v40 = vld [vmem:[#allocation8 + $0x204] ss:$16 sps:$4 sm:$0xff]  }
 0x190   :  { %1774 = vmatpush1.bf16.msra.mxu0 %v4627_v41  ;;  %1860 = vmatpush1.bf16.msra.mxu1 %v4630_v42  ;;  %v4722_v41 = vld [vmem:[#allocation8 + $0x20c] ss:$16 sps:$4 sm:$0xff]   ;;  %v424_v42 = vld [vmem:[%s5579_s4] sm:$0xf] }
 0x191   :  { %1775 = vmatprep.subr.bf16.mxu0 %v4635_v43  ;;  %1861 = vmatprep.subr.bf16.mxu1 %v4638_v44  ;;  %v433_v43 = vrot.slane %v424_v42, %v5483_v15  ;;  %v441_v44 = vrot.slane %v424_v42, %v5491_v19 }
 0x194   :  { %1776 = vmatpush1.bf16.msra.mxu0 %v4633_v45  ;;  %1862 = vmatpush1.bf16.msra.mxu1 %v4636_v46  ;;  %v437_v45 = vrot.slane %v424_v42, %v5488_v17  ;;  %v445_v46 = vrot.slane %v424_v42, %v5494_v21  ;;  %v4749_v42 = vld [vmem:[#allocation8 + $0x2a4] ss:$16 sps:$4 sm:$0xff]  }
 0x195   :  { %1777 = vmatprep.subr.bf16.mxu0 %v4641_v47  ;;  %1863 = vmatprep.subr.bf16.mxu1 %v4644_v48 }
 0x198   :  { %1778 = vmatpush1.bf16.msra.mxu0 %v4639_v49  ;;  %1864 = vmatpush1.bf16.msra.mxu1 %v4642_v50 }
 0x199   :  { %1779 = vmatprep.subr.bf16.mxu0 %v4647_v51  ;;  %1865 = vmatprep.subr.bf16.mxu1 %v4650_v52 }
 0x19c   :  { %1780 = vmatpush1.bf16.msra.mxu0 %v4645_v53  ;;  %1866 = vmatpush1.bf16.msra.mxu1 %v4648_v54 }
 0x19d   :  { %1781 = vmatprep.subr.bf16.mxu0 %v4653_v55  ;;  %1867 = vmatprep.subr.bf16.mxu1 %v4656_v56 }
 0x1a0   :  { %1782 = vmatpush1.bf16.msra.mxu0 %v4651_v57  ;;  %1868 = vmatpush1.bf16.msra.mxu1 %v4654_v58 }
 0x1a1   :  { %1783 = vmatprep.subr.bf16.mxu0 %v4659_v59  ;;  %1869 = vmatprep.subr.bf16.mxu1 %v4662_v60 }
 0x1a4   :  { %1784 = vmatpush1.bf16.msra.mxu0 %v4657_v61  ;;  %1870 = vmatpush1.bf16.msra.mxu1 %v4660_v62 }
 0x1a5   :  { %1785 = vmatprep.subr.bf16.mxu0 %v4665_v63  ;;  %1871 = vmatprep.subr.bf16.mxu1 %v4668_v1 }
 0x1a8   :  { %1786 = vmatpush1.bf16.msra.mxu0 %v4663_v2  ;;  %1872 = vmatpush1.bf16.msra.mxu1 %v4666_v3 }
 0x1a9   :  { %1787 = vmatprep.subr.bf16.mxu0 %v4671_v4  ;;  %1873 = vmatprep.subr.bf16.mxu1 %v4674_v5 }
 0x1ac   :  { %1788 = vmatpush1.bf16.msra.mxu0 %v4669_v6  ;;  %1874 = vmatpush1.bf16.msra.mxu1 %v4672_v7 }
 0x1ad   :  { %1789 = vmatprep.subr.bf16.mxu0 %v4677_v8  ;;  %1875 = vmatprep.subr.bf16.mxu1 %v4680_v9 }
 0x1b0   :  { %1790 = vmatpush1.bf16.msra.mxu0 %v4675_v10  ;;  %1876 = vmatpush1.bf16.msra.mxu1 %v4678_v11 }
 0x1b1   :  { %1791 = vmatprep.subr.bf16.mxu0 %v4683_v12  ;;  %1877 = vmatprep.subr.bf16.mxu1 %v4686_v13 }
 0x1b4   :  { %1792 = vmatpush1.bf16.msra.mxu0 %v4681_v14  ;;  %1878 = vmatpush1.bf16.msra.mxu1 %v4684_v16 }
 0x1b5   :  { %1793 = vmatprep.subr.bf16.mxu0 %v4689_v18  ;;  %1879 = vmatprep.subr.bf16.mxu1 %v4692_v20 }
 0x1b8   :  { %1794 = vmatpush1.bf16.msra.mxu0 %v4687_v22  ;;  %1880 = vmatpush1.bf16.msra.mxu1 %v4690_v23 }
 0x1b9   :  { %1795 = vmatprep.subr.bf16.mxu0 %v4695_v24  ;;  %1881 = vmatprep.subr.bf16.mxu1 %v4698_v25  ;;  %v4717_v24 = vld [vmem:[#allocation8 + $0x200] ss:$16 sps:$4 sm:$0xff]   ;;  %v4720_v25 = vld [vmem:[#allocation8 + $0x208] ss:$16 sps:$4 sm:$0xff]  }
 0x1bc   :  { %1796 = vmatpush1.bf16.msra.mxu0 %v4693_v26  ;;  %1882 = vmatpush1.bf16.msra.mxu1 %v4696_v27  ;;  %v4725_v26 = vld [vmem:[#allocation8 + $0x224] ss:$16 sps:$4 sm:$0xff]   ;;  %v4728_v27 = vld [vmem:[#allocation8 + $0x22c] ss:$16 sps:$4 sm:$0xff]  }
 0x1bd   :  { %1797 = vmatprep.subr.bf16.mxu0 %v4701_v28  ;;  %1883 = vmatprep.subr.bf16.mxu1 %v4704_v29  ;;  %v4723_v28 = vld [vmem:[#allocation8 + $0x220] ss:$16 sps:$4 sm:$0xff]   ;;  %v4726_v29 = vld [vmem:[#allocation8 + $0x228] ss:$16 sps:$4 sm:$0xff]  }
 0x1c0   :  { %1798 = vmatpush1.bf16.msra.mxu0 %v4699_v30  ;;  %1884 = vmatpush1.bf16.msra.mxu1 %v4702_v31  ;;  %v4731_v30 = vld [vmem:[#allocation8 + $0x244] ss:$16 sps:$4 sm:$0xff]   ;;  %v4734_v31 = vld [vmem:[#allocation8 + $0x24c] ss:$16 sps:$4 sm:$0xff]  }
 0x1c1   :  { %1799 = vmatprep.subr.bf16.mxu0 %v4707_v32  ;;  %1885 = vmatprep.subr.bf16.mxu1 %v4710_v33  ;;  %v4729_v32 = vld [vmem:[#allocation8 + $0x240] ss:$16 sps:$4 sm:$0xff]   ;;  %v4732_v33 = vld [vmem:[#allocation8 + $0x248] ss:$16 sps:$4 sm:$0xff]  }
 0x1c4   :  { %1800 = vmatpush1.bf16.msra.mxu0 %v4705_v34  ;;  %1886 = vmatpush1.bf16.msra.mxu1 %v4708_v35  ;;  %v4737_v34 = vld [vmem:[#allocation8 + $0x264] ss:$16 sps:$4 sm:$0xff]   ;;  %v4740_v35 = vld [vmem:[#allocation8 + $0x26c] ss:$16 sps:$4 sm:$0xff]  }
 0x1c5   :  { %1801 = vmatprep.subr.bf16.mxu0 %v4713_v36  ;;  %1887 = vmatprep.subr.bf16.mxu1 %v4716_v37  ;;  %v4735_v36 = vld [vmem:[#allocation8 + $0x260] ss:$16 sps:$4 sm:$0xff]   ;;  %v4738_v37 = vld [vmem:[#allocation8 + $0x268] ss:$16 sps:$4 sm:$0xff]  }
 0x1c8   :  { %1802 = vmatpush1.bf16.msra.mxu0 %v4711_v38  ;;  %1888 = vmatpush1.bf16.msra.mxu1 %v4714_v39  ;;  %v4743_v38 = vld [vmem:[#allocation8 + $0x284] ss:$16 sps:$4 sm:$0xff]   ;;  %v4746_v39 = vld [vmem:[#allocation8 + $0x28c] ss:$16 sps:$4 sm:$0xff]  }
 0x1c9   :  { %1814 = vmatprep.subr.bf16.mxu0 %v4719_v40  ;;  %1900 = vmatprep.subr.bf16.mxu1 %v4722_v41  ;;  %v4741_v40 = vld [vmem:[#allocation8 + $0x280] ss:$16 sps:$4 sm:$0xff]   ;;  %v4744_v41 = vld [vmem:[#allocation8 + $0x288] ss:$16 sps:$4 sm:$0xff]  }
 0x25e   :  { %v1031_v47 = vpop.f32.mrb[4].mxu0  ;;  %v1117_v48 = vpop.f32.mrb[4].mxu1 }
 0x25f   :  { %v4379_v49 = vadd.f32 %v1031_v47, %v433_v43  ;;  %v4383_v50 = vadd.f32 %v1117_v48, %v441_v44  ;;  %v1033_v51 = vpop.f32.mrb[5].mxu0  ;;  %v1119_v52 = vpop.f32.mrb[5].mxu1  ;;  %v4758_v47 = vld [vmem:[#allocation8 + $0x2cc] ss:$16 sps:$4 sm:$0xff]   ;;  %v4753_v48 = vld [vmem:[#allocation8 + $0x2c0] ss:$16 sps:$4 sm:$0xff]  }
 0x260   :  { %v4380_v53 = vadd.f32 %v1033_v51, %v437_v45  ;;  %v4384_v54 = vadd.f32 %v1119_v52, %v445_v46  ;;  %v1035_v55 = vpop.f32.mrb[6].mxu0  ;;  %v1121_v56 = vpop.f32.mrb[6].mxu1  ;;  %v4764_v51 = vld [vmem:[#allocation8 + $0x2ec] ss:$16 sps:$4 sm:$0xff]   ;;  %v4759_v52 = vld [vmem:[#allocation8 + $0x2e0] ss:$16 sps:$4 sm:$0xff]  }
 0x261   :  { %v1126_v57 = vmul.f32 0.2, %v4379_v49  ;;  %v1128_v58 = vmul.f32 0.2, %v4383_v50  ;;  %v4381_v59 = vadd.f32 %v1035_v55, %v433_v43  ;;  %v4385_v60 = vadd.f32 %v1121_v56, %v441_v44  ;;  %v1037_v61 = vpop.f32.mrb[7].mxu0  ;;  %v1123_v62 = vpop.f32.mrb[7].mxu1 }
 0x262   :  { %v1127_v63 = vmul.f32 0.2, %v4380_v53  ;;  %v1129_v1 = vmul.f32 0.2, %v4384_v54  ;;  %v4382_v2 = vadd.f32 %v1037_v61, %v437_v45  ;;  %v4386_v3 = vadd.f32 %v1123_v62, %v445_v46  ;;  %v4752_v43 = vld [vmem:[#allocation8 + $0x2ac] ss:$16 sps:$4 sm:$0xff]  }
 0x263   :  { %v1130_v4 = vmul.f32 0.2, %v4381_v59  ;;  %v1132_v5 = vmul.f32 0.2, %v4385_v60  ;;  %v1134_v8 = vmax.f32 %v4379_v49, %v1126_v57  ;;  %v1136_v9 = vmax.f32 %v4383_v50, %v1128_v58  ;;  %v4747_v44 = vld [vmem:[#allocation8 + $0x2a0] ss:$16 sps:$4 sm:$0xff]  }
 0x264   :  { %v1131_v6 = vmul.f32 0.2, %v4382_v2  ;;  %v1133_v7 = vmul.f32 0.2, %v4386_v3  ;;  %v1135_v12 = vmax.f32 %v4380_v53, %v1127_v63  ;;  %v1137_v13 = vmax.f32 %v4384_v54, %v1129_v1  ;;  %v4750_v45 = vld [vmem:[#allocation8 + $0x2a8] ss:$16 sps:$4 sm:$0xff]  }
 0x265   :  { %v1138_v10 = vmax.f32 %v4381_v59, %v1130_v4  ;;  %v1140_v11 = vmax.f32 %v4385_v60, %v1132_v5  ;;  %v4755_v46 = vld [vmem:[#allocation8 + $0x2c4] ss:$16 sps:$4 sm:$0xff]   ;;  %v4756_v49 = vld [vmem:[#allocation8 + $0x2c8] ss:$16 sps:$4 sm:$0xff]   ;;  %v4770_v55 = vld [vmem:[#allocation8 + $0x30c] ss:$16 sps:$4 sm:$0xff]  }
 0x266   :  { %v1139_v14 = vmax.f32 %v4382_v2, %v1131_v6  ;;  %v1141_v16 = vmax.f32 %v4386_v3, %v1133_v7  ;;  %v4761_v50 = vld [vmem:[#allocation8 + $0x2e4] ss:$16 sps:$4 sm:$0xff]   ;;  %v4762_v53 = vld [vmem:[#allocation8 + $0x2e8] ss:$16 sps:$4 sm:$0xff]   ;;  %v4765_v56 = vld [vmem:[#allocation8 + $0x300] ss:$16 sps:$4 sm:$0xff]  }
 0x267   :  { %v1243_v18 = vpack.c.bf16 %v1138_v10, %v1134_v8  ;;  %v5511_v20 = vpack.c.bf16 %v1140_v11, %v1136_v9  ;;  %v4767_v54 = vld [vmem:[#allocation8 + $0x304] ss:$16 sps:$4 sm:$0xff]   ;;  %v4768_v57 = vld [vmem:[#allocation8 + $0x308] ss:$16 sps:$4 sm:$0xff]   ;;  %v4776_v59 = vld [vmem:[#allocation10 + $0xc] ss:$16 sps:$4 sm:$0xff]  }
 0x268   :  { %v1246_v22 = vpack.c.bf16 %v1141_v16, %v1137_v13  ;;  %v1244_v23 = vpack.c.bf16 %v1139_v14, %v1135_v12  ;;  %v4773_v58 = vld [vmem:[#allocation10 + $0x4] ss:$16 sps:$4 sm:$0xff]   ;;  %v4771_v60 = vld [vmem:[#allocation10] ss:$16 sps:$4 sm:$0xff]   ;;  %v4774_v61 = vld [vmem:[#allocation10 + $0x8] ss:$16 sps:$4 sm:$0xff]  }
 0x269   :  { %v4779_v62 = vld [vmem:[#allocation10 + $0x24] ss:$16 sps:$4 sm:$0xff]   ;;  %v4782_v63 = vld [vmem:[#allocation10 + $0x2c] ss:$16 sps:$4 sm:$0xff]   ;;  %v4777_v1 = vld [vmem:[#allocation10 + $0x20] ss:$16 sps:$4 sm:$0xff]  }
 0x26a   :  { %1803 = vmatprep.mubr.bf16.mxu0 %v1244_v23  ;;  %1889 = vmatprep.mubr.bf16.mxu1 %v1244_v23  ;;  %v4780_v2 = vld [vmem:[#allocation10 + $0x28] ss:$16 sps:$4 sm:$0xff]   ;;  %v4785_v3 = vld [vmem:[#allocation10 + $0x44] ss:$16 sps:$4 sm:$0xff]   ;;  %v4788_v4 = vld [vmem:[#allocation10 + $0x4c] ss:$16 sps:$4 sm:$0xff]  }
 0x26b   :  { %1804 = vmatmul.mubr.bf16.vlgmr.msra.gmra.mrb[8].mxu0 %v1243_v18  ;;  %1890 = vmatmul.mubr.bf16.vlgmr.msra.gmra.mrb[8].mxu1 %v1243_v18  ;;  %v4783_v5 = vld [vmem:[#allocation10 + $0x40] ss:$16 sps:$4 sm:$0xff]   ;;  %v4786_v6 = vld [vmem:[#allocation10 + $0x48] ss:$16 sps:$4 sm:$0xff]   ;;  %v4791_v7 = vld [vmem:[#allocation10 + $0x64] ss:$16 sps:$4 sm:$0xff]  }
 0x26c   :  { %1815 = vmatpush1.bf16.msra.mxu0 %v4717_v24  ;;  %1901 = vmatpush1.bf16.msra.mxu1 %v4720_v25  ;;  %v4794_v8 = vld [vmem:[#allocation10 + $0x6c] ss:$16 sps:$4 sm:$0xff]   ;;  %v4789_v9 = vld [vmem:[#allocation10 + $0x60] ss:$16 sps:$4 sm:$0xff]   ;;  %v4792_v10 = vld [vmem:[#allocation10 + $0x68] ss:$16 sps:$4 sm:$0xff]  }
 0x26d   :  { %4124 = vmatprep.mubr.msk.bf16.mxu0 %vm950_vm1, %v1246_v22  ;;  %4125 = vmatprep.mubr.msk.bf16.mxu1 %vm950_vm1, %v1246_v22  ;;  %v4797_v11 = vld [vmem:[#allocation10 + $0x84] ss:$16 sps:$4 sm:$0xff]   ;;  %v4800_v12 = vld [vmem:[#allocation10 + $0x8c] ss:$16 sps:$4 sm:$0xff]   ;;  %v4795_v13 = vld [vmem:[#allocation10 + $0x80] ss:$16 sps:$4 sm:$0xff]  }
 0x26e   :  { %1816 = vmatprep.subr.bf16.mxu0 %v4725_v26  ;;  %1902 = vmatprep.subr.bf16.mxu1 %v4728_v27  ;;  %v4798_v14 = vld [vmem:[#allocation10 + $0x88] ss:$16 sps:$4 sm:$0xff]   ;;  %v4803_v16 = vld [vmem:[#allocation10 + $0xa4] ss:$16 sps:$4 sm:$0xff]   ;;  %v4806_v18 = vld [vmem:[#allocation10 + $0xac] ss:$16 sps:$4 sm:$0xff]  }
 0x26f   :  { %v4804_v22 = vld [vmem:[#allocation10 + $0xa8] ss:$16 sps:$4 sm:$0xff]   ;;  %v4809_v23 = vld [vmem:[#allocation10 + $0xc4] ss:$16 sps:$4 sm:$0xff]   ;;  %v4812_v24 = vld [vmem:[#allocation10 + $0xcc] ss:$16 sps:$4 sm:$0xff]  }
 0x270   :  { %1817 = vmatpush1.bf16.msra.mxu0 %v4723_v28  ;;  %1903 = vmatpush1.bf16.msra.mxu1 %v4726_v29  ;;  %v4807_v25 = vld [vmem:[#allocation10 + $0xc0] ss:$16 sps:$4 sm:$0xff]   ;;  %v4810_v26 = vld [vmem:[#allocation10 + $0xc8] ss:$16 sps:$4 sm:$0xff]   ;;  %v4815_v27 = vld [vmem:[#allocation10 + $0xe4] ss:$16 sps:$4 sm:$0xff]  }
 0x271   :  { %1818 = vmatprep.subr.bf16.mxu0 %v4731_v30  ;;  %1904 = vmatprep.subr.bf16.mxu1 %v4734_v31  ;;  %v4818_v28 = vld [vmem:[#allocation10 + $0xec] ss:$16 sps:$4 sm:$0xff]   ;;  %v4813_v29 = vld [vmem:[#allocation10 + $0xe0] ss:$16 sps:$4 sm:$0xff]   ;;  %v4816_v30 = vld [vmem:[#allocation10 + $0xe8] ss:$16 sps:$4 sm:$0xff]  }
 0x272   :  { %v4821_v31 = vld [vmem:[#allocation10 + $0x104] ss:$16 sps:$4 sm:$0xff]  }
 0x274   :  { %1819 = vmatpush1.bf16.msra.mxu0 %v4729_v32  ;;  %1905 = vmatpush1.bf16.msra.mxu1 %v4732_v33  ;;  %v4824_v32 = vld [vmem:[#allocation10 + $0x10c] ss:$16 sps:$4 sm:$0xff]   ;;  %v4819_v33 = vld [vmem:[#allocation10 + $0x100] ss:$16 sps:$4 sm:$0xff]  }
 0x275   :  { %1820 = vmatprep.subr.bf16.mxu0 %v4737_v34  ;;  %1906 = vmatprep.subr.bf16.mxu1 %v4740_v35  ;;  %v4822_v34 = vld [vmem:[#allocation10 + $0x108] ss:$16 sps:$4 sm:$0xff]   ;;  %v4827_v35 = vld [vmem:[#allocation10 + $0x124] ss:$16 sps:$4 sm:$0xff]  }
 0x278   :  { %1821 = vmatpush1.bf16.msra.mxu0 %v4735_v36  ;;  %1907 = vmatpush1.bf16.msra.mxu1 %v4738_v37  ;;  %v4830_v36 = vld [vmem:[#allocation10 + $0x12c] ss:$16 sps:$4 sm:$0xff]   ;;  %v4825_v37 = vld [vmem:[#allocation10 + $0x120] ss:$16 sps:$4 sm:$0xff]  }
 0x279   :  { %1822 = vmatprep.subr.bf16.mxu0 %v4743_v38  ;;  %1908 = vmatprep.subr.bf16.mxu1 %v4746_v39  ;;  %v4828_v38 = vld [vmem:[#allocation10 + $0x128] ss:$16 sps:$4 sm:$0xff]   ;;  %v4833_v39 = vld [vmem:[#allocation10 + $0x144] ss:$16 sps:$4 sm:$0xff]  }
 0x27c   :  { %1823 = vmatpush1.bf16.msra.mxu0 %v4741_v40  ;;  %1909 = vmatpush1.bf16.msra.mxu1 %v4744_v41  ;;  %v4836_v40 = vld [vmem:[#allocation10 + $0x14c] ss:$16 sps:$4 sm:$0xff]   ;;  %v4831_v41 = vld [vmem:[#allocation10 + $0x140] ss:$16 sps:$4 sm:$0xff]  }
 0x27d   :  { %1824 = vmatprep.subr.bf16.mxu0 %v4749_v42  ;;  %1910 = vmatprep.subr.bf16.mxu1 %v4752_v43  ;;  %v4834_v42 = vld [vmem:[#allocation10 + $0x148] ss:$16 sps:$4 sm:$0xff]   ;;  %v4839_v43 = vld [vmem:[#allocation10 + $0x164] ss:$16 sps:$4 sm:$0xff]  }
 0x280   :  { %1825 = vmatpush1.bf16.msra.mxu0 %v4747_v44  ;;  %1911 = vmatpush1.bf16.msra.mxu1 %v4750_v45  ;;  %v4842_v44 = vld [vmem:[#allocation10 + $0x16c] ss:$16 sps:$4 sm:$0xff]   ;;  %v4837_v45 = vld [vmem:[#allocation10 + $0x160] ss:$16 sps:$4 sm:$0xff]  }
 0x281   :  { %1826 = vmatprep.subr.bf16.mxu0 %v4755_v46  ;;  %1912 = vmatprep.subr.bf16.mxu1 %v4758_v47  ;;  %v4840_v46 = vld [vmem:[#allocation10 + $0x168] ss:$16 sps:$4 sm:$0xff]   ;;  %v4845_v47 = vld [vmem:[#allocation10 + $0x184] ss:$16 sps:$4 sm:$0xff]  }
 0x284   :  { %1827 = vmatpush1.bf16.msra.mxu0 %v4753_v48  ;;  %1913 = vmatpush1.bf16.msra.mxu1 %v4756_v49  ;;  %v4848_v48 = vld [vmem:[#allocation10 + $0x18c] ss:$16 sps:$4 sm:$0xff]   ;;  %v4843_v49 = vld [vmem:[#allocation10 + $0x180] ss:$16 sps:$4 sm:$0xff]  }
 0x285   :  { %1828 = vmatprep.subr.bf16.mxu0 %v4761_v50  ;;  %1914 = vmatprep.subr.bf16.mxu1 %v4764_v51  ;;  %v4846_v50 = vld [vmem:[#allocation10 + $0x188] ss:$16 sps:$4 sm:$0xff]   ;;  %v4851_v51 = vld [vmem:[#allocation10 + $0x1a4] ss:$16 sps:$4 sm:$0xff]  }
 0x288   :  { %1829 = vmatpush1.bf16.msra.mxu0 %v4759_v52  ;;  %1915 = vmatpush1.bf16.msra.mxu1 %v4762_v53  ;;  %v4854_v52 = vld [vmem:[#allocation10 + $0x1ac] ss:$16 sps:$4 sm:$0xff]   ;;  %v4849_v53 = vld [vmem:[#allocation10 + $0x1a0] ss:$16 sps:$4 sm:$0xff]  }
 0x289   :  { %1830 = vmatprep.subr.bf16.mxu0 %v4767_v54  ;;  %1916 = vmatprep.subr.bf16.mxu1 %v4770_v55  ;;  %v4852_v54 = vld [vmem:[#allocation10 + $0x1a8] ss:$16 sps:$4 sm:$0xff]   ;;  %v4857_v55 = vld [vmem:[#allocation10 + $0x1c4] ss:$16 sps:$4 sm:$0xff]  }
 0x28c   :  { %1831 = vmatpush1.bf16.msra.mxu0 %v4765_v56  ;;  %1917 = vmatpush1.bf16.msra.mxu1 %v4768_v57  ;;  %v4860_v56 = vld [vmem:[#allocation10 + $0x1cc] ss:$16 sps:$4 sm:$0xff]   ;;  %v4855_v57 = vld [vmem:[#allocation10 + $0x1c0] ss:$16 sps:$4 sm:$0xff]  }
 0x28d   :  { %2588 = vmatprep.subr.bf16.mxu0 %v4773_v58  ;;  %2674 = vmatprep.subr.bf16.mxu1 %v4776_v59  ;;  %v4858_v58 = vld [vmem:[#allocation10 + $0x1c8] ss:$16 sps:$4 sm:$0xff]   ;;  %v4863_v59 = vld [vmem:[#allocation10 + $0x1e4] ss:$16 sps:$4 sm:$0xff]  }
 0x28f   :  { %1847 = vmatmul.mubr.bf16.vlgmr.msra.gmra.mrb[8].mxu0 %v5511_v20  ;;  %1933 = vmatmul.mubr.bf16.vlgmr.msra.gmra.mrb[8].mxu1 %v5511_v20  ;;  %v4801_v20 = vld [vmem:[#allocation10 + $0xa0] ss:$16 sps:$4 sm:$0xff]  }
 0x290   :  { %2589 = vmatpush1.bf16.msra.mxu0 %v4771_v60  ;;  %2675 = vmatpush1.bf16.msra.mxu1 %v4774_v61  ;;  %v4866_v60 = vld [vmem:[#allocation10 + $0x1ec] ss:$16 sps:$4 sm:$0xff]   ;;  %v4861_v61 = vld [vmem:[#allocation10 + $0x1e0] ss:$16 sps:$4 sm:$0xff]  }
 0x291   :  { %2590 = vmatprep.subr.bf16.mxu0 %v4779_v62  ;;  %2676 = vmatprep.subr.bf16.mxu1 %v4782_v63  ;;  %v4864_v62 = vld [vmem:[#allocation10 + $0x1e8] ss:$16 sps:$4 sm:$0xff]   ;;  %v4869_v63 = vld [vmem:[#allocation10 + $0x204] ss:$16 sps:$4 sm:$0xff]  }
 0x294   :  { %2591 = vmatpush1.bf16.msra.mxu0 %v4777_v1  ;;  %2677 = vmatpush1.bf16.msra.mxu1 %v4780_v2  ;;  %v4872_v1 = vld [vmem:[#allocation10 + $0x20c] ss:$16 sps:$4 sm:$0xff]   ;;  %v1242_v2 = vld [vmem:[%s5581_s6] sm:$0xf] }
 0x295   :  { %2592 = vmatprep.subr.bf16.mxu0 %v4785_v3  ;;  %2678 = vmatprep.subr.bf16.mxu1 %v4788_v4  ;;  %v1251_v3 = vrot.slane %v1242_v2, %v5483_v15  ;;  %v1259_v4 = vrot.slane %v1242_v2, %v5491_v19 }
 0x298   :  { %2593 = vmatpush1.bf16.msra.mxu0 %v4783_v5  ;;  %2679 = vmatpush1.bf16.msra.mxu1 %v4786_v6  ;;  %v1255_v5 = vrot.slane %v1242_v2, %v5488_v17  ;;  %v1263_v6 = vrot.slane %v1242_v2, %v5494_v21  ;;  %v4899_v2 = vld [vmem:[#allocation10 + $0x2a4] ss:$16 sps:$4 sm:$0xff]  }
 0x299   :  { %2594 = vmatprep.subr.bf16.mxu0 %v4791_v7  ;;  %2680 = vmatprep.subr.bf16.mxu1 %v4794_v8 }
 0x29c   :  { %2595 = vmatpush1.bf16.msra.mxu0 %v4789_v9  ;;  %2681 = vmatpush1.bf16.msra.mxu1 %v4792_v10 }
 0x29d   :  { %2596 = vmatprep.subr.bf16.mxu0 %v4797_v11  ;;  %2682 = vmatprep.subr.bf16.mxu1 %v4800_v12 }
 0x2a0   :  { %2597 = vmatpush1.bf16.msra.mxu0 %v4795_v13  ;;  %2683 = vmatpush1.bf16.msra.mxu1 %v4798_v14 }
 0x2a1   :  { %2598 = vmatprep.subr.bf16.mxu0 %v4803_v16  ;;  %2684 = vmatprep.subr.bf16.mxu1 %v4806_v18 }
 0x2a4   :  { %2599 = vmatpush1.bf16.msra.mxu0 %v4801_v20  ;;  %2685 = vmatpush1.bf16.msra.mxu1 %v4804_v22 }
 0x2a5   :  { %2600 = vmatprep.subr.bf16.mxu0 %v4809_v23  ;;  %2686 = vmatprep.subr.bf16.mxu1 %v4812_v24 }
 0x2a8   :  { %2601 = vmatpush1.bf16.msra.mxu0 %v4807_v25  ;;  %2687 = vmatpush1.bf16.msra.mxu1 %v4810_v26 }
 0x2a9   :  { %2602 = vmatprep.subr.bf16.mxu0 %v4815_v27  ;;  %2688 = vmatprep.subr.bf16.mxu1 %v4818_v28 }
 0x2ac   :  { %2603 = vmatpush1.bf16.msra.mxu0 %v4813_v29  ;;  %2689 = vmatpush1.bf16.msra.mxu1 %v4816_v30 }
 0x2ad   :  { %2604 = vmatprep.subr.bf16.mxu0 %v4821_v31  ;;  %2690 = vmatprep.subr.bf16.mxu1 %v4824_v32 }
 0x2b0   :  { %2605 = vmatpush1.bf16.msra.mxu0 %v4819_v33  ;;  %2691 = vmatpush1.bf16.msra.mxu1 %v4822_v34 }
 0x2b1   :  { %2606 = vmatprep.subr.bf16.mxu0 %v4827_v35  ;;  %2692 = vmatprep.subr.bf16.mxu1 %v4830_v36 }
 0x2b4   :  { %2607 = vmatpush1.bf16.msra.mxu0 %v4825_v37  ;;  %2693 = vmatpush1.bf16.msra.mxu1 %v4828_v38 }
 0x2b5   :  { %2608 = vmatprep.subr.bf16.mxu0 %v4833_v39  ;;  %2694 = vmatprep.subr.bf16.mxu1 %v4836_v40 }
 0x2b8   :  { %2609 = vmatpush1.bf16.msra.mxu0 %v4831_v41  ;;  %2695 = vmatpush1.bf16.msra.mxu1 %v4834_v42 }
 0x2b9   :  { %2610 = vmatprep.subr.bf16.mxu0 %v4839_v43  ;;  %2696 = vmatprep.subr.bf16.mxu1 %v4842_v44 }
 0x2bc   :  { %2611 = vmatpush1.bf16.msra.mxu0 %v4837_v45  ;;  %2697 = vmatpush1.bf16.msra.mxu1 %v4840_v46 }
 0x2bd   :  { %2612 = vmatprep.subr.bf16.mxu0 %v4845_v47  ;;  %2698 = vmatprep.subr.bf16.mxu1 %v4848_v48  ;;  %v4867_v47 = vld [vmem:[#allocation10 + $0x200] ss:$16 sps:$4 sm:$0xff]   ;;  %v4870_v48 = vld [vmem:[#allocation10 + $0x208] ss:$16 sps:$4 sm:$0xff]  }
 0x2c0   :  { %2613 = vmatpush1.bf16.msra.mxu0 %v4843_v49  ;;  %2699 = vmatpush1.bf16.msra.mxu1 %v4846_v50  ;;  %v4875_v49 = vld [vmem:[#allocation10 + $0x224] ss:$16 sps:$4 sm:$0xff]   ;;  %v4878_v50 = vld [vmem:[#allocation10 + $0x22c] ss:$16 sps:$4 sm:$0xff]  }
 0x2c1   :  { %2614 = vmatprep.subr.bf16.mxu0 %v4851_v51  ;;  %2700 = vmatprep.subr.bf16.mxu1 %v4854_v52  ;;  %v4873_v51 = vld [vmem:[#allocation10 + $0x220] ss:$16 sps:$4 sm:$0xff]   ;;  %v4876_v52 = vld [vmem:[#allocation10 + $0x228] ss:$16 sps:$4 sm:$0xff]  }
 0x2c4   :  { %2615 = vmatpush1.bf16.msra.mxu0 %v4849_v53  ;;  %2701 = vmatpush1.bf16.msra.mxu1 %v4852_v54  ;;  %v4881_v53 = vld [vmem:[#allocation10 + $0x244] ss:$16 sps:$4 sm:$0xff]   ;;  %v4884_v54 = vld [vmem:[#allocation10 + $0x24c] ss:$16 sps:$4 sm:$0xff]  }
 0x2c5   :  { %2616 = vmatprep.subr.bf16.mxu0 %v4857_v55  ;;  %2702 = vmatprep.subr.bf16.mxu1 %v4860_v56  ;;  %v4879_v55 = vld [vmem:[#allocation10 + $0x240] ss:$16 sps:$4 sm:$0xff]   ;;  %v4882_v56 = vld [vmem:[#allocation10 + $0x248] ss:$16 sps:$4 sm:$0xff]  }
 0x2c8   :  { %2617 = vmatpush1.bf16.msra.mxu0 %v4855_v57  ;;  %2703 = vmatpush1.bf16.msra.mxu1 %v4858_v58  ;;  %v4887_v57 = vld [vmem:[#allocation10 + $0x264] ss:$16 sps:$4 sm:$0xff]   ;;  %v4890_v58 = vld [vmem:[#allocation10 + $0x26c] ss:$16 sps:$4 sm:$0xff]  }
 0x2c9   :  { %2618 = vmatprep.subr.bf16.mxu0 %v4863_v59  ;;  %2704 = vmatprep.subr.bf16.mxu1 %v4866_v60  ;;  %v4885_v59 = vld [vmem:[#allocation10 + $0x260] ss:$16 sps:$4 sm:$0xff]   ;;  %v4888_v60 = vld [vmem:[#allocation10 + $0x268] ss:$16 sps:$4 sm:$0xff]  }
 0x2cc   :  { %2619 = vmatpush1.bf16.msra.mxu0 %v4861_v61  ;;  %2705 = vmatpush1.bf16.msra.mxu1 %v4864_v62  ;;  %v4893_v61 = vld [vmem:[#allocation10 + $0x284] ss:$16 sps:$4 sm:$0xff]   ;;  %v4896_v62 = vld [vmem:[#allocation10 + $0x28c] ss:$16 sps:$4 sm:$0xff]  }
 0x2cd   :  { %2631 = vmatprep.subr.bf16.mxu0 %v4869_v63  ;;  %2717 = vmatprep.subr.bf16.mxu1 %v4872_v1  ;;  %v4891_v63 = vld [vmem:[#allocation10 + $0x280] ss:$16 sps:$4 sm:$0xff]   ;;  %v4894_v1 = vld [vmem:[#allocation10 + $0x288] ss:$16 sps:$4 sm:$0xff]  }
 0x362   :  { %v1848_v7 = vpop.f32.mrb[8].mxu0  ;;  %v1934_v8 = vpop.f32.mrb[8].mxu1 }
 0x363   :  { %v4387_v9 = vadd.f32 %v1848_v7, %v1251_v3  ;;  %v4391_v10 = vadd.f32 %v1934_v8, %v1259_v4  ;;  %v1850_v11 = vpop.f32.mrb[9].mxu0  ;;  %v1936_v12 = vpop.f32.mrb[9].mxu1  ;;  %v4908_v7 = vld [vmem:[#allocation10 + $0x2cc] ss:$16 sps:$4 sm:$0xff]   ;;  %v4903_v8 = vld [vmem:[#allocation10 + $0x2c0] ss:$16 sps:$4 sm:$0xff]  }
 0x364   :  { %v4388_v13 = vadd.f32 %v1850_v11, %v1255_v5  ;;  %v4392_v14 = vadd.f32 %v1936_v12, %v1263_v6  ;;  %v1852_v16 = vpop.f32.mrb[10].mxu0  ;;  %v1938_v18 = vpop.f32.mrb[10].mxu1  ;;  %v4914_v11 = vld [vmem:[#allocation10 + $0x2ec] ss:$16 sps:$4 sm:$0xff]   ;;  %v4909_v12 = vld [vmem:[#allocation10 + $0x2e0] ss:$16 sps:$4 sm:$0xff]  }
 0x365   :  { %v1943_v20 = vmul.f32 0.2, %v4387_v9  ;;  %v1945_v22 = vmul.f32 0.2, %v4391_v10  ;;  %v4389_v23 = vadd.f32 %v1852_v16, %v1251_v3  ;;  %v4393_v24 = vadd.f32 %v1938_v18, %v1259_v4  ;;  %v1854_v25 = vpop.f32.mrb[11].mxu0  ;;  %v1940_v26 = vpop.f32.mrb[11].mxu1 }
 0x366   :  { %v1944_v27 = vmul.f32 0.2, %v4388_v13  ;;  %v1946_v28 = vmul.f32 0.2, %v4392_v14  ;;  %v4390_v29 = vadd.f32 %v1854_v25, %v1255_v5  ;;  %v4394_v30 = vadd.f32 %v1940_v26, %v1263_v6  ;;  %v4902_v3 = vld [vmem:[#allocation10 + $0x2ac] ss:$16 sps:$4 sm:$0xff]  }
 0x367   :  { %v1947_v31 = vmul.f32 0.2, %v4389_v23  ;;  %v1949_v32 = vmul.f32 0.2, %v4393_v24  ;;  %v1951_v35 = vmax.f32 %v4387_v9, %v1943_v20  ;;  %v1953_v36 = vmax.f32 %v4391_v10, %v1945_v22  ;;  %v4897_v4 = vld [vmem:[#allocation10 + $0x2a0] ss:$16 sps:$4 sm:$0xff]  }
 0x368   :  { %v1948_v33 = vmul.f32 0.2, %v4390_v29  ;;  %v1950_v34 = vmul.f32 0.2, %v4394_v30  ;;  %v1952_v39 = vmax.f32 %v4388_v13, %v1944_v27  ;;  %v1954_v40 = vmax.f32 %v4392_v14, %v1946_v28  ;;  %v4900_v5 = vld [vmem:[#allocation10 + $0x2a8] ss:$16 sps:$4 sm:$0xff]  }
 0x369   :  { %v1955_v37 = vmax.f32 %v4389_v23, %v1947_v31  ;;  %v1957_v38 = vmax.f32 %v4393_v24, %v1949_v32  ;;  %v4905_v6 = vld [vmem:[#allocation10 + $0x2c4] ss:$16 sps:$4 sm:$0xff]   ;;  %v4906_v9 = vld [vmem:[#allocation10 + $0x2c8] ss:$16 sps:$4 sm:$0xff]   ;;  %v4920_v16 = vld [vmem:[#allocation10 + $0x30c] ss:$16 sps:$4 sm:$0xff]  }
 0x36a   :  { %v1956_v41 = vmax.f32 %v4390_v29, %v1948_v33  ;;  %v1958_v42 = vmax.f32 %v4394_v30, %v1950_v34  ;;  %v4911_v10 = vld [vmem:[#allocation10 + $0x2e4] ss:$16 sps:$4 sm:$0xff]   ;;  %v4912_v13 = vld [vmem:[#allocation10 + $0x2e8] ss:$16 sps:$4 sm:$0xff]   ;;  %v4915_v18 = vld [vmem:[#allocation10 + $0x300] ss:$16 sps:$4 sm:$0xff]  }
 0x36b   :  { %v2060_v43 = vpack.c.bf16 %v1955_v37, %v1951_v35  ;;  %v5524_v44 = vpack.c.bf16 %v1957_v38, %v1953_v36  ;;  %v4917_v14 = vld [vmem:[#allocation10 + $0x304] ss:$16 sps:$4 sm:$0xff]   ;;  %v4918_v20 = vld [vmem:[#allocation10 + $0x308] ss:$16 sps:$4 sm:$0xff]   ;;  %v4926_v23 = vld [vmem:[#allocation11 + $0xc] ss:$16 sps:$4 sm:$0xff]  }
 0x36c   :  { %v2063_v45 = vpack.c.bf16 %v1958_v42, %v1954_v40  ;;  %v2061_v46 = vpack.c.bf16 %v1956_v41, %v1952_v39  ;;  %v4923_v22 = vld [vmem:[#allocation11 + $0x4] ss:$16 sps:$4 sm:$0xff]   ;;  %v4921_v24 = vld [vmem:[#allocation11] ss:$16 sps:$4 sm:$0xff]   ;;  %v4924_v25 = vld [vmem:[#allocation11 + $0x8] ss:$16 sps:$4 sm:$0xff]  }
 0x36d   :  { %v4929_v26 = vld [vmem:[#allocation11 + $0x24] ss:$16 sps:$4 sm:$0xff]   ;;  %v4932_v27 = vld [vmem:[#allocation11 + $0x2c] ss:$16 sps:$4 sm:$0xff]   ;;  %v4927_v28 = vld [vmem:[#allocation11 + $0x20] ss:$16 sps:$4 sm:$0xff]  }
 0x36e   :  { %2620 = vmatprep.mubr.bf16.mxu0 %v2061_v46  ;;  %2706 = vmatprep.mubr.bf16.mxu1 %v2061_v46  ;;  %v4930_v29 = vld [vmem:[#allocation11 + $0x28] ss:$16 sps:$4 sm:$0xff]   ;;  %v4935_v30 = vld [vmem:[#allocation11 + $0x44] ss:$16 sps:$4 sm:$0xff]   ;;  %v4938_v31 = vld [vmem:[#allocation11 + $0x4c] ss:$16 sps:$4 sm:$0xff]  }
 0x36f   :  { %2621 = vmatmul.mubr.bf16.vlgmr.msra.gmra.mrb[12].mxu0 %v2060_v43  ;;  %2707 = vmatmul.mubr.bf16.vlgmr.msra.gmra.mrb[12].mxu1 %v2060_v43  ;;  %v4933_v32 = vld [vmem:[#allocation11 + $0x40] ss:$16 sps:$4 sm:$0xff]   ;;  %v4936_v33 = vld [vmem:[#allocation11 + $0x48] ss:$16 sps:$4 sm:$0xff]   ;;  %v4941_v34 = vld [vmem:[#allocation11 + $0x64] ss:$16 sps:$4 sm:$0xff]  }
 0x370   :  { %2632 = vmatpush1.bf16.msra.mxu0 %v4867_v47  ;;  %2718 = vmatpush1.bf16.msra.mxu1 %v4870_v48  ;;  %v4944_v35 = vld [vmem:[#allocation11 + $0x6c] ss:$16 sps:$4 sm:$0xff]   ;;  %v4939_v36 = vld [vmem:[#allocation11 + $0x60] ss:$16 sps:$4 sm:$0xff]   ;;  %v4942_v37 = vld [vmem:[#allocation11 + $0x68] ss:$16 sps:$4 sm:$0xff]  }
 0x371   :  { %4226 = vmatprep.mubr.msk.bf16.mxu0 %vm950_vm1, %v2063_v45  ;;  %4227 = vmatprep.mubr.msk.bf16.mxu1 %vm950_vm1, %v2063_v45  ;;  %v4947_v38 = vld [vmem:[#allocation11 + $0x84] ss:$16 sps:$4 sm:$0xff]   ;;  %v4950_v39 = vld [vmem:[#allocation11 + $0x8c] ss:$16 sps:$4 sm:$0xff]   ;;  %v4945_v40 = vld [vmem:[#allocation11 + $0x80] ss:$16 sps:$4 sm:$0xff]  }
 0x372   :  { %2633 = vmatprep.subr.bf16.mxu0 %v4875_v49  ;;  %2719 = vmatprep.subr.bf16.mxu1 %v4878_v50  ;;  %v4948_v41 = vld [vmem:[#allocation11 + $0x88] ss:$16 sps:$4 sm:$0xff]   ;;  %v4953_v42 = vld [vmem:[#allocation11 + $0xa4] ss:$16 sps:$4 sm:$0xff]   ;;  %v4956_v43 = vld [vmem:[#allocation11 + $0xac] ss:$16 sps:$4 sm:$0xff]  }
 0x373   :  { %v4954_v45 = vld [vmem:[#allocation11 + $0xa8] ss:$16 sps:$4 sm:$0xff]   ;;  %v4959_v46 = vld [vmem:[#allocation11 + $0xc4] ss:$16 sps:$4 sm:$0xff]   ;;  %v4962_v47 = vld [vmem:[#allocation11 + $0xcc] ss:$16 sps:$4 sm:$0xff]  }
 0x374   :  { %2634 = vmatpush1.bf16.msra.mxu0 %v4873_v51  ;;  %2720 = vmatpush1.bf16.msra.mxu1 %v4876_v52  ;;  %v4957_v48 = vld [vmem:[#allocation11 + $0xc0] ss:$16 sps:$4 sm:$0xff]   ;;  %v4960_v49 = vld [vmem:[#allocation11 + $0xc8] ss:$16 sps:$4 sm:$0xff]   ;;  %v4965_v50 = vld [vmem:[#allocation11 + $0xe4] ss:$16 sps:$4 sm:$0xff]  }
 0x375   :  { %2635 = vmatprep.subr.bf16.mxu0 %v4881_v53  ;;  %2721 = vmatprep.subr.bf16.mxu1 %v4884_v54  ;;  %v4968_v51 = vld [vmem:[#allocation11 + $0xec] ss:$16 sps:$4 sm:$0xff]   ;;  %v4963_v52 = vld [vmem:[#allocation11 + $0xe0] ss:$16 sps:$4 sm:$0xff]   ;;  %v4966_v53 = vld [vmem:[#allocation11 + $0xe8] ss:$16 sps:$4 sm:$0xff]  }
 0x376   :  { %v4971_v54 = vld [vmem:[#allocation11 + $0x104] ss:$16 sps:$4 sm:$0xff]  }
 0x378   :  { %2636 = vmatpush1.bf16.msra.mxu0 %v4879_v55  ;;  %2722 = vmatpush1.bf16.msra.mxu1 %v4882_v56  ;;  %v4974_v55 = vld [vmem:[#allocation11 + $0x10c] ss:$16 sps:$4 sm:$0xff]   ;;  %v4969_v56 = vld [vmem:[#allocation11 + $0x100] ss:$16 sps:$4 sm:$0xff]  }
 0x379   :  { %2637 = vmatprep.subr.bf16.mxu0 %v4887_v57  ;;  %2723 = vmatprep.subr.bf16.mxu1 %v4890_v58  ;;  %v4972_v57 = vld [vmem:[#allocation11 + $0x108] ss:$16 sps:$4 sm:$0xff]   ;;  %v4977_v58 = vld [vmem:[#allocation11 + $0x124] ss:$16 sps:$4 sm:$0xff]  }
 0x37c   :  { %2638 = vmatpush1.bf16.msra.mxu0 %v4885_v59  ;;  %2724 = vmatpush1.bf16.msra.mxu1 %v4888_v60  ;;  %v4980_v59 = vld [vmem:[#allocation11 + $0x12c] ss:$16 sps:$4 sm:$0xff]   ;;  %v4975_v60 = vld [vmem:[#allocation11 + $0x120] ss:$16 sps:$4 sm:$0xff]  }
 0x37d   :  { %2639 = vmatprep.subr.bf16.mxu0 %v4893_v61  ;;  %2725 = vmatprep.subr.bf16.mxu1 %v4896_v62  ;;  %v4978_v61 = vld [vmem:[#allocation11 + $0x128] ss:$16 sps:$4 sm:$0xff]   ;;  %v4983_v62 = vld [vmem:[#allocation11 + $0x144] ss:$16 sps:$4 sm:$0xff]  }
 0x380   :  { %2640 = vmatpush1.bf16.msra.mxu0 %v4891_v63  ;;  %2726 = vmatpush1.bf16.msra.mxu1 %v4894_v1  ;;  %v4986_v63 = vld [vmem:[#allocation11 + $0x14c] ss:$16 sps:$4 sm:$0xff]   ;;  %v4981_v1 = vld [vmem:[#allocation11 + $0x140] ss:$16 sps:$4 sm:$0xff]  }
 0x381   :  { %2641 = vmatprep.subr.bf16.mxu0 %v4899_v2  ;;  %2727 = vmatprep.subr.bf16.mxu1 %v4902_v3  ;;  %v4984_v2 = vld [vmem:[#allocation11 + $0x148] ss:$16 sps:$4 sm:$0xff]   ;;  %v4989_v3 = vld [vmem:[#allocation11 + $0x164] ss:$16 sps:$4 sm:$0xff]  }
 0x384   :  { %2642 = vmatpush1.bf16.msra.mxu0 %v4897_v4  ;;  %2728 = vmatpush1.bf16.msra.mxu1 %v4900_v5  ;;  %v4992_v4 = vld [vmem:[#allocation11 + $0x16c] ss:$16 sps:$4 sm:$0xff]   ;;  %v4987_v5 = vld [vmem:[#allocation11 + $0x160] ss:$16 sps:$4 sm:$0xff]  }
 0x385   :  { %2643 = vmatprep.subr.bf16.mxu0 %v4905_v6  ;;  %2729 = vmatprep.subr.bf16.mxu1 %v4908_v7  ;;  %v4990_v6 = vld [vmem:[#allocation11 + $0x168] ss:$16 sps:$4 sm:$0xff]   ;;  %v4995_v7 = vld [vmem:[#allocation11 + $0x184] ss:$16 sps:$4 sm:$0xff]  }
 0x388   :  { %2644 = vmatpush1.bf16.msra.mxu0 %v4903_v8  ;;  %2730 = vmatpush1.bf16.msra.mxu1 %v4906_v9  ;;  %v4998_v8 = vld [vmem:[#allocation11 + $0x18c] ss:$16 sps:$4 sm:$0xff]   ;;  %v4993_v9 = vld [vmem:[#allocation11 + $0x180] ss:$16 sps:$4 sm:$0xff]  }
 0x389   :  { %2645 = vmatprep.subr.bf16.mxu0 %v4911_v10  ;;  %2731 = vmatprep.subr.bf16.mxu1 %v4914_v11  ;;  %v4996_v10 = vld [vmem:[#allocation11 + $0x188] ss:$16 sps:$4 sm:$0xff]   ;;  %v5001_v11 = vld [vmem:[#allocation11 + $0x1a4] ss:$16 sps:$4 sm:$0xff]  }
 0x38c   :  { %2646 = vmatpush1.bf16.msra.mxu0 %v4909_v12  ;;  %2732 = vmatpush1.bf16.msra.mxu1 %v4912_v13  ;;  %v5004_v12 = vld [vmem:[#allocation11 + $0x1ac] ss:$16 sps:$4 sm:$0xff]   ;;  %v4999_v13 = vld [vmem:[#allocation11 + $0x1a0] ss:$16 sps:$4 sm:$0xff]  }
 0x38d   :  { %2647 = vmatprep.subr.bf16.mxu0 %v4917_v14  ;;  %2733 = vmatprep.subr.bf16.mxu1 %v4920_v16  ;;  %v5002_v14 = vld [vmem:[#allocation11 + $0x1a8] ss:$16 sps:$4 sm:$0xff]   ;;  %v5007_v16 = vld [vmem:[#allocation11 + $0x1c4] ss:$16 sps:$4 sm:$0xff]  }
 0x390   :  { %2648 = vmatpush1.bf16.msra.mxu0 %v4915_v18  ;;  %2734 = vmatpush1.bf16.msra.mxu1 %v4918_v20  ;;  %v5010_v18 = vld [vmem:[#allocation11 + $0x1cc] ss:$16 sps:$4 sm:$0xff]   ;;  %v5005_v20 = vld [vmem:[#allocation11 + $0x1c0] ss:$16 sps:$4 sm:$0xff]  }
 0x391   :  { %3405 = vmatprep.subr.bf16.mxu0 %v4923_v22  ;;  %3491 = vmatprep.subr.bf16.mxu1 %v4926_v23  ;;  %v5008_v22 = vld [vmem:[#allocation11 + $0x1c8] ss:$16 sps:$4 sm:$0xff]   ;;  %v5013_v23 = vld [vmem:[#allocation11 + $0x1e4] ss:$16 sps:$4 sm:$0xff]  }
 0x393   :  { %2664 = vmatmul.mubr.bf16.vlgmr.msra.gmra.mrb[12].mxu0 %v5524_v44  ;;  %2750 = vmatmul.mubr.bf16.vlgmr.msra.gmra.mrb[12].mxu1 %v5524_v44  ;;  %v4951_v44 = vld [vmem:[#allocation11 + $0xa0] ss:$16 sps:$4 sm:$0xff]  }
 0x394   :  { %3406 = vmatpush1.bf16.msra.mxu0 %v4921_v24  ;;  %3492 = vmatpush1.bf16.msra.mxu1 %v4924_v25  ;;  %v5016_v24 = vld [vmem:[#allocation11 + $0x1ec] ss:$16 sps:$4 sm:$0xff]   ;;  %v5011_v25 = vld [vmem:[#allocation11 + $0x1e0] ss:$16 sps:$4 sm:$0xff]  }
 0x395   :  { %3407 = vmatprep.subr.bf16.mxu0 %v4929_v26  ;;  %3493 = vmatprep.subr.bf16.mxu1 %v4932_v27  ;;  %v5014_v26 = vld [vmem:[#allocation11 + $0x1e8] ss:$16 sps:$4 sm:$0xff]   ;;  %v5019_v27 = vld [vmem:[#allocation11 + $0x204] ss:$16 sps:$4 sm:$0xff]  }
 0x398   :  { %3408 = vmatpush1.bf16.msra.mxu0 %v4927_v28  ;;  %3494 = vmatpush1.bf16.msra.mxu1 %v4930_v29  ;;  %v5022_v28 = vld [vmem:[#allocation11 + $0x20c] ss:$16 sps:$4 sm:$0xff]   ;;  %v2059_v29 = vld [vmem:[%s5583_s8] sm:$0xf] }
 0x399   :  { %3409 = vmatprep.subr.bf16.mxu0 %v4935_v30  ;;  %3495 = vmatprep.subr.bf16.mxu1 %v4938_v31  ;;  %v2068_v30 = vrot.slane %v2059_v29, %v5483_v15  ;;  %v2076_v31 = vrot.slane %v2059_v29, %v5491_v19 }
 0x39c   :  { %3410 = vmatpush1.bf16.msra.mxu0 %v4933_v32  ;;  %3496 = vmatpush1.bf16.msra.mxu1 %v4936_v33  ;;  %v2072_v32 = vrot.slane %v2059_v29, %v5488_v17  ;;  %v2080_v33 = vrot.slane %v2059_v29, %v5494_v21  ;;  %v5049_v29 = vld [vmem:[#allocation11 + $0x2a4] ss:$16 sps:$4 sm:$0xff]  }
 0x39d   :  { %3411 = vmatprep.subr.bf16.mxu0 %v4941_v34  ;;  %3497 = vmatprep.subr.bf16.mxu1 %v4944_v35 }
 0x3a0   :  { %3412 = vmatpush1.bf16.msra.mxu0 %v4939_v36  ;;  %3498 = vmatpush1.bf16.msra.mxu1 %v4942_v37 }
 0x3a1   :  { %3413 = vmatprep.subr.bf16.mxu0 %v4947_v38  ;;  %3499 = vmatprep.subr.bf16.mxu1 %v4950_v39 }
 0x3a4   :  { %3414 = vmatpush1.bf16.msra.mxu0 %v4945_v40  ;;  %3500 = vmatpush1.bf16.msra.mxu1 %v4948_v41 }
 0x3a5   :  { %3415 = vmatprep.subr.bf16.mxu0 %v4953_v42  ;;  %3501 = vmatprep.subr.bf16.mxu1 %v4956_v43 }
 0x3a8   :  { %3416 = vmatpush1.bf16.msra.mxu0 %v4951_v44  ;;  %3502 = vmatpush1.bf16.msra.mxu1 %v4954_v45 }
 0x3a9   :  { %3417 = vmatprep.subr.bf16.mxu0 %v4959_v46  ;;  %3503 = vmatprep.subr.bf16.mxu1 %v4962_v47 }
 0x3ac   :  { %3418 = vmatpush1.bf16.msra.mxu0 %v4957_v48  ;;  %3504 = vmatpush1.bf16.msra.mxu1 %v4960_v49 }
 0x3ad   :  { %3419 = vmatprep.subr.bf16.mxu0 %v4965_v50  ;;  %3505 = vmatprep.subr.bf16.mxu1 %v4968_v51 }
 0x3b0   :  { %3420 = vmatpush1.bf16.msra.mxu0 %v4963_v52  ;;  %3506 = vmatpush1.bf16.msra.mxu1 %v4966_v53 }
 0x3b1   :  { %3421 = vmatprep.subr.bf16.mxu0 %v4971_v54  ;;  %3507 = vmatprep.subr.bf16.mxu1 %v4974_v55 }
 0x3b4   :  { %3422 = vmatpush1.bf16.msra.mxu0 %v4969_v56  ;;  %3508 = vmatpush1.bf16.msra.mxu1 %v4972_v57 }
 0x3b5   :  { %3423 = vmatprep.subr.bf16.mxu0 %v4977_v58  ;;  %3509 = vmatprep.subr.bf16.mxu1 %v4980_v59 }
 0x3b8   :  { %3424 = vmatpush1.bf16.msra.mxu0 %v4975_v60  ;;  %3510 = vmatpush1.bf16.msra.mxu1 %v4978_v61 }
 0x3b9   :  { %3425 = vmatprep.subr.bf16.mxu0 %v4983_v62  ;;  %3511 = vmatprep.subr.bf16.mxu1 %v4986_v63 }
 0x3bc   :  { %3426 = vmatpush1.bf16.msra.mxu0 %v4981_v1  ;;  %3512 = vmatpush1.bf16.msra.mxu1 %v4984_v2 }
 0x3bd   :  { %3427 = vmatprep.subr.bf16.mxu0 %v4989_v3  ;;  %3513 = vmatprep.subr.bf16.mxu1 %v4992_v4 }
 0x3c0   :  { %3428 = vmatpush1.bf16.msra.mxu0 %v4987_v5  ;;  %3514 = vmatpush1.bf16.msra.mxu1 %v4990_v6 }
 0x3c1   :  { %3429 = vmatprep.subr.bf16.mxu0 %v4995_v7  ;;  %3515 = vmatprep.subr.bf16.mxu1 %v4998_v8  ;;  %v5017_v7 = vld [vmem:[#allocation11 + $0x200] ss:$16 sps:$4 sm:$0xff]   ;;  %v5020_v8 = vld [vmem:[#allocation11 + $0x208] ss:$16 sps:$4 sm:$0xff]  }
 0x3c4   :  { %3430 = vmatpush1.bf16.msra.mxu0 %v4993_v9  ;;  %3516 = vmatpush1.bf16.msra.mxu1 %v4996_v10  ;;  %v5025_v9 = vld [vmem:[#allocation11 + $0x224] ss:$16 sps:$4 sm:$0xff]   ;;  %v5028_v10 = vld [vmem:[#allocation11 + $0x22c] ss:$16 sps:$4 sm:$0xff]  }
 0x3c5   :  { %3431 = vmatprep.subr.bf16.mxu0 %v5001_v11  ;;  %3517 = vmatprep.subr.bf16.mxu1 %v5004_v12  ;;  %v5023_v11 = vld [vmem:[#allocation11 + $0x220] ss:$16 sps:$4 sm:$0xff]   ;;  %v5026_v12 = vld [vmem:[#allocation11 + $0x228] ss:$16 sps:$4 sm:$0xff]  }
 0x3c8   :  { %3432 = vmatpush1.bf16.msra.mxu0 %v4999_v13  ;;  %3518 = vmatpush1.bf16.msra.mxu1 %v5002_v14  ;;  %v5031_v13 = vld [vmem:[#allocation11 + $0x244] ss:$16 sps:$4 sm:$0xff]   ;;  %v5034_v14 = vld [vmem:[#allocation11 + $0x24c] ss:$16 sps:$4 sm:$0xff]  }
 0x3c9   :  { %3433 = vmatprep.subr.bf16.mxu0 %v5007_v16  ;;  %3519 = vmatprep.subr.bf16.mxu1 %v5010_v18  ;;  %v5029_v16 = vld [vmem:[#allocation11 + $0x240] ss:$16 sps:$4 sm:$0xff]   ;;  %v5032_v18 = vld [vmem:[#allocation11 + $0x248] ss:$16 sps:$4 sm:$0xff]  }
 0x3cc   :  { %3434 = vmatpush1.bf16.msra.mxu0 %v5005_v20  ;;  %3520 = vmatpush1.bf16.msra.mxu1 %v5008_v22  ;;  %v5037_v20 = vld [vmem:[#allocation11 + $0x264] ss:$16 sps:$4 sm:$0xff]   ;;  %v5040_v22 = vld [vmem:[#allocation11 + $0x26c] ss:$16 sps:$4 sm:$0xff]  }
 0x3cd   :  { %3435 = vmatprep.subr.bf16.mxu0 %v5013_v23  ;;  %3521 = vmatprep.subr.bf16.mxu1 %v5016_v24  ;;  %v5035_v23 = vld [vmem:[#allocation11 + $0x260] ss:$16 sps:$4 sm:$0xff]   ;;  %v5038_v24 = vld [vmem:[#allocation11 + $0x268] ss:$16 sps:$4 sm:$0xff]  }
 0x3d0   :  { %3436 = vmatpush1.bf16.msra.mxu0 %v5011_v25  ;;  %3522 = vmatpush1.bf16.msra.mxu1 %v5014_v26  ;;  %v5043_v25 = vld [vmem:[#allocation11 + $0x284] ss:$16 sps:$4 sm:$0xff]   ;;  %v5046_v26 = vld [vmem:[#allocation11 + $0x28c] ss:$16 sps:$4 sm:$0xff]  }
 0x3d1   :  { %3448 = vmatprep.subr.bf16.mxu0 %v5019_v27  ;;  %3534 = vmatprep.subr.bf16.mxu1 %v5022_v28  ;;  %v5041_v27 = vld [vmem:[#allocation11 + $0x280] ss:$16 sps:$4 sm:$0xff]   ;;  %v5044_v28 = vld [vmem:[#allocation11 + $0x288] ss:$16 sps:$4 sm:$0xff]  }
 0x466   :  { %v2665_v34 = vpop.f32.mrb[12].mxu0  ;;  %v2751_v35 = vpop.f32.mrb[12].mxu1 }
 0x467   :  { %v4395_v36 = vadd.f32 %v2665_v34, %v2068_v30  ;;  %v4399_v37 = vadd.f32 %v2751_v35, %v2076_v31  ;;  %v2667_v38 = vpop.f32.mrb[13].mxu0  ;;  %v2753_v39 = vpop.f32.mrb[13].mxu1  ;;  %v5058_v34 = vld [vmem:[#allocation11 + $0x2cc] ss:$16 sps:$4 sm:$0xff]   ;;  %v5053_v35 = vld [vmem:[#allocation11 + $0x2c0] ss:$16 sps:$4 sm:$0xff]  }
 0x468   :  { %v4396_v40 = vadd.f32 %v2667_v38, %v2072_v32  ;;  %v4400_v41 = vadd.f32 %v2753_v39, %v2080_v33  ;;  %v2669_v42 = vpop.f32.mrb[14].mxu0  ;;  %v2755_v43 = vpop.f32.mrb[14].mxu1  ;;  %v5064_v38 = vld [vmem:[#allocation11 + $0x2ec] ss:$16 sps:$4 sm:$0xff]   ;;  %v5059_v39 = vld [vmem:[#allocation11 + $0x2e0] ss:$16 sps:$4 sm:$0xff]  }
 0x469   :  { %v2760_v44 = vmul.f32 0.2, %v4395_v36  ;;  %v2762_v45 = vmul.f32 0.2, %v4399_v37  ;;  %v4397_v46 = vadd.f32 %v2669_v42, %v2068_v30  ;;  %v4401_v47 = vadd.f32 %v2755_v43, %v2076_v31  ;;  %v2671_v48 = vpop.f32.mrb[15].mxu0  ;;  %v2757_v49 = vpop.f32.mrb[15].mxu1 }
 0x46a   :  { %v2761_v50 = vmul.f32 0.2, %v4396_v40  ;;  %v2763_v51 = vmul.f32 0.2, %v4400_v41  ;;  %v4398_v52 = vadd.f32 %v2671_v48, %v2072_v32  ;;  %v4402_v53 = vadd.f32 %v2757_v49, %v2080_v33  ;;  %v5052_v30 = vld [vmem:[#allocation11 + $0x2ac] ss:$16 sps:$4 sm:$0xff]  }
 0x46b   :  { %v2764_v54 = vmul.f32 0.2, %v4397_v46  ;;  %v2766_v55 = vmul.f32 0.2, %v4401_v47  ;;  %v2768_v58 = vmax.f32 %v4395_v36, %v2760_v44  ;;  %v2770_v59 = vmax.f32 %v4399_v37, %v2762_v45  ;;  %v5047_v31 = vld [vmem:[#allocation11 + $0x2a0] ss:$16 sps:$4 sm:$0xff]  }
 0x46c   :  { %v2765_v56 = vmul.f32 0.2, %v4398_v52  ;;  %v2767_v57 = vmul.f32 0.2, %v4402_v53  ;;  %v2769_v62 = vmax.f32 %v4396_v40, %v2761_v50  ;;  %v2771_v63 = vmax.f32 %v4400_v41, %v2763_v51  ;;  %v5050_v32 = vld [vmem:[#allocation11 + $0x2a8] ss:$16 sps:$4 sm:$0xff]  }
 0x46d   :  { %v2772_v60 = vmax.f32 %v4397_v46, %v2764_v54  ;;  %v2774_v61 = vmax.f32 %v4401_v47, %v2766_v55  ;;  %v5055_v33 = vld [vmem:[#allocation11 + $0x2c4] ss:$16 sps:$4 sm:$0xff]   ;;  %v5056_v36 = vld [vmem:[#allocation11 + $0x2c8] ss:$16 sps:$4 sm:$0xff]   ;;  %v5070_v42 = vld [vmem:[#allocation11 + $0x30c] ss:$16 sps:$4 sm:$0xff]  }
 0x46e   :  { %v2773_v1 = vmax.f32 %v4398_v52, %v2765_v56  ;;  %v2775_v2 = vmax.f32 %v4402_v53, %v2767_v57  ;;  %v5061_v37 = vld [vmem:[#allocation11 + $0x2e4] ss:$16 sps:$4 sm:$0xff]   ;;  %v5062_v40 = vld [vmem:[#allocation11 + $0x2e8] ss:$16 sps:$4 sm:$0xff]   ;;  %v5065_v43 = vld [vmem:[#allocation11 + $0x300] ss:$16 sps:$4 sm:$0xff]  }
 0x46f   :  { %v2877_v3 = vpack.c.bf16 %v2772_v60, %v2768_v58  ;;  %v5537_v4 = vpack.c.bf16 %v2774_v61, %v2770_v59  ;;  %v5067_v41 = vld [vmem:[#allocation11 + $0x304] ss:$16 sps:$4 sm:$0xff]   ;;  %v5068_v44 = vld [vmem:[#allocation11 + $0x308] ss:$16 sps:$4 sm:$0xff]  }
 0x470   :  { %v2880_v5 = vpack.c.bf16 %v2775_v2, %v2771_v63  ;;  %v2878_v6 = vpack.c.bf16 %v2773_v1, %v2769_v62  ;;  %v5072_v45 = vld [vmem:[#allocation13 + $0x40] sm:$0xff]   ;;  %v5075_v48 = vld [vmem:[#allocation13 + $0x48] sm:$0xff]   ;;  %v5078_v51 = vld [vmem:[#allocation13 + $0x50] sm:$0xff]  }
 0x471   :  { %v5071_v46 = vld [vmem:[#allocation13 + $0x80] sm:$0xff]   ;;  %v5074_v49 = vld [vmem:[#allocation13 + $0x88] sm:$0xff]   ;;  %v5077_v52 = vld [vmem:[#allocation13 + $0x90] sm:$0xff]  }
 0x472   :  { %3437 = vmatprep.mubr.bf16.mxu0 %v2878_v6  ;;  %3523 = vmatprep.mubr.bf16.mxu1 %v2878_v6  ;;  %v5073_v47 = vld [vmem:[#allocation13] sm:$0xff]   ;;  %v5076_v50 = vld [vmem:[#allocation13 + $0x8] sm:$0xff]   ;;  %v5079_v53 = vld [vmem:[#allocation13 + $0x10] sm:$0xff]  }
 0x473   :  { %3438 = vmatmul.mubr.bf16.vlgmr.msra.gmra.mrb[16].mxu0 %v2877_v3  ;;  %3524 = vmatmul.mubr.bf16.vlgmr.msra.gmra.mrb[16].mxu1 %v2877_v3  ;;  %v5081_v54 = vld [vmem:[#allocation13 + $0x58] sm:$0xff]   ;;  %v5084_v57 = vld [vmem:[#allocation13 + $0x60] sm:$0xff]   ;;  %v5086_v60 = vld [vmem:[#allocation13 + $0xa8] sm:$0xff]  }
 0x474   :  { %3449 = vmatpush1.bf16.msra.mxu0 %v5017_v7  ;;  %3535 = vmatpush1.bf16.msra.mxu1 %v5020_v8  ;;  %v5080_v55 = vld [vmem:[#allocation13 + $0x98] sm:$0xff]   ;;  %v5083_v58 = vld [vmem:[#allocation13 + $0xa0] sm:$0xff]   ;;  %v5087_v61 = vld [vmem:[#allocation13 + $0x68] sm:$0xff]  }
 0x475   :  { %4328 = vmatprep.mubr.msk.bf16.mxu0 %vm950_vm1, %v2880_v5  ;;  %4329 = vmatprep.mubr.msk.bf16.mxu1 %vm950_vm1, %v2880_v5  ;;  %v5082_v56 = vld [vmem:[#allocation13 + $0x18] sm:$0xff]   ;;  %v5085_v59 = vld [vmem:[#allocation13 + $0x20] sm:$0xff]   ;;  %v5088_v62 = vld [vmem:[#allocation13 + $0x28] sm:$0xff]  }
 0x476   :  { %3450 = vmatprep.subr.bf16.mxu0 %v5025_v9  ;;  %3536 = vmatprep.subr.bf16.mxu1 %v5028_v10  ;;  %v5089_v63 = vld [vmem:[#allocation13 + $0xb0] sm:$0xff]   ;;  %v5092_v3 = vld [vmem:[#allocation13 + $0xb8] sm:$0xff]   ;;  %v5095_v6 = vld [vmem:[#allocation13 + $0xc0] sm:$0xff]  }
 0x477   :  { %v5090_v1 = vld [vmem:[#allocation13 + $0x70] sm:$0xff]   ;;  %v5094_v5 = vld [vmem:[#allocation13 + $0x38] sm:$0xff]  }
 0x478   :  { %3451 = vmatpush1.bf16.msra.mxu0 %v5023_v11  ;;  %3537 = vmatpush1.bf16.msra.mxu1 %v5026_v12  ;;  %v5091_v2 = vld [vmem:[#allocation13 + $0x30] sm:$0xff]   ;;  %v2876_v7 = vld [vmem:[%s5585_s10] sm:$0xf] }
 0x479   :  { %3452 = vmatprep.subr.bf16.mxu0 %v5031_v13  ;;  %3538 = vmatprep.subr.bf16.mxu1 %v5034_v14  ;;  %v2885_v8 = vrot.slane %v2876_v7, %v5483_v15  ;;  %v2893_v9 = vrot.slane %v2876_v7, %v5491_v19  ;;  %v2889_v10 = vrot.slane %v2876_v7, %v5488_v17 }
 0x47a   :  { %v2897_v11 = vrot.slane %v2876_v7, %v5494_v21 }
 0x47c   :  { %3453 = vmatpush1.bf16.msra.mxu0 %v5029_v16  ;;  %3539 = vmatpush1.bf16.msra.mxu1 %v5032_v18 }
 0x47d   :  { %3454 = vmatprep.subr.bf16.mxu0 %v5037_v20  ;;  %3540 = vmatprep.subr.bf16.mxu1 %v5040_v22 }
 0x480   :  { %3455 = vmatpush1.bf16.msra.mxu0 %v5035_v23  ;;  %3541 = vmatpush1.bf16.msra.mxu1 %v5038_v24 }
 0x481   :  { %3456 = vmatprep.subr.bf16.mxu0 %v5043_v25  ;;  %3542 = vmatprep.subr.bf16.mxu1 %v5046_v26 }
 0x484   :  { %3457 = vmatpush1.bf16.msra.mxu0 %v5041_v27  ;;  %3543 = vmatpush1.bf16.msra.mxu1 %v5044_v28 }
 0x485   :  { %3458 = vmatprep.subr.bf16.mxu0 %v5049_v29  ;;  %3544 = vmatprep.subr.bf16.mxu1 %v5052_v30 }
 0x488   :  { %3459 = vmatpush1.bf16.msra.mxu0 %v5047_v31  ;;  %3545 = vmatpush1.bf16.msra.mxu1 %v5050_v32 }
 0x489   :  { %3460 = vmatprep.subr.bf16.mxu0 %v5055_v33  ;;  %3546 = vmatprep.subr.bf16.mxu1 %v5058_v34 }
 0x48c   :  { %3461 = vmatpush1.bf16.msra.mxu0 %v5053_v35  ;;  %3547 = vmatpush1.bf16.msra.mxu1 %v5056_v36 }
 0x48d   :  { %3462 = vmatprep.subr.bf16.mxu0 %v5061_v37  ;;  %3548 = vmatprep.subr.bf16.mxu1 %v5064_v38 }
 0x490   :  { %3463 = vmatpush1.bf16.msra.mxu0 %v5059_v39  ;;  %3549 = vmatpush1.bf16.msra.mxu1 %v5062_v40 }
 0x491   :  { %3464 = vmatprep.subr.bf16.mxu0 %v5067_v41  ;;  %3550 = vmatprep.subr.bf16.mxu1 %v5070_v42 }
 0x494   :  { %3465 = vmatpush1.bf16.msra.mxu0 %v5065_v43  ;;  %3551 = vmatpush1.bf16.msra.mxu1 %v5068_v44 }
 0x495   :  { %3848 = vmatprep.subr.bf16.mxu1 %v5293_v0  ;;  %4357 = vmatprep.subr.bf16.mxu0 %v5072_v45 }
 0x497   :  { %3481 = vmatmul.mubr.bf16.vlgmr.msra.gmra.mrb[16].mxu0 %v5537_v4  ;;  %3567 = vmatmul.mubr.bf16.vlgmr.msra.gmra.mrb[16].mxu1 %v5537_v4  ;;  %v5093_v4 = vld [vmem:[#allocation13 + $0x78] sm:$0xff]  }
 0x498   :  { %3849 = vmatpush1.bf16.msra.mxu1 %v5071_v46  ;;  %4358 = vmatpush3.bf16.msra.mxu0 %v5073_v47 }
 0x499   :  { %3850 = vmatprep.subr.bf16.mxu1 %v5293_v0  ;;  %4359 = vmatprep.subr.bf16.mxu0 %v5075_v48 }
 0x49c   :  { %3851 = vmatpush1.bf16.msra.mxu1 %v5074_v49  ;;  %4360 = vmatpush3.bf16.msra.mxu0 %v5076_v50  ;;  %v4330_v49 = vld [vmem:[%s5587_s12] ss:$0 sm:$0xff] }
 0x49d   :  { %3852 = vmatprep.subr.bf16.mxu1 %v5293_v0  ;;  %4361 = vmatprep.subr.bf16.mxu0 %v5078_v51 }
 0x4a0   :  { %3853 = vmatpush1.bf16.msra.mxu1 %v5077_v52  ;;  %4362 = vmatpush3.bf16.msra.mxu0 %v5079_v53 }
 0x4a1   :  { %3854 = vmatprep.subr.bf16.mxu1 %v5293_v0  ;;  %4363 = vmatprep.subr.bf16.mxu0 %v5081_v54 }
 0x4a4   :  { %3855 = vmatpush1.bf16.msra.mxu1 %v5080_v55  ;;  %4364 = vmatpush3.bf16.msra.mxu0 %v5082_v56 }
 0x4a5   :  { %3856 = vmatprep.subr.bf16.mxu1 %v5293_v0  ;;  %4365 = vmatprep.subr.bf16.mxu0 %v5084_v57 }
 0x4a8   :  { %3857 = vmatpush1.bf16.msra.mxu1 %v5083_v58  ;;  %4366 = vmatpush3.bf16.msra.mxu0 %v5085_v59 }
 0x4a9   :  { %3858 = vmatprep.subr.bf16.mxu1 %v5293_v0  ;;  %4367 = vmatprep.subr.bf16.mxu0 %v5087_v61 }
 0x4ac   :  { %3859 = vmatpush1.bf16.msra.mxu1 %v5086_v60  ;;  %4368 = vmatpush3.bf16.msra.mxu0 %v5088_v62 }
 0x4ad   :  { %3860 = vmatprep.subr.bf16.mxu1 %v5293_v0  ;;  %4369 = vmatprep.subr.bf16.mxu0 %v5090_v1 }
 0x4b0   :  { %3861 = vmatpush1.bf16.msra.mxu1 %v5089_v63  ;;  %4370 = vmatpush3.bf16.msra.mxu0 %v5091_v2 }
 0x4b1   :  { %3862 = vmatprep.subr.bf16.mxu1 %v5293_v0  ;;  %4371 = vmatprep.subr.bf16.mxu0 %v5093_v4 }
 0x4b4   :  { %3863 = vmatpush1.bf16.msra.mxu1 %v5092_v3  ;;  %4372 = vmatpush3.bf16.msra.mxu0 %v5094_v5 }
 0x4b5   :  { %3864 = vmatprep.subr.bf16.mxu1 %v5293_v0 }
 0x4b8   :  { %3865 = vmatpush1.bf16.msra.mxu1 %v5095_v6 }
 0x56a   :  { %v3482_v12 = vpop.f32.mrb[16].mxu0  ;;  %v3568_v13 = vpop.f32.mrb[16].mxu1 }
 0x56b   :  { %v4403_v0 = vadd.f32 %v3482_v12, %v2885_v8  ;;  %v4407_v14 = vadd.f32 %v3568_v13, %v2893_v9  ;;  %v3484_v16 = vpop.f32.mrb[17].mxu0  ;;  %v3570_v18 = vpop.f32.mrb[17].mxu1 }
 0x56c   :  { %v4404_v20 = vadd.f32 %v3484_v16, %v2889_v10  ;;  %v4408_v22 = vadd.f32 %v3570_v18, %v2897_v11  ;;  %v3486_v23 = vpop.f32.mrb[18].mxu0  ;;  %v3572_v24 = vpop.f32.mrb[18].mxu1 }
 0x56d   :  { %v3577_v25 = vmul.f32 0.2, %v4403_v0  ;;  %v3579_v26 = vmul.f32 0.2, %v4407_v14  ;;  %v4405_v27 = vadd.f32 %v3486_v23, %v2885_v8  ;;  %v4409_v15 = vadd.f32 %v3572_v24, %v2893_v9  ;;  %v3488_v28 = vpop.f32.mrb[19].mxu0  ;;  %v3574_v19 = vpop.f32.mrb[19].mxu1 }
 0x56e   :  { %v3578_v29 = vmul.f32 0.2, %v4404_v20  ;;  %v3580_v17 = vmul.f32 0.2, %v4408_v22  ;;  %v4406_v30 = vadd.f32 %v3488_v28, %v2889_v10  ;;  %v4410_v21 = vadd.f32 %v3574_v19, %v2897_v11 }
 0x56f   :  { %v3581_v31 = vmul.f32 0.2, %v4405_v27  ;;  %v3583_v32 = vmul.f32 0.2, %v4409_v15  ;;  %v3585_v35 = vmax.f32 %v4403_v0, %v3577_v25  ;;  %v3587_v36 = vmax.f32 %v4407_v14, %v3579_v26 }
 0x570   :  { %v3582_v33 = vmul.f32 0.2, %v4406_v30  ;;  %v3584_v34 = vmul.f32 0.2, %v4410_v21  ;;  %v3586_v39 = vmax.f32 %v4404_v20, %v3578_v29  ;;  %v3588_v40 = vmax.f32 %v4408_v22, %v3580_v17 }
 0x571   :  { %v3589_v37 = vmax.f32 %v4405_v27, %v3581_v31  ;;  %v3591_v38 = vmax.f32 %v4409_v15, %v3583_v32 }
 0x572   :  { %v3590_v41 = vmax.f32 %v4406_v30, %v3582_v33  ;;  %v3592_v42 = vmax.f32 %v4410_v21, %v3584_v34 }
 0x573   :  { %v3644_v43 = vpack.c.bf16 %v3589_v37, %v3585_v35  ;;  %v3646_v44 = vpack.c.bf16 %v3591_v38, %v3587_v36 }
 0x574   :  { %v3647_v45 = vpack.c.bf16 %v3592_v42, %v3588_v40  ;;  %v3645_v46 = vpack.c.bf16 %v3590_v41, %v3586_v39 }
 0x576   :  { %3839 = vmatprep.mubr.bf16.mxu0 %v3645_v46  ;;  %4356 = vmatprep.mubr.msk.bf16.mxu1 %vm950_vm1, %v3647_v45 }
 0x577   :  { %3840 = vmatmul.mubr.bf16.vlgmr.msra.gmra.mrb[20].mxu0 %v3644_v43  ;;  %3881 = vmatmul.mubr.bf16.vlgmr.msra.gmra.mrb[20].mxu1 %v3646_v44 }
 0x64a   :  { %v4373_v47 = vpop.f32.mrb[20].mxu0  ;;  %v3882_v48 = vpop.f32.mrb[20].mxu1 }
 0x64b   :  { %v4374_v50 = vpop.f32.mrb[21].mxu0  ;;  %v3884_v51 = vpop.f32.mrb[21].mxu1 }
 0x64c   :  { %v4375_v52 = vadd.f32 %v4374_v50, %v4373_v47  ;;  %v4376_v53 = vpop.f32.mrb[22].mxu0  ;;  %v3885_v54 = vpop.f32.mrb[22].mxu1 }
 0x64d   :  { %v4377_v55 = vpop.f32.mrb[23].mxu0  ;;  %v3887_v56 = vpop.f32.mrb[23].mxu1 }
 0x64e   :  { %v3842_v57 = vadd.f32 %v4375_v52, %v4330_v49  ;;  %v4378_v58 = vadd.f32 %v4377_v55, %v4376_v53 }
 0x650   :  { %v3883_v59 = vadd.f32 %v3882_v48, %v3842_v57  ;;  %v3845_v60 = vadd.f32 %v4378_v58, %v4330_v49 }
 0x652   :  { %3889 = vst [vmem:[#allocation14] sm:$0xff] %v3883_v59  ;;  %v3886_v61 = vadd.f32 %v3885_v54, %v3845_v60 }
 0x654   :  { %3890 = vst [vmem:[#allocation14 + $0x8] sm:$0xff] %v3886_v61 }
 0x655   :  { %5261 = shalt.err (!%p5258_p4)
}
 0x656   :  { %s5262_s30 = scalar_lea.hbm %s5588_s13, 256 }
 0x657   :  { %p5263_p5 = scmp.ne.s32.totalorder %s5588_s13, %s5262_s30  ;;  %p5266_p6 = scmp.lt.u32.totalorder %s5262_s30, %s5588_s13 }
 0x659   :  { %p5268_p7 = pnand %p5266_p6, %p5263_p5 }
 0x65b   :  { %5271 = shalt.err (!%p5268_p7)
}
 0x65c   :  { %s5295_s0 = smov 128   ;;  %s5296_s15 = smov 8  }
 0x65d   :  { %3902 = dma.vmem_to_hbm [thread:$0]  %s3897_s16, 256, %s5588_s13, [#allocation4], %s5295_s0, %s5295_s0, %s5296_s15  }
 0x65e   :  { %5280 = dma.done.wait [#allocation4], 256  }
 0x65f   :  { %5281 = vsyncadd [#allocation4], 4294967040 }
 0x660   :  { %3906 = vsyncpa [#allocation3], 1 }
 0x661   :  { %3907 = vsyncpa [#allocation6], 1 }
 0x662   :  { %3908 = vsyncpa [#allocation9], 1 }
 0x663   :  { %3909 = vsyncpa [#allocation12], 1 }
 0x664   :  { %3910 = vsyncpa [#allocation4], 1 }

</bundles_post_ra>
